<compile_context>
chip_gen: v6e
topology: v6e:2x2x1
jax: 0.10.0
libtpu: 0.0.40
codegen_flags: <defaults>
</compile_context>

<pallas_src>
import math

import jax
import jax.numpy as jnp
from jax.experimental import pallas as pl
from jax.experimental.pallas import tpu as pltpu

_VSPEC = pl.BlockSpec(memory_space=pltpu.MemorySpace.VMEM)
_MATMUL_DTYPE = jnp.bfloat16   # MXU-native on v5e/v6e/v7x; accumulation stays f32.


# ---------------------------------------------------------------------------
# Pallas kernels
# ---------------------------------------------------------------------------
def _conv_bn_relu_kernel(x_ref, w_ref, shift_ref, o_ref):
    # x_ref     : (Kp, mt)    bf16 im2col patches (all taps folded into the contraction)
    # w_ref     : (Cout, Kp)  bf16 conv weights with the BN scale pre-folded
    # shift_ref : (Cout, 1)   f32  folded BN shift
    # o_ref     : (Cout, mt)  f32  lane-dense output (M is the lane axis)
    acc = jnp.dot(w_ref[...], x_ref[...], preferred_element_type=jnp.float32)
    o_ref[...] = jnp.maximum(acc + shift_ref[...], 0.0)


def _conv_bn_relu_add_kernel(x_ref, w_ref, shift_ref, r_ref, o_ref):
    # Same as above plus the fused residual add: relu(bn(conv2(h))) + shortcut.
    acc = jnp.dot(w_ref[...], x_ref[...], preferred_element_type=jnp.float32)
    o_ref[...] = jnp.maximum(acc + shift_ref[...], 0.0) + r_ref[...]


def _head_kernel(x_ref, w_ref, b_ref, o_ref):
    # x_ref: (C, N, H*W) -> global average pool over spatial, then Linear (transposed).
    pooled = jnp.mean(x_ref[...], axis=2)                        # (C, N)
    o_ref[...] = jnp.dot(w_ref[...], pooled,
                         preferred_element_type=jnp.float32) + b_ref[...]


# ---------------------------------------------------------------------------
# Wrappers around the kernels
# ---------------------------------------------------------------------------
def _m_tile(m, cap=1024):
    """Largest 128-multiple tile (<= cap) evenly dividing m; else one full block."""
    if m % 128 != 0:
        return m
    mt = 128
    while mt * 2 <= cap and m % (mt * 2) == 0:
        mt *= 2
    return mt


def conv_bn_relu(x, p, stride, residual=None):
    """Conv2d(no bias, 'same' pad) -> folded eval BN -> ReLU [-> + residual].

    x        : (Cin, N, H, W) f32 activations (channel-major)
    residual : optional (Cout, N, Ho, Wo) f32
    returns  : (Cout, N, Ho, Wo) f32
    """
    Cin, N, H, W = x.shape
    KH, KW, _, Cout = p["w"].shape
    pad = (KH - 1) // 2
    Ho = (H + 2 * pad - KH) // stride + 1
    Wo = (W + 2 * pad - KW) // stride + 1
    M = N * Ho * Wo

    # im2col: one (K2*Cin, M) patch matrix (taps concatenated along the contraction).
    xp = jnp.pad(x, ((0, 0), (0, 0), (pad, pad), (pad, pad)))
    taps = []
    for kh in range(KH):
        for kw in range(KW):
            sl = xp[:, :,
                    kh:kh + (Ho - 1) * stride + 1:stride,
                    kw:kw + (Wo - 1) * stride + 1:stride]
            taps.append(sl.reshape(Cin, M))
    patches = jnp.concatenate(taps, axis=0)                      # rows ordered (kh,kw,ci)

    # Fold eval-mode BatchNorm: scale into the weights, shift stays as an epilogue add.
    scale = p["gamma"] / jnp.sqrt(p["var"] + p["eps"])           # (Cout,)
    shift = (p["beta"] - p["mean"] * scale).reshape(Cout, 1)     # f32
    w = p["w"] * scale[None, None, None, :]                      # HWIO, scale folded
    w = jnp.transpose(w, (3, 0, 1, 2)).reshape(Cout, KH * KW * Cin)

    # Pad the contraction dim to a multiple of 16 (clean bf16 sublane tiling).
    K = KH * KW * Cin
    kpad = (-K) % 16
    if kpad:
        patches = jnp.pad(patches, ((0, kpad), (0, 0)))
        w = jnp.pad(w, ((0, 0), (0, kpad)))
    Kp = K + kpad

    patches = patches.astype(_MATMUL_DTYPE)
    w = w.astype(_MATMUL_DTYPE)

    mt = _m_tile(M)
    grid = (M // mt,)
    x_spec = pl.BlockSpec((Kp, mt), lambda i: (0, i))
    w_spec = pl.BlockSpec((Cout, Kp), lambda i: (0, 0))          # resident weights
    s_spec = pl.BlockSpec((Cout, 1), lambda i: (0, 0))
    o_spec = pl.BlockSpec((Cout, mt), lambda i: (0, i))
    out_shape = jax.ShapeDtypeStruct((Cout, M), jnp.float32)
    cparams = pltpu.CompilerParams(dimension_semantics=("parallel",))

    if residual is None:
        y = pl.pallas_call(
            _conv_bn_relu_kernel,
            out_shape=out_shape,
            grid=grid,
            in_specs=[x_spec, w_spec, s_spec],
            out_specs=o_spec,
            compiler_params=cparams,
        )(patches, w, shift)
    else:
        r = residual.reshape(Cout, M)
        r_spec = pl.BlockSpec((Cout, mt), lambda i: (0, i))
        y = pl.pallas_call(
            _conv_bn_relu_add_kernel,
            out_shape=out_shape,
            grid=grid,
            in_specs=[x_spec, w_spec, s_spec, r_spec],
            out_specs=o_spec,
            compiler_params=cparams,
        )(patches, w, shift, r)
    return y.reshape(Cout, N, Ho, Wo)


def block_forward(x, pblock):
    """Block.forward with downsample='pad' (default) and no renorm LayerNorms."""
    shortcut = x
    cin = x.shape[0]
    cout = pblock["conv1"]["w"].shape[-1]
    stride = 1 if cin == cout else 2

    h = conv_bn_relu(x, pblock["conv1"], stride)

    if stride == 2:
        # downsample = AvgPool2d(2,2) then zero-pad channels by cin//2 on each side.
        C, N, H, W = shortcut.shape
        sc = shortcut.reshape(C, N, H // 2, 2, W // 2, 2).mean(axis=(3, 5))
        p = cin // 2
        shortcut = jnp.pad(sc, ((p, p), (0, 0), (0, 0), (0, 0)))

    # conv2 (stride 1) with the residual add fused into the kernel (no post-add ReLU).
    return conv_bn_relu(h, pblock["conv2"], 1, residual=shortcut)


def net_forward(params, x_nchw):
    x = jnp.transpose(x_nchw, (1, 0, 2, 3)).astype(jnp.float32)  # NCHW -> (C, N, H, W)
    x = conv_bn_relu(x, params["conv1"], 1)
    for layer in ("layer1", "layer2", "layer3"):
        for blk in params[layer]:
            x = block_forward(x, blk)
    C, N, H, W = x.shape
    num_classes = params["linear_w"].shape[1]
    # Head: fused global average pool + Linear (computed transposed, (ncls, N)).
    logits_t = pl.pallas_call(
        _head_kernel,
        out_shape=jax.ShapeDtypeStruct((num_classes, N), jnp.float32),
        in_specs=[_VSPEC, _VSPEC, _VSPEC],
        out_specs=_VSPEC,
    )(x.reshape(C, N, H * W),
      params["linear_w"].T,
      params["linear_b"].reshape(num_classes, 1))
    return logits_t.T


# ---------------------------------------------------------------------------
# Deterministic parameter initialization (shapes from Net.__init__)
# ---------------------------------------------------------------------------
def _xavier_uniform(key, kh, kw, cin, cout):
    fan_in = cin * kh * kw
    fan_out = cout * kh * kw
    bound = math.sqrt(6.0 / (fan_in + fan_out))
    return jax.random.uniform(key, (kh, kw, cin, cout), jnp.float32, -bound, bound)


def _conv_bn_params(key, cin, cout, k):
    return {
        "w": _xavier_uniform(key, k, k, cin, cout),
        "gamma": jnp.ones((cout,), jnp.float32),
        "beta": jnp.zeros((cout,), jnp.float32),
        "mean": jnp.zeros((cout,), jnp.float32),   # BatchNorm running_mean (init)
        "var": jnp.ones((cout,), jnp.float32),     # BatchNorm running_var  (init)
        "eps": 1e-3,                               # matches nn.BatchNorm2d(..., eps=0.001)
    }


def init_net_params(key, num_blocks=1, num_classes=10, kernel_size=3):
    keys = iter(jax.random.split(key, 64))
    params = {"conv1": _conv_bn_params(next(keys), 3, 16, 3)}

    def make_layer(cin, cout):
        blocks = []
        in_channels = [cin] + [cout] * (num_blocks - 1)
        for ic in in_channels:
            blocks.append({
                "conv1": _conv_bn_params(next(keys), ic, cout, kernel_size),
                "conv2": _conv_bn_params(next(keys), cout, cout, kernel_size),
            })
        return blocks

    params["layer1"] = make_layer(16, 16)
    params["layer2"] = make_layer(16, 32)
    params["layer3"] = make_layer(32, 64)

    scale = math.sqrt(3.0 / 64)  # nn.init.uniform_(linear.weight, -sqrt(3/in), sqrt(3/in))
    params["linear_w"] = jax.random.uniform(next(keys), (64, num_classes),
                                            jnp.float32, -scale, scale)
    params["linear_b"] = jnp.zeros((num_classes,), jnp.float32)
    return params


if __name__ == "__main__":
    key = jax.random.PRNGKey(0)
    pkey, xkey = jax.random.split(key)
    params = init_net_params(pkey, num_blocks=1, num_classes=10)

    # Small deterministic CIFAR-shaped input: batch=2, 3 channels, 32x32 spatial (NCHW).
    x = jax.random.normal(xkey, (2, 3, 32, 32), jnp.float32)

    logits = jax.jit(net_forward)(params, x)
    logits = jax.block_until_ready(logits)
    assert logits.shape == (2, 10), logits.shape
    assert bool(jnp.all(jnp.isfinite(logits)))
    print("KERNEL_OK")
</pallas_src>

<mosaic_0001>
module attributes {stable_mosaic.version = 11 : i64} {
  func.func @_conv_bn_relu_kernel(%arg0: i32, %arg1: memref<32x1024xbf16, #tpu.memory_space<vmem>>, %arg2: memref<16x32xbf16, #tpu.memory_space<vmem>>, %arg3: memref<16x1xf32, #tpu.memory_space<vmem>>, %arg4: memref<16x1024xf32, #tpu.memory_space<vmem>>) attributes {dimension_semantics = [#tpu.dimension_semantics<parallel>], iteration_bounds = array<i64: 2>, scalar_prefetch = 0 : i64, scratch_operands = 0 : i64, tpu.core_type = #tpu.core_type<tc>, window_params = [{transform_indices = @transform_0, window_bounds = array<i64: 32, 1024>}, {pipeline_mode = #tpu.pipeline_mode<synchronous>, transform_indices = @transform_1, window_bounds = array<i64: 16, 32>}, {pipeline_mode = #tpu.pipeline_mode<synchronous>, transform_indices = @transform_2, window_bounds = array<i64: 16, 1>}, {transform_indices = @transform_3, window_bounds = array<i64: 16, 1024>}]} {
    %c0 = arith.constant 0 : index
    %c0_0 = arith.constant 0 : index
    %0 = vector.load %arg2[%c0, %c0_0] : memref<16x32xbf16, #tpu.memory_space<vmem>>, vector<16x32xbf16>
    %c0_1 = arith.constant 0 : index
    %c0_2 = arith.constant 0 : index
    %1 = vector.load %arg1[%c0_1, %c0_2] : memref<32x1024xbf16, #tpu.memory_space<vmem>>, vector<32x1024xbf16>
    %cst = arith.constant dense<0.000000e+00> : vector<16x1024xf32>
    %2 = tpu.matmul %0, %1, %cst {dimension_numbers = #tpu.dot_dimension_numbers<[1], [0], [0], [1], [0, 0, 1, 1], [], []>} : vector<16x32xbf16>, vector<32x1024xbf16>, vector<16x1024xf32> -> vector<16x1024xf32>
    %c0_3 = arith.constant 0 : index
    %c0_4 = arith.constant 0 : index
    %3 = vector.load %arg3[%c0_3, %c0_4] : memref<16x1xf32, #tpu.memory_space<vmem>>, vector<16x1xf32>
    %4 = vector.broadcast %3 : vector<16x1xf32> to vector<16x1024xf32>
    %5 = arith.addf %2, %4 : vector<16x1024xf32>
    %cst_5 = arith.constant 0.000000e+00 : f32
    %6 = vector.broadcast %cst_5 : f32 to vector<16x1024xf32>
    %7 = arith.maximumf %5, %6 : vector<16x1024xf32>
    %c0_6 = arith.constant 0 : index
    %c0_7 = arith.constant 0 : index
    %8 = vector.load %arg4[%c0_6, %c0_7] : memref<16x1024xf32, #tpu.memory_space<vmem>>, vector<16x1024xf32>
    tpu.vector_store %arg4[%c0_6, %c0_7], %7 {strides = array<i32>} : memref<16x1024xf32, #tpu.memory_space<vmem>>, vector<16x1024xf32>,
    return
  }
  func.func @transform_0(%arg0: i32) -> (i32, i32) {
    %c0_i32 = arith.constant 0 : i32
    %c0_i32_0 = arith.constant 0 : i32
    return %c0_i32, %arg0 : i32, i32
  }
  func.func @transform_1(%arg0: i32) -> (i32, i32) {
    %c0_i32 = arith.constant 0 : i32
    %c0_i32_0 = arith.constant 0 : i32
    %c0_i32_1 = arith.constant 0 : i32
    return %c0_i32, %c0_i32_0 : i32, i32
  }
  func.func @transform_2(%arg0: i32) -> (i32, i32) {
    %c0_i32 = arith.constant 0 : i32
    %c0_i32_0 = arith.constant 0 : i32
    %c0_i32_1 = arith.constant 0 : i32
    return %c0_i32, %c0_i32_0 : i32, i32
  }
  func.func @transform_3(%arg0: i32) -> (i32, i32) {
    %c0_i32 = arith.constant 0 : i32
    %c0_i32_0 = arith.constant 0 : i32
    return %c0_i32, %arg0 : i32, i32
  }
}

module attributes {stable_mosaic.version = 11 : i64} {
  func.func @_conv_bn_relu_kernel(%arg0: i32, %arg1: memref<144x1024xbf16, #tpu.memory_space<vmem>>, %arg2: memref<16x144xbf16, #tpu.memory_space<vmem>>, %arg3: memref<16x1xf32, #tpu.memory_space<vmem>>, %arg4: memref<16x1024xf32, #tpu.memory_space<vmem>>) attributes {dimension_semantics = [#tpu.dimension_semantics<parallel>], iteration_bounds = array<i64: 2>, scalar_prefetch = 0 : i64, scratch_operands = 0 : i64, tpu.core_type = #tpu.core_type<tc>, window_params = [{transform_indices = @transform_0, window_bounds = array<i64: 144, 1024>}, {pipeline_mode = #tpu.pipeline_mode<synchronous>, transform_indices = @transform_1, window_bounds = array<i64: 16, 144>}, {pipeline_mode = #tpu.pipeline_mode<synchronous>, transform_indices = @transform_2, window_bounds = array<i64: 16, 1>}, {transform_indices = @transform_3, window_bounds = array<i64: 16, 1024>}]} {
    %c0 = arith.constant 0 : index
    %c0_0 = arith.constant 0 : index
    %0 = vector.load %arg2[%c0, %c0_0] : memref<16x144xbf16, #tpu.memory_space<vmem>>, vector<16x144xbf16>
    %c0_1 = arith.constant 0 : index
    %c0_2 = arith.constant 0 : index
    %1 = vector.load %arg1[%c0_1, %c0_2] : memref<144x1024xbf16, #tpu.memory_space<vmem>>, vector<144x1024xbf16>
    %cst = arith.constant dense<0.000000e+00> : vector<16x1024xf32>
    %2 = tpu.matmul %0, %1, %cst {dimension_numbers = #tpu.dot_dimension_numbers<[1], [0], [0], [1], [0, 0, 1, 1], [], []>} : vector<16x144xbf16>, vector<144x1024xbf16>, vector<16x1024xf32> -> vector<16x1024xf32>
    %c0_3 = arith.constant 0 : index
    %c0_4 = arith.constant 0 : index
    %3 = vector.load %arg3[%c0_3, %c0_4] : memref<16x1xf32, #tpu.memory_space<vmem>>, vector<16x1xf32>
    %4 = vector.broadcast %3 : vector<16x1xf32> to vector<16x1024xf32>
    %5 = arith.addf %2, %4 : vector<16x1024xf32>
    %cst_5 = arith.constant 0.000000e+00 : f32
    %6 = vector.broadcast %cst_5 : f32 to vector<16x1024xf32>
    %7 = arith.maximumf %5, %6 : vector<16x1024xf32>
    %c0_6 = arith.constant 0 : index
    %c0_7 = arith.constant 0 : index
    %8 = vector.load %arg4[%c0_6, %c0_7] : memref<16x1024xf32, #tpu.memory_space<vmem>>, vector<16x1024xf32>
    tpu.vector_store %arg4[%c0_6, %c0_7], %7 {strides = array<i32>} : memref<16x1024xf32, #tpu.memory_space<vmem>>, vector<16x1024xf32>,
    return
  }
  func.func @transform_0(%arg0: i32) -> (i32, i32) {
    %c0_i32 = arith.constant 0 : i32
    %c0_i32_0 = arith.constant 0 : i32
    return %c0_i32, %arg0 : i32, i32
  }
  func.func @transform_1(%arg0: i32) -> (i32, i32) {
    %c0_i32 = arith.constant 0 : i32
    %c0_i32_0 = arith.constant 0 : i32
    %c0_i32_1 = arith.constant 0 : i32
    return %c0_i32, %c0_i32_0 : i32, i32
  }
  func.func @transform_2(%arg0: i32) -> (i32, i32) {
    %c0_i32 = arith.constant 0 : i32
    %c0_i32_0 = arith.constant 0 : i32
    %c0_i32_1 = arith.constant 0 : i32
    return %c0_i32, %c0_i32_0 : i32, i32
  }
  func.func @transform_3(%arg0: i32) -> (i32, i32) {
    %c0_i32 = arith.constant 0 : i32
    %c0_i32_0 = arith.constant 0 : i32
    return %c0_i32, %arg0 : i32, i32
  }
}

module attributes {stable_mosaic.version = 11 : i64} {
  func.func @_conv_bn_relu_add_kernel(%arg0: i32, %arg1: memref<144x1024xbf16, #tpu.memory_space<vmem>>, %arg2: memref<16x144xbf16, #tpu.memory_space<vmem>>, %arg3: memref<16x1xf32, #tpu.memory_space<vmem>>, %arg4: memref<16x1024xf32, #tpu.memory_space<vmem>>, %arg5: memref<16x1024xf32, #tpu.memory_space<vmem>>) attributes {dimension_semantics = [#tpu.dimension_semantics<parallel>], iteration_bounds = array<i64: 2>, scalar_prefetch = 0 : i64, scratch_operands = 0 : i64, tpu.core_type = #tpu.core_type<tc>, window_params = [{transform_indices = @transform_0, window_bounds = array<i64: 144, 1024>}, {pipeline_mode = #tpu.pipeline_mode<synchronous>, transform_indices = @transform_1, window_bounds = array<i64: 16, 144>}, {pipeline_mode = #tpu.pipeline_mode<synchronous>, transform_indices = @transform_2, window_bounds = array<i64: 16, 1>}, {transform_indices = @transform_3, window_bounds = array<i64: 16, 1024>}, {transform_indices = @transform_4, window_bounds = array<i64: 16, 1024>}]} {
    %c0 = arith.constant 0 : index
    %c0_0 = arith.constant 0 : index
    %0 = vector.load %arg2[%c0, %c0_0] : memref<16x144xbf16, #tpu.memory_space<vmem>>, vector<16x144xbf16>
    %c0_1 = arith.constant 0 : index
    %c0_2 = arith.constant 0 : index
    %1 = vector.load %arg1[%c0_1, %c0_2] : memref<144x1024xbf16, #tpu.memory_space<vmem>>, vector<144x1024xbf16>
    %cst = arith.constant dense<0.000000e+00> : vector<16x1024xf32>
    %2 = tpu.matmul %0, %1, %cst {dimension_numbers = #tpu.dot_dimension_numbers<[1], [0], [0], [1], [0, 0, 1, 1], [], []>} : vector<16x144xbf16>, vector<144x1024xbf16>, vector<16x1024xf32> -> vector<16x1024xf32>
    %c0_3 = arith.constant 0 : index
    %c0_4 = arith.constant 0 : index
    %3 = vector.load %arg3[%c0_3, %c0_4] : memref<16x1xf32, #tpu.memory_space<vmem>>, vector<16x1xf32>
    %4 = vector.broadcast %3 : vector<16x1xf32> to vector<16x1024xf32>
    %5 = arith.addf %2, %4 : vector<16x1024xf32>
    %cst_5 = arith.constant 0.000000e+00 : f32
    %6 = vector.broadcast %cst_5 : f32 to vector<16x1024xf32>
    %7 = arith.maximumf %5, %6 : vector<16x1024xf32>
    %c0_6 = arith.constant 0 : index
    %c0_7 = arith.constant 0 : index
    %8 = vector.load %arg4[%c0_6, %c0_7] : memref<16x1024xf32, #tpu.memory_space<vmem>>, vector<16x1024xf32>
    %9 = arith.addf %7, %8 : vector<16x1024xf32>
    %c0_8 = arith.constant 0 : index
    %c0_9 = arith.constant 0 : index
    %10 = vector.load %arg5[%c0_8, %c0_9] : memref<16x1024xf32, #tpu.memory_space<vmem>>, vector<16x1024xf32>
    tpu.vector_store %arg5[%c0_8, %c0_9], %9 {strides = array<i32>} : memref<16x1024xf32, #tpu.memory_space<vmem>>, vector<16x1024xf32>,
    return
  }
  func.func @transform_0(%arg0: i32) -> (i32, i32) {
    %c0_i32 = arith.constant 0 : i32
    %c0_i32_0 = arith.constant 0 : i32
    return %c0_i32, %arg0 : i32, i32
  }
  func.func @transform_1(%arg0: i32) -> (i32, i32) {
    %c0_i32 = arith.constant 0 : i32
    %c0_i32_0 = arith.constant 0 : i32
    %c0_i32_1 = arith.constant 0 : i32
    return %c0_i32, %c0_i32_0 : i32, i32
  }
  func.func @transform_2(%arg0: i32) -> (i32, i32) {
    %c0_i32 = arith.constant 0 : i32
    %c0_i32_0 = arith.constant 0 : i32
    %c0_i32_1 = arith.constant 0 : i32
    return %c0_i32, %c0_i32_0 : i32, i32
  }
  func.func @transform_3(%arg0: i32) -> (i32, i32) {
    %c0_i32 = arith.constant 0 : i32
    %c0_i32_0 = arith.constant 0 : i32
    return %c0_i32, %arg0 : i32, i32
  }
  func.func @transform_4(%arg0: i32) -> (i32, i32) {
    %c0_i32 = arith.constant 0 : i32
    %c0_i32_0 = arith.constant 0 : i32
    return %c0_i32, %arg0 : i32, i32
  }
}

module attributes {stable_mosaic.version = 11 : i64} {
  func.func @_conv_bn_relu_kernel(%arg0: i32, %arg1: memref<144x512xbf16, #tpu.memory_space<vmem>>, %arg2: memref<32x144xbf16, #tpu.memory_space<vmem>>, %arg3: memref<32x1xf32, #tpu.memory_space<vmem>>, %arg4: memref<32x512xf32, #tpu.memory_space<vmem>>) attributes {dimension_semantics = [#tpu.dimension_semantics<parallel>], iteration_bounds = array<i64: 1>, scalar_prefetch = 0 : i64, scratch_operands = 0 : i64, tpu.core_type = #tpu.core_type<tc>, window_params = [{transform_indices = @transform_0, window_bounds = array<i64: 144, 512>}, {pipeline_mode = #tpu.pipeline_mode<synchronous>, transform_indices = @transform_1, window_bounds = array<i64: 32, 144>}, {pipeline_mode = #tpu.pipeline_mode<synchronous>, transform_indices = @transform_2, window_bounds = array<i64: 32, 1>}, {transform_indices = @transform_3, window_bounds = array<i64: 32, 512>}]} {
    %c0 = arith.constant 0 : index
    %c0_0 = arith.constant 0 : index
    %0 = vector.load %arg2[%c0, %c0_0] : memref<32x144xbf16, #tpu.memory_space<vmem>>, vector<32x144xbf16>
    %c0_1 = arith.constant 0 : index
    %c0_2 = arith.constant 0 : index
    %1 = vector.load %arg1[%c0_1, %c0_2] : memref<144x512xbf16, #tpu.memory_space<vmem>>, vector<144x512xbf16>
    %cst = arith.constant dense<0.000000e+00> : vector<32x512xf32>
    %2 = tpu.matmul %0, %1, %cst {dimension_numbers = #tpu.dot_dimension_numbers<[1], [0], [0], [1], [0, 0, 1, 1], [], []>} : vector<32x144xbf16>, vector<144x512xbf16>, vector<32x512xf32> -> vector<32x512xf32>
    %c0_3 = arith.constant 0 : index
    %c0_4 = arith.constant 0 : index
    %3 = vector.load %arg3[%c0_3, %c0_4] : memref<32x1xf32, #tpu.memory_space<vmem>>, vector<32x1xf32>
    %4 = vector.broadcast %3 : vector<32x1xf32> to vector<32x512xf32>
    %5 = arith.addf %2, %4 : vector<32x512xf32>
    %cst_5 = arith.constant 0.000000e+00 : f32
    %6 = vector.broadcast %cst_5 : f32 to vector<32x512xf32>
    %7 = arith.maximumf %5, %6 : vector<32x512xf32>
    %c0_6 = arith.constant 0 : index
    %c0_7 = arith.constant 0 : index
    %8 = vector.load %arg4[%c0_6, %c0_7] : memref<32x512xf32, #tpu.memory_space<vmem>>, vector<32x512xf32>
    tpu.vector_store %arg4[%c0_6, %c0_7], %7 {strides = array<i32>} : memref<32x512xf32, #tpu.memory_space<vmem>>, vector<32x512xf32>,
    return
  }
  func.func @transform_0(%arg0: i32) -> (i32, i32) {
    %c0_i32 = arith.constant 0 : i32
    %c0_i32_0 = arith.constant 0 : i32
    return %c0_i32, %arg0 : i32, i32
  }
  func.func @transform_1(%arg0: i32) -> (i32, i32) {
    %c0_i32 = arith.constant 0 : i32
    %c0_i32_0 = arith.constant 0 : i32
    %c0_i32_1 = arith.constant 0 : i32
    return %c0_i32, %c0_i32_0 : i32, i32
  }
  func.func @transform_2(%arg0: i32) -> (i32, i32) {
    %c0_i32 = arith.constant 0 : i32
    %c0_i32_0 = arith.constant 0 : i32
    %c0_i32_1 = arith.constant 0 : i32
    return %c0_i32, %c0_i32_0 : i32, i32
  }
  func.func @transform_3(%arg0: i32) -> (i32, i32) {
    %c0_i32 = arith.constant 0 : i32
    %c0_i32_0 = arith.constant 0 : i32
    return %c0_i32, %arg0 : i32, i32
  }
}

module attributes {stable_mosaic.version = 11 : i64} {
  func.func @_conv_bn_relu_add_kernel(%arg0: i32, %arg1: memref<288x512xbf16, #tpu.memory_space<vmem>>, %arg2: memref<32x288xbf16, #tpu.memory_space<vmem>>, %arg3: memref<32x1xf32, #tpu.memory_space<vmem>>, %arg4: memref<32x512xf32, #tpu.memory_space<vmem>>, %arg5: memref<32x512xf32, #tpu.memory_space<vmem>>) attributes {dimension_semantics = [#tpu.dimension_semantics<parallel>], iteration_bounds = array<i64: 1>, scalar_prefetch = 0 : i64, scratch_operands = 0 : i64, tpu.core_type = #tpu.core_type<tc>, window_params = [{transform_indices = @transform_0, window_bounds = array<i64: 288, 512>}, {pipeline_mode = #tpu.pipeline_mode<synchronous>, transform_indices = @transform_1, window_bounds = array<i64: 32, 288>}, {pipeline_mode = #tpu.pipeline_mode<synchronous>, transform_indices = @transform_2, window_bounds = array<i64: 32, 1>}, {transform_indices = @transform_3, window_bounds = array<i64: 32, 512>}, {transform_indices = @transform_4, window_bounds = array<i64: 32, 512>}]} {
    %c0 = arith.constant 0 : index
    %c0_0 = arith.constant 0 : index
    %0 = vector.load %arg2[%c0, %c0_0] : memref<32x288xbf16, #tpu.memory_space<vmem>>, vector<32x288xbf16>
    %c0_1 = arith.constant 0 : index
    %c0_2 = arith.constant 0 : index
    %1 = vector.load %arg1[%c0_1, %c0_2] : memref<288x512xbf16, #tpu.memory_space<vmem>>, vector<288x512xbf16>
    %cst = arith.constant dense<0.000000e+00> : vector<32x512xf32>
    %2 = tpu.matmul %0, %1, %cst {dimension_numbers = #tpu.dot_dimension_numbers<[1], [0], [0], [1], [0, 0, 1, 1], [], []>} : vector<32x288xbf16>, vector<288x512xbf16>, vector<32x512xf32> -> vector<32x512xf32>
    %c0_3 = arith.constant 0 : index
    %c0_4 = arith.constant 0 : index
    %3 = vector.load %arg3[%c0_3, %c0_4] : memref<32x1xf32, #tpu.memory_space<vmem>>, vector<32x1xf32>
    %4 = vector.broadcast %3 : vector<32x1xf32> to vector<32x512xf32>
    %5 = arith.addf %2, %4 : vector<32x512xf32>
    %cst_5 = arith.constant 0.000000e+00 : f32
    %6 = vector.broadcast %cst_5 : f32 to vector<32x512xf32>
    %7 = arith.maximumf %5, %6 : vector<32x512xf32>
    %c0_6 = arith.constant 0 : index
    %c0_7 = arith.constant 0 : index
    %8 = vector.load %arg4[%c0_6, %c0_7] : memref<32x512xf32, #tpu.memory_space<vmem>>, vector<32x512xf32>
    %9 = arith.addf %7, %8 : vector<32x512xf32>
    %c0_8 = arith.constant 0 : index
    %c0_9 = arith.constant 0 : index
    %10 = vector.load %arg5[%c0_8, %c0_9] : memref<32x512xf32, #tpu.memory_space<vmem>>, vector<32x512xf32>
    tpu.vector_store %arg5[%c0_8, %c0_9], %9 {strides = array<i32>} : memref<32x512xf32, #tpu.memory_space<vmem>>, vector<32x512xf32>,
    return
  }
  func.func @transform_0(%arg0: i32) -> (i32, i32) {
    %c0_i32 = arith.constant 0 : i32
    %c0_i32_0 = arith.constant 0 : i32
    return %c0_i32, %arg0 : i32, i32
  }
  func.func @transform_1(%arg0: i32) -> (i32, i32) {
    %c0_i32 = arith.constant 0 : i32
    %c0_i32_0 = arith.constant 0 : i32
    %c0_i32_1 = arith.constant 0 : i32
    return %c0_i32, %c0_i32_0 : i32, i32
  }
  func.func @transform_2(%arg0: i32) -> (i32, i32) {
    %c0_i32 = arith.constant 0 : i32
    %c0_i32_0 = arith.constant 0 : i32
    %c0_i32_1 = arith.constant 0 : i32
    return %c0_i32, %c0_i32_0 : i32, i32
  }
  func.func @transform_3(%arg0: i32) -> (i32, i32) {
    %c0_i32 = arith.constant 0 : i32
    %c0_i32_0 = arith.constant 0 : i32
    return %c0_i32, %arg0 : i32, i32
  }
  func.func @transform_4(%arg0: i32) -> (i32, i32) {
    %c0_i32 = arith.constant 0 : i32
    %c0_i32_0 = arith.constant 0 : i32
    return %c0_i32, %arg0 : i32, i32
  }
}

module attributes {stable_mosaic.version = 11 : i64} {
  func.func @_conv_bn_relu_kernel(%arg0: i32, %arg1: memref<288x128xbf16, #tpu.memory_space<vmem>>, %arg2: memref<64x288xbf16, #tpu.memory_space<vmem>>, %arg3: memref<64x1xf32, #tpu.memory_space<vmem>>, %arg4: memref<64x128xf32, #tpu.memory_space<vmem>>) attributes {dimension_semantics = [#tpu.dimension_semantics<parallel>], iteration_bounds = array<i64: 1>, scalar_prefetch = 0 : i64, scratch_operands = 0 : i64, tpu.core_type = #tpu.core_type<tc>, window_params = [{transform_indices = @transform_0, window_bounds = array<i64: 288, 128>}, {pipeline_mode = #tpu.pipeline_mode<synchronous>, transform_indices = @transform_1, window_bounds = array<i64: 64, 288>}, {pipeline_mode = #tpu.pipeline_mode<synchronous>, transform_indices = @transform_2, window_bounds = array<i64: 64, 1>}, {transform_indices = @transform_3, window_bounds = array<i64: 64, 128>}]} {
    %c0 = arith.constant 0 : index
    %c0_0 = arith.constant 0 : index
    %0 = vector.load %arg2[%c0, %c0_0] : memref<64x288xbf16, #tpu.memory_space<vmem>>, vector<64x288xbf16>
    %c0_1 = arith.constant 0 : index
    %c0_2 = arith.constant 0 : index
    %1 = vector.load %arg1[%c0_1, %c0_2] : memref<288x128xbf16, #tpu.memory_space<vmem>>, vector<288x128xbf16>
    %cst = arith.constant dense<0.000000e+00> : vector<64x128xf32>
    %2 = tpu.matmul %0, %1, %cst {dimension_numbers = #tpu.dot_dimension_numbers<[1], [0], [0], [1], [0, 0, 1, 1], [], []>} : vector<64x288xbf16>, vector<288x128xbf16>, vector<64x128xf32> -> vector<64x128xf32>
    %c0_3 = arith.constant 0 : index
    %c0_4 = arith.constant 0 : index
    %3 = vector.load %arg3[%c0_3, %c0_4] : memref<64x1xf32, #tpu.memory_space<vmem>>, vector<64x1xf32>
    %4 = vector.broadcast %3 : vector<64x1xf32> to vector<64x128xf32>
    %5 = arith.addf %2, %4 : vector<64x128xf32>
    %cst_5 = arith.constant 0.000000e+00 : f32
    %6 = vector.broadcast %cst_5 : f32 to vector<64x128xf32>
    %7 = arith.maximumf %5, %6 : vector<64x128xf32>
    %c0_6 = arith.constant 0 : index
    %c0_7 = arith.constant 0 : index
    %8 = vector.load %arg4[%c0_6, %c0_7] : memref<64x128xf32, #tpu.memory_space<vmem>>, vector<64x128xf32>
    tpu.vector_store %arg4[%c0_6, %c0_7], %7 {strides = array<i32>} : memref<64x128xf32, #tpu.memory_space<vmem>>, vector<64x128xf32>,
    return
  }
  func.func @transform_0(%arg0: i32) -> (i32, i32) {
    %c0_i32 = arith.constant 0 : i32
    %c0_i32_0 = arith.constant 0 : i32
    return %c0_i32, %arg0 : i32, i32
  }
  func.func @transform_1(%arg0: i32) -> (i32, i32) {
    %c0_i32 = arith.constant 0 : i32
    %c0_i32_0 = arith.constant 0 : i32
    %c0_i32_1 = arith.constant 0 : i32
    return %c0_i32, %c0_i32_0 : i32, i32
  }
  func.func @transform_2(%arg0: i32) -> (i32, i32) {
    %c0_i32 = arith.constant 0 : i32
    %c0_i32_0 = arith.constant 0 : i32
    %c0_i32_1 = arith.constant 0 : i32
    return %c0_i32, %c0_i32_0 : i32, i32
  }
  func.func @transform_3(%arg0: i32) -> (i32, i32) {
    %c0_i32 = arith.constant 0 : i32
    %c0_i32_0 = arith.constant 0 : i32
    return %c0_i32, %arg0 : i32, i32
  }
}

module attributes {stable_mosaic.version = 11 : i64} {
  func.func @_conv_bn_relu_add_kernel(%arg0: i32, %arg1: memref<576x128xbf16, #tpu.memory_space<vmem>>, %arg2: memref<64x576xbf16, #tpu.memory_space<vmem>>, %arg3: memref<64x1xf32, #tpu.memory_space<vmem>>, %arg4: memref<64x128xf32, #tpu.memory_space<vmem>>, %arg5: memref<64x128xf32, #tpu.memory_space<vmem>>) attributes {dimension_semantics = [#tpu.dimension_semantics<parallel>], iteration_bounds = array<i64: 1>, scalar_prefetch = 0 : i64, scratch_operands = 0 : i64, tpu.core_type = #tpu.core_type<tc>, window_params = [{transform_indices = @transform_0, window_bounds = array<i64: 576, 128>}, {pipeline_mode = #tpu.pipeline_mode<synchronous>, transform_indices = @transform_1, window_bounds = array<i64: 64, 576>}, {pipeline_mode = #tpu.pipeline_mode<synchronous>, transform_indices = @transform_2, window_bounds = array<i64: 64, 1>}, {transform_indices = @transform_3, window_bounds = array<i64: 64, 128>}, {transform_indices = @transform_4, window_bounds = array<i64: 64, 128>}]} {
    %c0 = arith.constant 0 : index
    %c0_0 = arith.constant 0 : index
    %0 = vector.load %arg2[%c0, %c0_0] : memref<64x576xbf16, #tpu.memory_space<vmem>>, vector<64x576xbf16>
    %c0_1 = arith.constant 0 : index
    %c0_2 = arith.constant 0 : index
    %1 = vector.load %arg1[%c0_1, %c0_2] : memref<576x128xbf16, #tpu.memory_space<vmem>>, vector<576x128xbf16>
    %cst = arith.constant dense<0.000000e+00> : vector<64x128xf32>
    %2 = tpu.matmul %0, %1, %cst {dimension_numbers = #tpu.dot_dimension_numbers<[1], [0], [0], [1], [0, 0, 1, 1], [], []>} : vector<64x576xbf16>, vector<576x128xbf16>, vector<64x128xf32> -> vector<64x128xf32>
    %c0_3 = arith.constant 0 : index
    %c0_4 = arith.constant 0 : index
    %3 = vector.load %arg3[%c0_3, %c0_4] : memref<64x1xf32, #tpu.memory_space<vmem>>, vector<64x1xf32>
    %4 = vector.broadcast %3 : vector<64x1xf32> to vector<64x128xf32>
    %5 = arith.addf %2, %4 : vector<64x128xf32>
    %cst_5 = arith.constant 0.000000e+00 : f32
    %6 = vector.broadcast %cst_5 : f32 to vector<64x128xf32>
    %7 = arith.maximumf %5, %6 : vector<64x128xf32>
    %c0_6 = arith.constant 0 : index
    %c0_7 = arith.constant 0 : index
    %8 = vector.load %arg4[%c0_6, %c0_7] : memref<64x128xf32, #tpu.memory_space<vmem>>, vector<64x128xf32>
    %9 = arith.addf %7, %8 : vector<64x128xf32>
    %c0_8 = arith.constant 0 : index
    %c0_9 = arith.constant 0 : index
    %10 = vector.load %arg5[%c0_8, %c0_9] : memref<64x128xf32, #tpu.memory_space<vmem>>, vector<64x128xf32>
    tpu.vector_store %arg5[%c0_8, %c0_9], %9 {strides = array<i32>} : memref<64x128xf32, #tpu.memory_space<vmem>>, vector<64x128xf32>,
    return
  }
  func.func @transform_0(%arg0: i32) -> (i32, i32) {
    %c0_i32 = arith.constant 0 : i32
    %c0_i32_0 = arith.constant 0 : i32
    return %c0_i32, %arg0 : i32, i32
  }
  func.func @transform_1(%arg0: i32) -> (i32, i32) {
    %c0_i32 = arith.constant 0 : i32
    %c0_i32_0 = arith.constant 0 : i32
    %c0_i32_1 = arith.constant 0 : i32
    return %c0_i32, %c0_i32_0 : i32, i32
  }
  func.func @transform_2(%arg0: i32) -> (i32, i32) {
    %c0_i32 = arith.constant 0 : i32
    %c0_i32_0 = arith.constant 0 : i32
    %c0_i32_1 = arith.constant 0 : i32
    return %c0_i32, %c0_i32_0 : i32, i32
  }
  func.func @transform_3(%arg0: i32) -> (i32, i32) {
    %c0_i32 = arith.constant 0 : i32
    %c0_i32_0 = arith.constant 0 : i32
    return %c0_i32, %arg0 : i32, i32
  }
  func.func @transform_4(%arg0: i32) -> (i32, i32) {
    %c0_i32 = arith.constant 0 : i32
    %c0_i32_0 = arith.constant 0 : i32
    return %c0_i32, %arg0 : i32, i32
  }
}

module attributes {stable_mosaic.version = 11 : i64} {
  func.func @_head_kernel(%arg0: memref<64x2x64xf32, #tpu.memory_space<vmem>>, %arg1: memref<10x64xf32, #tpu.memory_space<vmem>>, %arg2: memref<10x1xf32, #tpu.memory_space<vmem>>, %arg3: memref<10x2xf32, #tpu.memory_space<vmem>>) attributes {dimension_semantics = [], scalar_prefetch = 0 : i64, scratch_operands = 0 : i64, tpu.core_type = #tpu.core_type<tc>} {
    %c0 = arith.constant 0 : index
    %c0_0 = arith.constant 0 : index
    %c0_1 = arith.constant 0 : index
    %0 = vector.load %arg0[%c0, %c0_0, %c0_1] : memref<64x2x64xf32, #tpu.memory_space<vmem>>, vector<64x2x64xf32>
    %cst = arith.constant dense<0.000000e+00> : vector<64x2xf32>
    %1 = vector.multi_reduction <add>, %0, %cst [2] : vector<64x2x64xf32> to vector<64x2xf32>
    %cst_2 = arith.constant 6.400000e+01 : f32
    %2 = vector.broadcast %cst_2 : f32 to vector<64x2xf32>
    %3 = arith.divf %1, %2 : vector<64x2xf32>
    %c0_3 = arith.constant 0 : index
    %c0_4 = arith.constant 0 : index
    %4 = vector.load %arg1[%c0_3, %c0_4] : memref<10x64xf32, #tpu.memory_space<vmem>>, vector<10x64xf32>
    %cst_5 = arith.constant dense<0.000000e+00> : vector<10x2xf32>
    %5 = tpu.matmul %4, %3, %cst_5 {dimension_numbers = #tpu.dot_dimension_numbers<[1], [0], [0], [1], [0, 0, 1, 1], [], []>} : vector<10x64xf32>, vector<64x2xf32>, vector<10x2xf32> -> vector<10x2xf32>
    %c0_6 = arith.constant 0 : index
    %c0_7 = arith.constant 0 : index
    %6 = vector.load %arg2[%c0_6, %c0_7] : memref<10x1xf32, #tpu.memory_space<vmem>>, vector<10x1xf32>
    %7 = vector.broadcast %6 : vector<10x1xf32> to vector<10x2xf32>
    %8 = arith.addf %5, %7 : vector<10x2xf32>
    %c0_8 = arith.constant 0 : index
    %c0_9 = arith.constant 0 : index
    %9 = vector.load %arg3[%c0_8, %c0_9] : memref<10x2xf32, #tpu.memory_space<vmem>>, vector<10x2xf32>
    tpu.vector_store %arg3[%c0_8, %c0_9], %8 {strides = array<i32>} : memref<10x2xf32, #tpu.memory_space<vmem>>, vector<10x2xf32>,
    return
  }
}

</mosaic_0001>

<bundles_post_ra>
// kernel: net_forward.8
= control target key start
LH: loop header
LB: loop body
LE: loop exit
PB: predicated region body
PF: predicated region fallthrough
CT: control target
= control target key end

     0   :  { %s764_s12 = smov 0   ;;  %s766_s13 = smov 0   ;;  %s911_s0 = inlined_call_operand.vmem [shape: bf16[32,2048], index: 0, kind: input, shape index: {}]   ;;  %s912_s1 = inlined_call_operand.vmem [shape: bf16[16,32], index: 1, kind: input, shape index: {}]   ;;  %s913_s2 = inlined_call_operand.vmem [shape: f32[16,1], index: 2, kind: input, shape index: {}]   ;;  %s914_s3 = inlined_call_operand.vmem [shape: f32[16,2048], index: 3, kind: output, shape index: {}]  }
   0x1   :  { %s768_s14 = smov 0  }
   0x2 LB: > { %s654_s15 = sadd.s32 4294967295, %s741_s14   ;;  %s781_s16 = sadd.s32 1, %s741_s14   ;;  %s741_s14 = sphi %s768_s14, %s918_s14   ;;  %s737_s13 = sphi %s766_s13, %s917_s13   ;;  %s733_s12 = sphi %s764_s12, %s916_s12  }
   0x3   : > { %s17_s17 = ssub.s32 %s741_s14, %s781_s16  ;;  %s20_s18 = sadd.s32 1, %s737_s13 }
   0x4   : > { %p18_p0 = scmp.eq.s32.totalorder %s17_s17, 0  ;;  %p27_p1 = scmp.ne.s32.totalorder %s737_s13, %s733_s12 }
   0x5   : > { %p28_p2 = scmp.eq.s32.totalorder %s741_s14, 0  ;;  %p99_p3 = scmp.eq.s32.totalorder %s654_s15, 1 }
   0x6   : > { %s792_s19 = scalar_select %p18_p0, %s737_s13, %s20_s18  }
   0x7   : > { %p29_p4 = por %p28_p2, %p27_p1  ;;  %p794_p5 = por %p99_p3, %p27_p1 }
   0x8   : > { %p657_p6 = scmp.ge.s32.totalorder %s741_s14, 2 }
   0xa   : > { %127 = sbr.rel (%p657_p6) target bundleno = 27 (0x1b), region = 24 }
   0xf   : > { %130 = sbr.rel (!%p29_p4) target bundleno = 27 (0x1b), region = 28  ;;  %s132_s21 = sand.u32 (%p29_p4), 1, %s737_s13  }
  0x10   : > { %s690_s22 = sshll.u32 (%p29_p4), %s741_s14, 5  ;;  %s658_s23 = sshll.u32 (%p29_p4), %s132_s21, 7 }
  0x11   : > { %s804_s26 = scalar_lea.vmem (%p29_p4), %s911_s0, %s690_s22  ;;  %s134_s27 = scalar_lea.vmem (%p29_p4), [#allocation2], %s658_s23 }
  0x12   : > { %v150_v0 = vld [vmem:[%s804_s26] sm:$0xff] (%p29_p4)  ;;  %v152_v1 = vld [vmem:[%s804_s26 + $0x8] sm:$0xff] (%p29_p4)  ;;  %v154_v2 = vld [vmem:[%s804_s26 + $0x10] sm:$0xff] (%p29_p4) }
  0x13   : > { %151 = vst [vmem:[%s134_s27] sm:$0xff] (%p29_p4), %v150_v0  ;;  %153 = vst [vmem:[%s134_s27 + $0x8] sm:$0xff] (%p29_p4), %v152_v1  ;;  %v156_v3 = vld [vmem:[%s804_s26 + $0x18] sm:$0xff] (%p29_p4)  ;;  %v158_v4 = vld [vmem:[%s804_s26 + $0x40] sm:$0xff] (%p29_p4) }
  0x14   : > { %155 = vst [vmem:[%s134_s27 + $0x10] sm:$0xff] %v154_v2  ;;  %v160_v5 = vld [vmem:[%s804_s26 + $0x48] sm:$0xff]  ;;  %157 = vst [vmem:[%s134_s27 + $0x18] sm:$0xff] %v156_v3  ;;  %v162_v6 = vld [vmem:[%s804_s26 + $0x50] sm:$0xff] }
  0x15   : > { %159 = vst [vmem:[%s134_s27 + $0x20] sm:$0xff] %v158_v4  ;;  %161 = vst [vmem:[%s134_s27 + $0x28] sm:$0xff] %v160_v5  ;;  %v164_v7 = vld [vmem:[%s804_s26 + $0x58] sm:$0xff]  ;;  %v166_v8 = vld [vmem:[%s804_s26 + $0x80] sm:$0xff] }
  0x16   : > { %163 = vst [vmem:[%s134_s27 + $0x30] sm:$0xff] %v162_v6  ;;  %165 = vst [vmem:[%s134_s27 + $0x38] sm:$0xff] %v164_v7  ;;  %v168_v9 = vld [vmem:[%s804_s26 + $0x88] sm:$0xff]  ;;  %v170_v10 = vld [vmem:[%s804_s26 + $0x90] sm:$0xff] }
  0x17   : > { %167 = vst [vmem:[%s134_s27 + $0x40] sm:$0xff] %v166_v8  ;;  %v172_v11 = vld [vmem:[%s804_s26 + $0x98] sm:$0xff]  ;;  %169 = vst [vmem:[%s134_s27 + $0x48] sm:$0xff] %v168_v9  ;;  %v174_v12 = vld [vmem:[%s804_s26 + $0xc0] sm:$0xff] }
  0x18   : > { %171 = vst [vmem:[%s134_s27 + $0x50] sm:$0xff] %v170_v10  ;;  %173 = vst [vmem:[%s134_s27 + $0x58] sm:$0xff] %v172_v11  ;;  %v176_v13 = vld [vmem:[%s804_s26 + $0xc8] sm:$0xff]  ;;  %v178_v14 = vld [vmem:[%s804_s26 + $0xd0] sm:$0xff] }
  0x19   : > { %175 = vst [vmem:[%s134_s27 + $0x60] sm:$0xff] %v174_v12  ;;  %177 = vst [vmem:[%s134_s27 + $0x68] sm:$0xff] %v176_v13  ;;  %v180_v15 = vld [vmem:[%s804_s26 + $0xd8] sm:$0xff] }
  0x1a   : > { %179 = vst [vmem:[%s134_s27 + $0x70] sm:$0xff] %v178_v14  ;;  %181 = vst [vmem:[%s134_s27 + $0x78] sm:$0xff] %v180_v15 }
  0x1b PF: > { %p661_p7 = scmp.ge.s32.totalorder %s741_s14, 1  ;;  %p186_p8 = scmp.lt.s32.totalorder %s741_s14, 3 }
  0x1d   : > { %p187_p9 = pnand %p661_p7, %p186_p8 }
  0x1e   : > { %s193_s28 = sand.u32 (!%p187_p9), 1, %s733_s12  }
  0x1f   : > { %190 = sbr.rel (%p187_p9) target bundleno = 269 (0x10d), region = 51  ;;  %s825_s29 = sshll.u32 (!%p187_p9), %s193_s28, 7 }
  0x20   : > { %s831_s5 = scalar_lea.vmem (!%p187_p9), [#allocation2], %s825_s29  ;;  %s860_s10 = scalar_lea.vmem (!%p187_p9), [#allocation3], %s825_s29 }
  0x24   : > { %v743_v16 = vmov 0   ;;  %v236_v17 = vld [vmem:[%s913_s2] sm:$0xff]  ;;  %v229_v20 = vld [vmem:[%s831_s5 + $0x48] sm:$0xff]  ;;  %v230_v32 = vld [vmem:[%s831_s5 + $0x50] sm:$0xff]  ;;  %vm333_vm0 = vcmask 261120   ;;  %s691_s11 = sshll.u32 (%p794_p5), %s654_s15, 6 }
  0x25   : > { %369 = vmatprep.mubr.bf16.mxu0 %v743_v16  ;;  %412 = vmatprep.mubr.bf16.mxu1 %v743_v16  ;;  %v228_v18 = vld [vmem:[%s831_s5 + $0x40] sm:$0xff]  ;;  %v233_v22 = vld [vmem:[%s831_s5 + $0x68] sm:$0xff]  ;;  %v234_v34 = vld [vmem:[%s831_s5 + $0x70] sm:$0xff]  ;;  %s550_s18 = scalar_lea.vmem (%p794_p5), %s914_s3, %s691_s11 }
  0x26   : > { %717 = vset.pattern.permute.xlu0 %v743_v16  ;;  %v232_v19 = vld [vmem:[%s831_s5 + $0x60] sm:$0xff]  ;;  %v237_v26 = vld [vmem:[%s913_s2 + $0x8] sm:$0xff]  ;;  %v676_v27 = vcombine.high %v229_v20, %v233_v22  ;;  %v675_v28 = vcombine.low %v229_v20, %v233_v22  ;;  %v231_v35 = vld [vmem:[%s831_s5 + $0x58] sm:$0xff]  ;;  %v678_v39 = vcombine.high %v230_v32, %v234_v34  ;;  %v677_v46 = vcombine.low %v230_v32, %v234_v34 }
  0x27   : > { %240 = vperm.xlu0 %717, %v236_v17   ;;  %v674_v21 = vcombine.high %v228_v18, %v232_v19  ;;  %v673_v23 = vcombine.low %v228_v18, %v232_v19  ;;  %v220_v24 = vld [vmem:[%s831_s5] sm:$0xff]  ;;  %v221_v30 = vld [vmem:[%s831_s5 + $0x8] sm:$0xff]  ;;  %v235_v36 = vld [vmem:[%s831_s5 + $0x78] sm:$0xff] }
  0x28   : > { %v224_v25 = vld [vmem:[%s831_s5 + $0x20] sm:$0xff]  ;;  %v225_v31 = vld [vmem:[%s831_s5 + $0x28] sm:$0xff]  ;;  %392 = vmatprep.subr.bf16.mxu1 %v676_v27  ;;  %v680_v40 = vcombine.high %v231_v35, %v235_v36  ;;  %v222_v41 = vld [vmem:[%s831_s5 + $0x10] sm:$0xff]  ;;  %v679_v47 = vcombine.low %v231_v35, %v235_v36 }
  0x29   : > { %v666_v29 = vcombine.high %v220_v24, %v224_v25  ;;  %349 = vmatprep.subr.bf16.mxu0 %v674_v21  ;;  %v668_v33 = vcombine.high %v221_v30, %v225_v31  ;;  %v665_v37 = vcombine.low %v220_v24, %v224_v25  ;;  %393 = vmatpush1.bf16.msra.mxu1 %v675_v28  ;;  %v226_v42 = vld [vmem:[%s831_s5 + $0x30] sm:$0xff]  ;;  %v718_v43 = vld [vmem:[%s912_s1] sm:$0xff]   ;;  %v223_v44 = vld [vmem:[%s831_s5 + $0x18] sm:$0xff] }
  0x2a   : > { %350 = vmatpush1.bf16.msra.mxu0 %v673_v23  ;;  %v667_v38 = vcombine.low %v221_v30, %v225_v31  ;;  %v227_v45 = vld [vmem:[%s831_s5 + $0x38] sm:$0xff]  ;;  %v670_v48 = vcombine.high %v222_v41, %v226_v42  ;;  %v669_v50 = vcombine.low %v222_v41, %v226_v42 }
  0x2b   : > { %351 = vmatprep.subr.bf16.mxu0 %v666_v29  ;;  %394 = vmatprep.subr.bf16.mxu1 %v668_v33  ;;  %v672_v49 = vcombine.high %v223_v44, %v227_v45  ;;  %v671_v51 = vcombine.low %v223_v44, %v227_v45 }
  0x2c   : > { %245 = vperm.xlu0 %717, %v237_v26  }
  0x2d   : > { %395 = vmatpush1.bf16.msra.mxu1 %v667_v38 }
  0x2e   : > { %352 = vmatpush1.bf16.msra.mxu0 %v665_v37  ;;  %478 = vmatprep.subr.bf16.mxu1 %v680_v40 }
  0x2f   : > { %435 = vmatprep.subr.bf16.mxu0 %v678_v39 }
  0x30   : > { %682 = vmatmul.mubr.msk.bf16.vlgmr.msra.gmra.mxu1 %vm333_vm0, %v718_v43 }
  0x31   : > { %681 = vmatmul.mubr.msk.bf16.vlgmr.msra.gmra.mxu0 %vm333_vm0, %v718_v43  ;;  %479 = vmatpush1.bf16.msra.mxu1 %v679_v47 }
  0x32   : > { %436 = vmatpush1.bf16.msra.mxu0 %v677_v46  ;;  %480 = vmatprep.subr.bf16.mxu1 %v672_v49 }
  0x33   : > { %437 = vmatprep.subr.bf16.mxu0 %v670_v48  ;;  %455 = vmatprep.mubr.bf16.mxu0 %v743_v16 }
  0x34   : > { %498 = vmatprep.mubr.bf16.mxu1 %v743_v16 }
  0x35   : > { %481 = vmatpush1.bf16.msra.mxu1 %v671_v51 }
  0x36   : > { %438 = vmatpush1.bf16.msra.mxu0 %v669_v50 }
  0x38   : > { %684 = vmatmul.mubr.msk.bf16.vlgmr.msra.gmra.mxu1 %vm333_vm0, %v718_v43 }
  0x39   : > { %683 = vmatmul.mubr.msk.bf16.vlgmr.msra.gmra.mxu0 %vm333_vm0, %v718_v43 }
  0xa2   : > { %v241_v52 = vpop.permute.xlu0 %240 }
  0xa7   : > { %v246_v58 = vpop.permute.xlu0 %245 }
  0xf0   : > { %v414_v55 = vpop.f32.mrf.mxu1 }
  0xf1   : > { %v371_v53 = vpop.f32.mrf.mxu0  ;;  %v415_v56 = vadd.f32 %v414_v55, %v241_v52 }
  0xf2   : > { %v372_v54 = vadd.f32 %v371_v53, %v241_v52  ;;  %v416_v61 = vpop.f32.mrf.mxu1 }
  0xf3   : > { %v373_v57 = vpop.f32.mrf.mxu0  ;;  %v511_v62 = vmax.f32 %v415_v56, 0.0  ;;  %v417_v63 = vadd.f32 %v416_v61, %v241_v52 }
  0xf4   : > { %v509_v59 = vmax.f32 %v372_v54, 0.0  ;;  %v374_v60 = vadd.f32 %v373_v57, %v241_v52  ;;  %v418_v3 = vpop.f32.mrf.mxu1 }
  0xf5   : > { %v375_v0 = vpop.f32.mrf.mxu0  ;;  %527 = vst [vmem:[%s860_s10 + $0x10] sm:$0xff] %v511_v62  ;;  %v512_v4 = vmax.f32 %v417_v63, 0.0  ;;  %v419_v5 = vadd.f32 %v418_v3, %v246_v58 }
  0xf6   : > { %525 = vst [vmem:[%s860_s10] sm:$0xff] %v509_v59  ;;  %v510_v1 = vmax.f32 %v374_v60, 0.0  ;;  %v376_v2 = vadd.f32 %v375_v0, %v246_v58  ;;  %v420_v9 = vpop.f32.mrf.mxu1 }
  0xf7   : > { %v377_v6 = vpop.f32.mrf.mxu0  ;;  %528 = vst [vmem:[%s860_s10 + $0x18] sm:$0xff] %v512_v4  ;;  %v519_v10 = vmax.f32 %v419_v5, 0.0  ;;  %v421_v11 = vadd.f32 %v420_v9, %v246_v58 }
  0xf8   : > { %526 = vst [vmem:[%s860_s10 + $0x8] sm:$0xff] %v510_v1  ;;  %v517_v7 = vmax.f32 %v376_v2, 0.0  ;;  %v378_v8 = vadd.f32 %v377_v6, %v246_v58  ;;  %v500_v15 = vpop.f32.mrf.mxu1 }
  0xf9   : > { %v457_v12 = vpop.f32.mrf.mxu0  ;;  %535 = vst [vmem:[%s860_s10 + $0x50] sm:$0xff] %v519_v10  ;;  %v520_v16 = vmax.f32 %v421_v11, 0.0  ;;  %v501_v17 = vadd.f32 %v500_v15, %v241_v52 }
  0xfa   : > { %533 = vst [vmem:[%s860_s10 + $0x40] sm:$0xff] %v517_v7  ;;  %v518_v13 = vmax.f32 %v378_v8, 0.0  ;;  %v458_v14 = vadd.f32 %v457_v12, %v241_v52  ;;  %v502_v21 = vpop.f32.mrf.mxu1 }
  0xfb   : > { %v459_v18 = vpop.f32.mrf.mxu0  ;;  %536 = vst [vmem:[%s860_s10 + $0x58] sm:$0xff] %v520_v16  ;;  %v515_v22 = vmax.f32 %v501_v17, 0.0  ;;  %v503_v23 = vadd.f32 %v502_v21, %v241_v52 }
  0xfc   : > { %534 = vst [vmem:[%s860_s10 + $0x48] sm:$0xff] %v518_v13  ;;  %v513_v19 = vmax.f32 %v458_v14, 0.0  ;;  %v460_v20 = vadd.f32 %v459_v18, %v241_v52  ;;  %v504_v27 = vpop.f32.mrf.mxu1  ;;  %v567_v40 = vld [vmem:[%s860_s10 + $0x10] sm:$0xff] (%p794_p5) }
  0xfd   : > { %v461_v24 = vpop.f32.mrf.mxu0  ;;  %531 = vst [vmem:[%s860_s10 + $0x30] sm:$0xff] %v515_v22  ;;  %v516_v28 = vmax.f32 %v503_v23, 0.0  ;;  %v505_v29 = vadd.f32 %v504_v27, %v246_v58  ;;  %v563_v38 = vld [vmem:[%s860_s10] sm:$0xff] (%p794_p5)  ;;  %568 = vst [vmem:[%s550_s18 + $0x10] sm:$0xff] (%p794_p5), %v567_v40 }
  0xfe   : > { %529 = vst [vmem:[%s860_s10 + $0x20] sm:$0xff] %v513_v19  ;;  %v514_v25 = vmax.f32 %v460_v20, 0.0  ;;  %v462_v26 = vadd.f32 %v461_v24, %v246_v58  ;;  %v506_v33 = vpop.f32.mrf.mxu1  ;;  %v569_v41 = vld [vmem:[%s860_s10 + $0x18] sm:$0xff] (%p794_p5)  ;;  %564 = vst [vmem:[%s550_s18] sm:$0xff] (%p794_p5), %v563_v38 }
  0xff   : > { %v463_v30 = vpop.f32.mrf.mxu0  ;;  %532 = vst [vmem:[%s860_s10 + $0x38] sm:$0xff] %v516_v28  ;;  %v523_v34 = vmax.f32 %v505_v29, 0.0  ;;  %v507_v35 = vadd.f32 %v506_v33, %v246_v58  ;;  %v565_v39 = vld [vmem:[%s860_s10 + $0x8] sm:$0xff] (%p794_p5)  ;;  %570 = vst [vmem:[%s550_s18 + $0x18] sm:$0xff] (%p794_p5), %v569_v41 }
 0x100   : > { %530 = vst [vmem:[%s860_s10 + $0x28] sm:$0xff] %v514_v25  ;;  %v521_v31 = vmax.f32 %v462_v26, 0.0  ;;  %v464_v32 = vadd.f32 %v463_v30, %v246_v58  ;;  %547 = sbr.rel (!%p794_p5) target bundleno = 269 (0x10d), region = 59  ;;  %566 = vst [vmem:[%s550_s18 + $0x8] sm:$0xff] (%p794_p5), %v565_v39  ;;  %v583_v48 = vld [vmem:[%s860_s10 + $0x50] sm:$0xff] (%p794_p5) }
 0x101   : > { %539 = vst [vmem:[%s860_s10 + $0x70] sm:$0xff] %v523_v34  ;;  %v524_v37 = vmax.f32 %v507_v35, 0.0  ;;  %v579_v46 = vld [vmem:[%s860_s10 + $0x40] sm:$0xff] (%p794_p5)  ;;  %584 = vst [vmem:[%s550_s18 + $0x90] sm:$0xff] (%p794_p5), %v583_v48 }
 0x102   : > { %537 = vst [vmem:[%s860_s10 + $0x60] sm:$0xff] %v521_v31  ;;  %v522_v36 = vmax.f32 %v464_v32, 0.0  ;;  %580 = vst [vmem:[%s550_s18 + $0x80] sm:$0xff] (%p794_p5), %v579_v46  ;;  %v585_v49 = vld [vmem:[%s860_s10 + $0x58] sm:$0xff] (%p794_p5) }
 0x103   : > { %540 = vst [vmem:[%s860_s10 + $0x78] sm:$0xff] %v524_v37  ;;  %v581_v47 = vld [vmem:[%s860_s10 + $0x48] sm:$0xff] (%p794_p5)  ;;  %586 = vst [vmem:[%s550_s18 + $0x98] sm:$0xff] (%p794_p5), %v585_v49 }
 0x104   : > { %538 = vst [vmem:[%s860_s10 + $0x68] sm:$0xff] %v522_v36  ;;  %v575_v44 = vld [vmem:[%s860_s10 + $0x30] sm:$0xff] (%p794_p5)  ;;  %582 = vst [vmem:[%s550_s18 + $0x88] sm:$0xff] (%p794_p5), %v581_v47 }
 0x105   : > { %v571_v42 = vld [vmem:[%s860_s10 + $0x20] sm:$0xff]  ;;  %576 = vst [vmem:[%s550_s18 + $0x30] sm:$0xff] %v575_v44 }
 0x106   : > { %572 = vst [vmem:[%s550_s18 + $0x20] sm:$0xff] %v571_v42  ;;  %v577_v45 = vld [vmem:[%s860_s10 + $0x38] sm:$0xff] }
 0x107   : > { %v573_v43 = vld [vmem:[%s860_s10 + $0x28] sm:$0xff]  ;;  %578 = vst [vmem:[%s550_s18 + $0x38] sm:$0xff] %v577_v45 }
 0x108   : > { %574 = vst [vmem:[%s550_s18 + $0x28] sm:$0xff] %v573_v43  ;;  %v591_v52 = vld [vmem:[%s860_s10 + $0x70] sm:$0xff] }
 0x109   : > { %v587_v50 = vld [vmem:[%s860_s10 + $0x60] sm:$0xff]  ;;  %592 = vst [vmem:[%s550_s18 + $0xb0] sm:$0xff] %v591_v52 }
 0x10a   : > { %588 = vst [vmem:[%s550_s18 + $0xa0] sm:$0xff] %v587_v50  ;;  %v593_v53 = vld [vmem:[%s860_s10 + $0x78] sm:$0xff] }
 0x10b   : > { %v589_v51 = vld [vmem:[%s860_s10 + $0x68] sm:$0xff]  ;;  %594 = vst [vmem:[%s550_s18 + $0xb8] sm:$0xff] %v593_v53 }
 0x10c   : > { %590 = vst [vmem:[%s550_s18 + $0xa8] sm:$0xff] %v589_v51 }
 0x10d PF: > { %p10_p10 = scmp.ge.s32.totalorder %s781_s16, 4   ;;  %s916_s12 = smov %s737_s13 }
 0x10e   : > { %s917_s13 = smov %s792_s19  ;;  %s918_s14 = smov %s781_s16 }
 0x10f   :  { %12 = sbr.rel (!%p10_p10) target bundleno = 2 (0x2), region = 113 }

// kernel: net_forward.10
= control target key start
LH: loop header
LB: loop body
LE: loop exit
PB: predicated region body
PF: predicated region fallthrough
CT: control target
= control target key end

     0   :  { %s1433_s15 = smov 0   ;;  %s1435_s16 = smov 0   ;;  %s1850_s0 = inlined_call_operand.vmem [shape: bf16[144,2048], index: 0, kind: input, shape index: {}]   ;;  %s1851_s1 = inlined_call_operand.vmem [shape: bf16[16,144], index: 1, kind: input, shape index: {}]   ;;  %s1852_s2 = inlined_call_operand.vmem [shape: f32[16,1], index: 2, kind: input, shape index: {}]   ;;  %s1853_s3 = inlined_call_operand.vmem [shape: f32[16,2048], index: 3, kind: input, shape index: {}]   ;;  %s1854_s4 = inlined_call_operand.vmem [shape: f32[16,2048], index: 4, kind: output, shape index: {}]  }
   0x1   :  { %s1437_s17 = smov 0  }
   0x2 LB: > { %s1254_s18 = sadd.s32 4294967295, %s1405_s17   ;;  %s1450_s19 = sadd.s32 1, %s1405_s17   ;;  %s1405_s17 = sphi %s1437_s17, %s1859_s17   ;;  %s1401_s16 = sphi %s1435_s16, %s1858_s16   ;;  %s1397_s15 = sphi %s1433_s15, %s1857_s15  }
   0x3   : > { %s18_s20 = ssub.s32 %s1405_s17, %s1450_s19  ;;  %s21_s21 = sadd.s32 1, %s1401_s16 }
   0x4   : > { %p19_p0 = scmp.eq.s32.totalorder %s18_s20, 0  ;;  %p28_p1 = scmp.ne.s32.totalorder %s1401_s16, %s1397_s15 }
   0x5   : > { %p29_p2 = scmp.eq.s32.totalorder %s1405_s17, 0  ;;  %p126_p3 = scmp.eq.s32.totalorder %s1254_s18, 1 }
   0x6   : > { %s1461_s22 = scalar_select %p19_p0, %s1401_s16, %s21_s21  }
   0x7   : > { %p1463_p4 = por %p29_p2, %p28_p1  ;;  %p1467_p5 = por %p126_p3, %p28_p1 }
   0x8   : > { %p1257_p6 = scmp.ge.s32.totalorder %s1405_s17, 2 }
   0xa   : > { %154 = sbr.rel (%p1257_p6) target bundleno = 68 (0x44), region = 24 }
   0xf   : > { %157 = sbr.rel (!%p1463_p4) target bundleno = 56 (0x38), region = 28  ;;  %s159_s25 = sand.u32 (%p1463_p4), 1, %s1401_s16  }
  0x10   : > { %s1349_s26 = sshll.u32 (%p1463_p4), %s1405_s17, 5  ;;  %s1352_s27 = smul.u32 (%p1463_p4), 576, %s159_s25 }
  0x11   : > { %s1479_s30 = scalar_lea.vmem (%p1463_p4), %s1850_s0, %s1349_s26 }
  0x12   : > { %v177_v0 = vld [vmem:[%s1479_s30] sm:$0xff] (%p1463_p4)  ;;  %v179_v1 = vld [vmem:[%s1479_s30 + $0x8] sm:$0xff] (%p1463_p4)  ;;  %v181_v2 = vld [vmem:[%s1479_s30 + $0x10] sm:$0xff] (%p1463_p4)  ;;  %s1487_s5 = scalar_lea.vmem (%p1463_p4), [#allocation2], %s1352_s27 }
  0x13   : > { %v183_v3 = vld [vmem:[%s1479_s30 + $0x18] sm:$0xff] (%p1463_p4)  ;;  %v185_v4 = vld [vmem:[%s1479_s30 + $0x40] sm:$0xff] (%p1463_p4)  ;;  %v187_v5 = vld [vmem:[%s1479_s30 + $0x48] sm:$0xff] (%p1463_p4)  ;;  %178 = vst [vmem:[%s1487_s5] sm:$0xff] (%p1463_p4), %v177_v0 }
  0x14   : > { %180 = vst [vmem:[%s1487_s5 + $0x8] sm:$0xff] %v179_v1  ;;  %182 = vst [vmem:[%s1487_s5 + $0x10] sm:$0xff] %v181_v2  ;;  %v189_v6 = vld [vmem:[%s1479_s30 + $0x50] sm:$0xff]  ;;  %v191_v7 = vld [vmem:[%s1479_s30 + $0x58] sm:$0xff] }
  0x15   : > { %184 = vst [vmem:[%s1487_s5 + $0x18] sm:$0xff] %v183_v3  ;;  %186 = vst [vmem:[%s1487_s5 + $0x20] sm:$0xff] %v185_v4  ;;  %v193_v8 = vld [vmem:[%s1479_s30 + $0x80] sm:$0xff]  ;;  %v195_v9 = vld [vmem:[%s1479_s30 + $0x88] sm:$0xff] }
  0x16   : > { %188 = vst [vmem:[%s1487_s5 + $0x28] sm:$0xff] %v187_v5  ;;  %190 = vst [vmem:[%s1487_s5 + $0x30] sm:$0xff] %v189_v6  ;;  %v197_v10 = vld [vmem:[%s1479_s30 + $0x90] sm:$0xff]  ;;  %v199_v11 = vld [vmem:[%s1479_s30 + $0x98] sm:$0xff] }
  0x17   : > { %192 = vst [vmem:[%s1487_s5 + $0x38] sm:$0xff] %v191_v7  ;;  %194 = vst [vmem:[%s1487_s5 + $0x40] sm:$0xff] %v193_v8  ;;  %v201_v12 = vld [vmem:[%s1479_s30 + $0xc0] sm:$0xff]  ;;  %v203_v13 = vld [vmem:[%s1479_s30 + $0xc8] sm:$0xff] }
  0x18   : > { %196 = vst [vmem:[%s1487_s5 + $0x48] sm:$0xff] %v195_v9  ;;  %198 = vst [vmem:[%s1487_s5 + $0x50] sm:$0xff] %v197_v10  ;;  %v205_v14 = vld [vmem:[%s1479_s30 + $0xd0] sm:$0xff]  ;;  %v207_v15 = vld [vmem:[%s1479_s30 + $0xd8] sm:$0xff] }
  0x19   : > { %200 = vst [vmem:[%s1487_s5 + $0x58] sm:$0xff] %v199_v11  ;;  %202 = vst [vmem:[%s1487_s5 + $0x60] sm:$0xff] %v201_v12  ;;  %v209_v16 = vld [vmem:[%s1479_s30 + $0x100] sm:$0xff]  ;;  %v211_v17 = vld [vmem:[%s1479_s30 + $0x108] sm:$0xff] }
  0x1a   : > { %204 = vst [vmem:[%s1487_s5 + $0x68] sm:$0xff] %v203_v13  ;;  %206 = vst [vmem:[%s1487_s5 + $0x70] sm:$0xff] %v205_v14  ;;  %v213_v18 = vld [vmem:[%s1479_s30 + $0x110] sm:$0xff]  ;;  %v215_v19 = vld [vmem:[%s1479_s30 + $0x118] sm:$0xff] }
  0x1b   : > { %208 = vst [vmem:[%s1487_s5 + $0x78] sm:$0xff] %v207_v15  ;;  %210 = vst [vmem:[%s1487_s5 + $0x80] sm:$0xff] %v209_v16  ;;  %v217_v20 = vld [vmem:[%s1479_s30 + $0x140] sm:$0xff]  ;;  %v219_v21 = vld [vmem:[%s1479_s30 + $0x148] sm:$0xff] }
  0x1c   : > { %212 = vst [vmem:[%s1487_s5 + $0x88] sm:$0xff] %v211_v17  ;;  %214 = vst [vmem:[%s1487_s5 + $0x90] sm:$0xff] %v213_v18  ;;  %v221_v22 = vld [vmem:[%s1479_s30 + $0x150] sm:$0xff]  ;;  %v223_v23 = vld [vmem:[%s1479_s30 + $0x158] sm:$0xff] }
  0x1d   : > { %216 = vst [vmem:[%s1487_s5 + $0x98] sm:$0xff] %v215_v19  ;;  %218 = vst [vmem:[%s1487_s5 + $0xa0] sm:$0xff] %v217_v20  ;;  %v225_v24 = vld [vmem:[%s1479_s30 + $0x180] sm:$0xff]  ;;  %v227_v25 = vld [vmem:[%s1479_s30 + $0x188] sm:$0xff] }
  0x1e   : > { %220 = vst [vmem:[%s1487_s5 + $0xa8] sm:$0xff] %v219_v21  ;;  %222 = vst [vmem:[%s1487_s5 + $0xb0] sm:$0xff] %v221_v22  ;;  %v229_v26 = vld [vmem:[%s1479_s30 + $0x190] sm:$0xff]  ;;  %v231_v27 = vld [vmem:[%s1479_s30 + $0x198] sm:$0xff] }
  0x1f   : > { %224 = vst [vmem:[%s1487_s5 + $0xb8] sm:$0xff] %v223_v23  ;;  %226 = vst [vmem:[%s1487_s5 + $0xc0] sm:$0xff] %v225_v24  ;;  %v233_v28 = vld [vmem:[%s1479_s30 + $0x1c0] sm:$0xff]  ;;  %v235_v29 = vld [vmem:[%s1479_s30 + $0x1c8] sm:$0xff] }
  0x20   : > { %228 = vst [vmem:[%s1487_s5 + $0xc8] sm:$0xff] %v227_v25  ;;  %230 = vst [vmem:[%s1487_s5 + $0xd0] sm:$0xff] %v229_v26  ;;  %v237_v30 = vld [vmem:[%s1479_s30 + $0x1d0] sm:$0xff]  ;;  %v239_v31 = vld [vmem:[%s1479_s30 + $0x1d8] sm:$0xff] }
  0x21   : > { %232 = vst [vmem:[%s1487_s5 + $0xd8] sm:$0xff] %v231_v27  ;;  %234 = vst [vmem:[%s1487_s5 + $0xe0] sm:$0xff] %v233_v28  ;;  %v241_v32 = vld [vmem:[%s1479_s30 + $0x200] sm:$0xff]  ;;  %v243_v33 = vld [vmem:[%s1479_s30 + $0x208] sm:$0xff] }
  0x22   : > { %236 = vst [vmem:[%s1487_s5 + $0xe8] sm:$0xff] %v235_v29  ;;  %238 = vst [vmem:[%s1487_s5 + $0xf0] sm:$0xff] %v237_v30  ;;  %v245_v34 = vld [vmem:[%s1479_s30 + $0x210] sm:$0xff]  ;;  %v247_v35 = vld [vmem:[%s1479_s30 + $0x218] sm:$0xff] }
  0x23   : > { %240 = vst [vmem:[%s1487_s5 + $0xf8] sm:$0xff] %v239_v31  ;;  %242 = vst [vmem:[%s1487_s5 + $0x100] sm:$0xff] %v241_v32  ;;  %v249_v36 = vld [vmem:[%s1479_s30 + $0x240] sm:$0xff]  ;;  %v251_v37 = vld [vmem:[%s1479_s30 + $0x248] sm:$0xff] }
  0x24   : > { %244 = vst [vmem:[%s1487_s5 + $0x108] sm:$0xff] %v243_v33  ;;  %246 = vst [vmem:[%s1487_s5 + $0x110] sm:$0xff] %v245_v34  ;;  %v253_v38 = vld [vmem:[%s1479_s30 + $0x250] sm:$0xff]  ;;  %v255_v39 = vld [vmem:[%s1479_s30 + $0x258] sm:$0xff] }
  0x25   : > { %248 = vst [vmem:[%s1487_s5 + $0x118] sm:$0xff] %v247_v35  ;;  %250 = vst [vmem:[%s1487_s5 + $0x120] sm:$0xff] %v249_v36  ;;  %v257_v40 = vld [vmem:[%s1479_s30 + $0x280] sm:$0xff]  ;;  %v259_v41 = vld [vmem:[%s1479_s30 + $0x288] sm:$0xff] }
  0x26   : > { %252 = vst [vmem:[%s1487_s5 + $0x128] sm:$0xff] %v251_v37  ;;  %254 = vst [vmem:[%s1487_s5 + $0x130] sm:$0xff] %v253_v38  ;;  %v261_v42 = vld [vmem:[%s1479_s30 + $0x290] sm:$0xff]  ;;  %v263_v43 = vld [vmem:[%s1479_s30 + $0x298] sm:$0xff] }
  0x27   : > { %256 = vst [vmem:[%s1487_s5 + $0x138] sm:$0xff] %v255_v39  ;;  %258 = vst [vmem:[%s1487_s5 + $0x140] sm:$0xff] %v257_v40  ;;  %v265_v44 = vld [vmem:[%s1479_s30 + $0x2c0] sm:$0xff]  ;;  %v267_v45 = vld [vmem:[%s1479_s30 + $0x2c8] sm:$0xff] }
  0x28   : > { %260 = vst [vmem:[%s1487_s5 + $0x148] sm:$0xff] %v259_v41  ;;  %262 = vst [vmem:[%s1487_s5 + $0x150] sm:$0xff] %v261_v42  ;;  %v269_v46 = vld [vmem:[%s1479_s30 + $0x2d0] sm:$0xff]  ;;  %v271_v47 = vld [vmem:[%s1479_s30 + $0x2d8] sm:$0xff] }
  0x29   : > { %264 = vst [vmem:[%s1487_s5 + $0x158] sm:$0xff] %v263_v43  ;;  %266 = vst [vmem:[%s1487_s5 + $0x160] sm:$0xff] %v265_v44  ;;  %v273_v48 = vld [vmem:[%s1479_s30 + $0x300] sm:$0xff]  ;;  %v275_v49 = vld [vmem:[%s1479_s30 + $0x308] sm:$0xff] }
  0x2a   : > { %268 = vst [vmem:[%s1487_s5 + $0x168] sm:$0xff] %v267_v45  ;;  %270 = vst [vmem:[%s1487_s5 + $0x170] sm:$0xff] %v269_v46  ;;  %v277_v50 = vld [vmem:[%s1479_s30 + $0x310] sm:$0xff]  ;;  %v279_v51 = vld [vmem:[%s1479_s30 + $0x318] sm:$0xff] }
  0x2b   : > { %272 = vst [vmem:[%s1487_s5 + $0x178] sm:$0xff] %v271_v47  ;;  %274 = vst [vmem:[%s1487_s5 + $0x180] sm:$0xff] %v273_v48  ;;  %v281_v52 = vld [vmem:[%s1479_s30 + $0x340] sm:$0xff]  ;;  %v283_v53 = vld [vmem:[%s1479_s30 + $0x348] sm:$0xff] }
  0x2c   : > { %276 = vst [vmem:[%s1487_s5 + $0x188] sm:$0xff] %v275_v49  ;;  %278 = vst [vmem:[%s1487_s5 + $0x190] sm:$0xff] %v277_v50  ;;  %v285_v54 = vld [vmem:[%s1479_s30 + $0x350] sm:$0xff]  ;;  %v287_v55 = vld [vmem:[%s1479_s30 + $0x358] sm:$0xff] }
  0x2d   : > { %280 = vst [vmem:[%s1487_s5 + $0x198] sm:$0xff] %v279_v51  ;;  %282 = vst [vmem:[%s1487_s5 + $0x1a0] sm:$0xff] %v281_v52  ;;  %v289_v56 = vld [vmem:[%s1479_s30 + $0x380] sm:$0xff]  ;;  %v291_v57 = vld [vmem:[%s1479_s30 + $0x388] sm:$0xff] }
  0x2e   : > { %284 = vst [vmem:[%s1487_s5 + $0x1a8] sm:$0xff] %v283_v53  ;;  %286 = vst [vmem:[%s1487_s5 + $0x1b0] sm:$0xff] %v285_v54  ;;  %v293_v58 = vld [vmem:[%s1479_s30 + $0x390] sm:$0xff]  ;;  %v295_v59 = vld [vmem:[%s1479_s30 + $0x398] sm:$0xff] }
  0x2f   : > { %288 = vst [vmem:[%s1487_s5 + $0x1b8] sm:$0xff] %v287_v55  ;;  %290 = vst [vmem:[%s1487_s5 + $0x1c0] sm:$0xff] %v289_v56  ;;  %v297_v60 = vld [vmem:[%s1479_s30 + $0x3c0] sm:$0xff]  ;;  %v299_v61 = vld [vmem:[%s1479_s30 + $0x3c8] sm:$0xff] }
  0x30   : > { %292 = vst [vmem:[%s1487_s5 + $0x1c8] sm:$0xff] %v291_v57  ;;  %294 = vst [vmem:[%s1487_s5 + $0x1d0] sm:$0xff] %v293_v58  ;;  %v301_v62 = vld [vmem:[%s1479_s30 + $0x3d0] sm:$0xff]  ;;  %v303_v63 = vld [vmem:[%s1479_s30 + $0x3d8] sm:$0xff] }
  0x31   : > { %296 = vst [vmem:[%s1487_s5 + $0x1d8] sm:$0xff] %v295_v59  ;;  %298 = vst [vmem:[%s1487_s5 + $0x1e0] sm:$0xff] %v297_v60  ;;  %v305_v0 = vld [vmem:[%s1479_s30 + $0x400] sm:$0xff]  ;;  %v307_v1 = vld [vmem:[%s1479_s30 + $0x408] sm:$0xff] }
  0x32   : > { %300 = vst [vmem:[%s1487_s5 + $0x1e8] sm:$0xff] %v299_v61  ;;  %302 = vst [vmem:[%s1487_s5 + $0x1f0] sm:$0xff] %v301_v62  ;;  %v309_v2 = vld [vmem:[%s1479_s30 + $0x410] sm:$0xff]  ;;  %v311_v3 = vld [vmem:[%s1479_s30 + $0x418] sm:$0xff] }
  0x33   : > { %304 = vst [vmem:[%s1487_s5 + $0x1f8] sm:$0xff] %v303_v63  ;;  %306 = vst [vmem:[%s1487_s5 + $0x200] sm:$0xff] %v305_v0  ;;  %v313_v4 = vld [vmem:[%s1479_s30 + $0x440] sm:$0xff]  ;;  %v315_v5 = vld [vmem:[%s1479_s30 + $0x448] sm:$0xff] }
  0x34   : > { %308 = vst [vmem:[%s1487_s5 + $0x208] sm:$0xff] %v307_v1  ;;  %310 = vst [vmem:[%s1487_s5 + $0x210] sm:$0xff] %v309_v2  ;;  %v317_v6 = vld [vmem:[%s1479_s30 + $0x450] sm:$0xff]  ;;  %v319_v7 = vld [vmem:[%s1479_s30 + $0x458] sm:$0xff] }
  0x35   : > { %312 = vst [vmem:[%s1487_s5 + $0x218] sm:$0xff] %v311_v3  ;;  %314 = vst [vmem:[%s1487_s5 + $0x220] sm:$0xff] %v313_v4 }
  0x36   : > { %316 = vst [vmem:[%s1487_s5 + $0x228] sm:$0xff] %v315_v5  ;;  %318 = vst [vmem:[%s1487_s5 + $0x230] sm:$0xff] %v317_v6 }
  0x37   : > { %320 = vst [vmem:[%s1487_s5 + $0x238] sm:$0xff] %v319_v7 }
  0x38 PF: > { %326 = sbr.rel (!%p1463_p4) target bundleno = 68 (0x44), region = 51  ;;  %s328_s6 = sand.u32 (%p1463_p4), 1, %s1401_s16  }
  0x39   : > { %s1350_s7 = sshll.u32 (%p1463_p4), %s1405_s17, 6  ;;  %s1260_s8 = sshll.u32 (%p1463_p4), %s328_s6, 7 }
  0x3a   : > { %s1634_s11 = scalar_lea.vmem (%p1463_p4), %s1853_s3, %s1350_s7  ;;  %s330_s12 = scalar_lea.vmem (%p1463_p4), [#allocation3], %s1260_s8 }
  0x3b   : > { %v346_v8 = vld [vmem:[%s1634_s11] sm:$0xff] (%p1463_p4)  ;;  %v348_v9 = vld [vmem:[%s1634_s11 + $0x8] sm:$0xff] (%p1463_p4)  ;;  %v350_v10 = vld [vmem:[%s1634_s11 + $0x10] sm:$0xff] (%p1463_p4) }
  0x3c   : > { %347 = vst [vmem:[%s330_s12] sm:$0xff] (%p1463_p4), %v346_v8  ;;  %349 = vst [vmem:[%s330_s12 + $0x8] sm:$0xff] (%p1463_p4), %v348_v9  ;;  %v352_v11 = vld [vmem:[%s1634_s11 + $0x18] sm:$0xff] (%p1463_p4)  ;;  %v354_v12 = vld [vmem:[%s1634_s11 + $0x20] sm:$0xff] (%p1463_p4) }
  0x3d   : > { %351 = vst [vmem:[%s330_s12 + $0x10] sm:$0xff] %v350_v10  ;;  %v356_v13 = vld [vmem:[%s1634_s11 + $0x28] sm:$0xff]  ;;  %353 = vst [vmem:[%s330_s12 + $0x18] sm:$0xff] %v352_v11  ;;  %v358_v14 = vld [vmem:[%s1634_s11 + $0x30] sm:$0xff] }
  0x3e   : > { %355 = vst [vmem:[%s330_s12 + $0x20] sm:$0xff] %v354_v12  ;;  %357 = vst [vmem:[%s330_s12 + $0x28] sm:$0xff] %v356_v13  ;;  %v360_v15 = vld [vmem:[%s1634_s11 + $0x38] sm:$0xff]  ;;  %v362_v16 = vld [vmem:[%s1634_s11 + $0x80] sm:$0xff] }
  0x3f   : > { %359 = vst [vmem:[%s330_s12 + $0x30] sm:$0xff] %v358_v14  ;;  %361 = vst [vmem:[%s330_s12 + $0x38] sm:$0xff] %v360_v15  ;;  %v364_v17 = vld [vmem:[%s1634_s11 + $0x88] sm:$0xff]  ;;  %v366_v18 = vld [vmem:[%s1634_s11 + $0x90] sm:$0xff] }
  0x40   : > { %363 = vst [vmem:[%s330_s12 + $0x40] sm:$0xff] %v362_v16  ;;  %v368_v19 = vld [vmem:[%s1634_s11 + $0x98] sm:$0xff]  ;;  %365 = vst [vmem:[%s330_s12 + $0x48] sm:$0xff] %v364_v17  ;;  %v370_v20 = vld [vmem:[%s1634_s11 + $0xa0] sm:$0xff] }
  0x41   : > { %367 = vst [vmem:[%s330_s12 + $0x50] sm:$0xff] %v366_v18  ;;  %369 = vst [vmem:[%s330_s12 + $0x58] sm:$0xff] %v368_v19  ;;  %v372_v21 = vld [vmem:[%s1634_s11 + $0xa8] sm:$0xff]  ;;  %v374_v22 = vld [vmem:[%s1634_s11 + $0xb0] sm:$0xff] }
  0x42   : > { %371 = vst [vmem:[%s330_s12 + $0x60] sm:$0xff] %v370_v20  ;;  %373 = vst [vmem:[%s330_s12 + $0x68] sm:$0xff] %v372_v21  ;;  %v376_v23 = vld [vmem:[%s1634_s11 + $0xb8] sm:$0xff] }
  0x43   : > { %375 = vst [vmem:[%s330_s12 + $0x70] sm:$0xff] %v374_v22  ;;  %377 = vst [vmem:[%s330_s12 + $0x78] sm:$0xff] %v376_v23 }
  0x44 PF: > { %p1263_p7 = scmp.ge.s32.totalorder %s1405_s17, 1  ;;  %p382_p8 = scmp.lt.s32.totalorder %s1405_s17, 3 }
  0x46   : > { %p383_p9 = pnand %p1263_p7, %p382_p8 }
  0x47   : > { %s389_s13 = sand.u32 (!%p383_p9), 1, %s1397_s15  }
  0x48   : > { %386 = sbr.rel (%p383_p9) target bundleno = 369 (0x171), region = 74  ;;  %s1264_s5 = sshll.u32 (!%p383_p9), %s389_s13, 7 }
  0x49   : > { %s1353_s21 = smul.u32 (!%p383_p9), 576, %s389_s13  ;;  %s1764_s6 = scalar_lea.vmem (!%p383_p9), [#allocation3], %s1264_s5 }
  0x4a   : > { %s1778_s15 = scalar_lea.vmem (!%p383_p9), [#allocation4], %s1264_s5 }
  0x4b   : > { %s1669_s26 = scalar_lea.vmem (!%p383_p9), [#allocation2], %s1353_s21 }
  0x4d   : > { %v1658_v24 = vld [vmem:[%s1851_s1 + $0x4] ss:$8 sps:$4 sm:$0xff]   ;;  %vm883_vm0 = vcmask 130048   ;;  %v1407_v26 = vmov 0   ;;  %s1351_s7 = sshll.u32 (%p1467_p5), %s1254_s18, 6 }
  0x4e   : > { %v502_v25 = vld [vmem:[%s1852_s2] sm:$0xff]  ;;  %1340 = vmatprep.mubr.msk.bf16.mxu0 %vm883_vm0, %v1658_v24  ;;  %1341 = vmatprep.mubr.msk.bf16.mxu1 %vm883_vm0, %v1658_v24  ;;  %v487_v29 = vld [vmem:[%s1669_s26 + $0x1c8] sm:$0xff]  ;;  %s1132_s24 = scalar_lea.vmem (%p1467_p5), %s1854_s4, %s1351_s7 }
  0x4f   : > { %1379 = vset.pattern.permute.xlu0 %v1407_v26  ;;  %v486_v27 = vld [vmem:[%s1669_s26 + $0x1c0] sm:$0xff]  ;;  %v491_v31 = vld [vmem:[%s1669_s26 + $0x1e8] sm:$0xff] }
  0x50   : > { %v490_v28 = vld [vmem:[%s1669_s26 + $0x1e0] sm:$0xff]  ;;  %506 = vperm.xlu0 %1379, %v502_v25   ;;  %v1327_v35 = vcombine.high %v487_v29, %v491_v31  ;;  %v1326_v36 = vcombine.low %v487_v29, %v491_v31  ;;  %v479_v38 = vld [vmem:[%s1669_s26 + $0x188] sm:$0xff] }
  0x51   : > { %v1325_v30 = vcombine.high %v486_v27, %v490_v28  ;;  %v1324_v32 = vcombine.low %v486_v27, %v490_v28  ;;  %v478_v33 = vld [vmem:[%s1669_s26 + $0x180] sm:$0xff]  ;;  %v483_v39 = vld [vmem:[%s1669_s26 + $0x1a8] sm:$0xff] }
  0x52   : > { %v482_v34 = vld [vmem:[%s1669_s26 + $0x1a0] sm:$0xff]  ;;  %v1319_v41 = vcombine.high %v479_v38, %v483_v39  ;;  %v471_v43 = vld [vmem:[%s1669_s26 + $0x148] sm:$0xff]  ;;  %930 = vmatprep.subr.bf16.mxu1 %v1327_v35  ;;  %v1318_v47 = vcombine.low %v479_v38, %v483_v39  ;;  %v488_v35 = vld [vmem:[%s1669_s26 + $0x1d0] sm:$0xff] }
  0x53   : > { %v1317_v37 = vcombine.high %v478_v33, %v482_v34  ;;  %v470_v40 = vld [vmem:[%s1669_s26 + $0x140] sm:$0xff]  ;;  %887 = vmatprep.subr.bf16.mxu0 %v1325_v30  ;;  %v475_v44 = vld [vmem:[%s1669_s26 + $0x168] sm:$0xff]  ;;  %v1316_v45 = vcombine.low %v478_v33, %v482_v34  ;;  %931 = vmatpush1.bf16.msra.mxu1 %v1326_v36  ;;  %v492_v36 = vld [vmem:[%s1669_s26 + $0x1f0] sm:$0xff] }
  0x54   : > { %v474_v42 = vld [vmem:[%s1669_s26 + $0x160] sm:$0xff]  ;;  %888 = vmatpush1.bf16.msra.mxu0 %v1324_v32  ;;  %v503_v46 = vld [vmem:[%s1852_s2 + $0x8] sm:$0xff]  ;;  %932 = vmatprep.subr.bf16.mxu1 %v1319_v41  ;;  %v1311_v49 = vcombine.high %v471_v43, %v475_v44  ;;  %v1310_v55 = vcombine.low %v471_v43, %v475_v44  ;;  %v493_v38 = vld [vmem:[%s1669_s26 + $0x1f8] sm:$0xff]  ;;  %v1329_v41 = vcombine.high %v488_v35, %v492_v36 }
  0x55   : > { %889 = vmatprep.subr.bf16.mxu0 %v1317_v37  ;;  %v1309_v48 = vcombine.high %v470_v40, %v474_v42  ;;  %v462_v50 = vld [vmem:[%s1669_s26 + $0x100] sm:$0xff]  ;;  %v463_v52 = vld [vmem:[%s1669_s26 + $0x108] sm:$0xff]  ;;  %511 = vperm.xlu0 %1379, %v503_v46   ;;  %v1308_v54 = vcombine.low %v470_v40, %v474_v42  ;;  %v489_v37 = vld [vmem:[%s1669_s26 + $0x1d8] sm:$0xff] }
  0x56   : > { %v466_v51 = vld [vmem:[%s1669_s26 + $0x120] sm:$0xff]  ;;  %v467_v53 = vld [vmem:[%s1669_s26 + $0x128] sm:$0xff]  ;;  %v1331_v42 = vcombine.high %v489_v37, %v493_v38  ;;  %v480_v43 = vld [vmem:[%s1669_s26 + $0x190] sm:$0xff] }
  0x57   : > { %933 = vmatpush1.bf16.msra.mxu1 %v1318_v47  ;;  %v1301_v56 = vcombine.high %v462_v50, %v466_v51  ;;  %v1303_v57 = vcombine.high %v463_v52, %v467_v53  ;;  %v454_v58 = vld [vmem:[%s1669_s26 + $0xc0] sm:$0xff]  ;;  %v455_v60 = vld [vmem:[%s1669_s26 + $0xc8] sm:$0xff]  ;;  %v1300_v62 = vcombine.low %v462_v50, %v466_v51  ;;  %v1302_v63 = vcombine.low %v463_v52, %v467_v53  ;;  %v484_v44 = vld [vmem:[%s1669_s26 + $0x1b0] sm:$0xff] }
  0x58   : > { %890 = vmatpush1.bf16.msra.mxu0 %v1316_v45  ;;  %934 = vmatprep.subr.bf16.mxu1 %v1311_v49  ;;  %v458_v59 = vld [vmem:[%s1669_s26 + $0xe0] sm:$0xff]  ;;  %v459_v61 = vld [vmem:[%s1669_s26 + $0xe8] sm:$0xff]  ;;  %v481_v46 = vld [vmem:[%s1669_s26 + $0x198] sm:$0xff]  ;;  %v1330_v49 = vcombine.low %v489_v37, %v493_v38  ;;  %v1321_v50 = vcombine.high %v480_v43, %v484_v44 }
  0x59   : > { %891 = vmatprep.subr.bf16.mxu0 %v1309_v48  ;;  %v1293_v0 = vcombine.high %v454_v58, %v458_v59  ;;  %v1295_v1 = vcombine.high %v455_v60, %v459_v61  ;;  %v446_v2 = vld [vmem:[%s1669_s26 + $0x80] sm:$0xff]  ;;  %v447_v4 = vld [vmem:[%s1669_s26 + $0x88] sm:$0xff]  ;;  %v1292_v6 = vcombine.low %v454_v58, %v458_v59  ;;  %v1294_v7 = vcombine.low %v455_v60, %v459_v61  ;;  %v485_v47 = vld [vmem:[%s1669_s26 + $0x1b8] sm:$0xff] }
  0x5a   : > { %v450_v3 = vld [vmem:[%s1669_s26 + $0xa0] sm:$0xff]  ;;  %v451_v5 = vld [vmem:[%s1669_s26 + $0xa8] sm:$0xff]  ;;  %v1328_v48 = vcombine.low %v488_v35, %v492_v36  ;;  %v1323_v51 = vcombine.high %v481_v46, %v485_v47  ;;  %v472_v52 = vld [vmem:[%s1669_s26 + $0x150] sm:$0xff] }
  0x5b   : > { %935 = vmatpush1.bf16.msra.mxu1 %v1310_v55  ;;  %v1285_v8 = vcombine.high %v446_v2, %v450_v3  ;;  %v1287_v9 = vcombine.high %v447_v4, %v451_v5  ;;  %v438_v10 = vld [vmem:[%s1669_s26 + $0x40] sm:$0xff]  ;;  %v439_v12 = vld [vmem:[%s1669_s26 + $0x48] sm:$0xff]  ;;  %v1284_v14 = vcombine.low %v446_v2, %v450_v3  ;;  %v1286_v15 = vcombine.low %v447_v4, %v451_v5  ;;  %v476_v53 = vld [vmem:[%s1669_s26 + $0x170] sm:$0xff] }
  0x5c   : > { %892 = vmatpush1.bf16.msra.mxu0 %v1308_v54  ;;  %936 = vmatprep.subr.bf16.mxu1 %v1303_v57  ;;  %v442_v11 = vld [vmem:[%s1669_s26 + $0x60] sm:$0xff]  ;;  %v443_v13 = vld [vmem:[%s1669_s26 + $0x68] sm:$0xff]  ;;  %v473_v54 = vld [vmem:[%s1669_s26 + $0x158] sm:$0xff]  ;;  %v1322_v57 = vcombine.low %v481_v46, %v485_v47  ;;  %v1313_v58 = vcombine.high %v472_v52, %v476_v53 }
  0x5d   : > { %893 = vmatprep.subr.bf16.mxu0 %v1301_v56  ;;  %v1277_v16 = vcombine.high %v438_v10, %v442_v11  ;;  %v1279_v17 = vcombine.high %v439_v12, %v443_v13  ;;  %v430_v18 = vld [vmem:[%s1669_s26] sm:$0xff]  ;;  %v431_v20 = vld [vmem:[%s1669_s26 + $0x8] sm:$0xff]  ;;  %v1276_v22 = vcombine.low %v438_v10, %v442_v11  ;;  %v1278_v23 = vcombine.low %v439_v12, %v443_v13  ;;  %v477_v55 = vld [vmem:[%s1669_s26 + $0x178] sm:$0xff] }
  0x5e   : > { %v434_v19 = vld [vmem:[%s1669_s26 + $0x20] sm:$0xff]  ;;  %v435_v21 = vld [vmem:[%s1669_s26 + $0x28] sm:$0xff]  ;;  %v1320_v56 = vcombine.low %v480_v43, %v484_v44  ;;  %v1315_v59 = vcombine.high %v473_v54, %v477_v55  ;;  %v464_v60 = vld [vmem:[%s1669_s26 + $0x110] sm:$0xff] }
  0x5f   : > { %937 = vmatpush1.bf16.msra.mxu1 %v1302_v63  ;;  %v1269_v25 = vcombine.high %v430_v18, %v434_v19  ;;  %v1271_v26 = vcombine.high %v431_v20, %v435_v21  ;;  %v494_v27 = vld [vmem:[%s1669_s26 + $0x200] sm:$0xff]  ;;  %v495_v29 = vld [vmem:[%s1669_s26 + $0x208] sm:$0xff]  ;;  %v1268_v31 = vcombine.low %v430_v18, %v434_v19  ;;  %v1270_v32 = vcombine.low %v431_v20, %v435_v21  ;;  %v468_v61 = vld [vmem:[%s1669_s26 + $0x130] sm:$0xff] }
  0x60   : > { %894 = vmatpush1.bf16.msra.mxu0 %v1300_v62  ;;  %938 = vmatprep.subr.bf16.mxu1 %v1295_v1  ;;  %v498_v28 = vld [vmem:[%s1669_s26 + $0x220] sm:$0xff]  ;;  %v499_v30 = vld [vmem:[%s1669_s26 + $0x228] sm:$0xff]  ;;  %v465_v62 = vld [vmem:[%s1669_s26 + $0x118] sm:$0xff]  ;;  %v1314_v1 = vcombine.low %v473_v54, %v477_v55  ;;  %v1305_v2 = vcombine.high %v464_v60, %v468_v61 }
  0x61   : > { %895 = vmatprep.subr.bf16.mxu0 %v1293_v0  ;;  %v1333_v33 = vcombine.high %v494_v27, %v498_v28  ;;  %v1335_v34 = vcombine.high %v495_v29, %v499_v30  ;;  %v1332_v39 = vcombine.low %v494_v27, %v498_v28  ;;  %v1334_v40 = vcombine.low %v495_v29, %v499_v30  ;;  %v1719_v45 = vld [vmem:[%s1851_s1] ss:$8 sps:$4 sm:$0xff]   ;;  %v469_v63 = vld [vmem:[%s1669_s26 + $0x138] sm:$0xff]  ;;  %v456_v4 = vld [vmem:[%s1669_s26 + $0xd0] sm:$0xff] }
  0x62   : > { %v1312_v0 = vcombine.low %v472_v52, %v476_v53  ;;  %v1307_v3 = vcombine.high %v465_v62, %v469_v63  ;;  %v460_v5 = vld [vmem:[%s1669_s26 + $0xf0] sm:$0xff]  ;;  %v449_v13 = vld [vmem:[%s1669_s26 + $0x98] sm:$0xff] }
  0x63   : > { %939 = vmatpush1.bf16.msra.mxu1 %v1294_v7  ;;  %v461_v7 = vld [vmem:[%s1669_s26 + $0xf8] sm:$0xff]  ;;  %v448_v11 = vld [vmem:[%s1669_s26 + $0x90] sm:$0xff] }
  0x64   : > { %896 = vmatpush1.bf16.msra.mxu0 %v1292_v6  ;;  %940 = vmatprep.subr.bf16.mxu1 %v1287_v9  ;;  %v457_v6 = vld [vmem:[%s1669_s26 + $0xd8] sm:$0xff]  ;;  %v1297_v9 = vcombine.high %v456_v4, %v460_v5  ;;  %v452_v12 = vld [vmem:[%s1669_s26 + $0xb0] sm:$0xff] }
  0x65   : > { %897 = vmatprep.subr.bf16.mxu0 %v1285_v8  ;;  %v1304_v8 = vcombine.low %v464_v60, %v468_v61  ;;  %v1299_v10 = vcombine.high %v457_v6, %v461_v7  ;;  %v440_v19 = vld [vmem:[%s1669_s26 + $0x50] sm:$0xff]  ;;  %v441_v21 = vld [vmem:[%s1669_s26 + $0x58] sm:$0xff] }
  0x66   : > { %v444_v20 = vld [vmem:[%s1669_s26 + $0x70] sm:$0xff]  ;;  %v433_v30 = vld [vmem:[%s1669_s26 + $0x18] sm:$0xff] }
  0x67   : > { %941 = vmatpush1.bf16.msra.mxu1 %v1286_v15  ;;  %v1296_v15 = vcombine.low %v456_v4, %v460_v5  ;;  %v432_v28 = vld [vmem:[%s1669_s26 + $0x10] sm:$0xff]  ;;  %v497_v38 = vld [vmem:[%s1669_s26 + $0x218] sm:$0xff]  ;;  %v1083_v5 = vld [vmem:[%s1764_s6 + $0x40] sm:$0xff] }
  0x68   : > { %898 = vmatpush1.bf16.msra.mxu0 %v1284_v14  ;;  %942 = vmatprep.subr.bf16.mxu1 %v1279_v17  ;;  %v453_v14 = vld [vmem:[%s1669_s26 + $0xb8] sm:$0xff]  ;;  %v1289_v17 = vcombine.high %v448_v11, %v452_v12  ;;  %v436_v29 = vld [vmem:[%s1669_s26 + $0x30] sm:$0xff] }
  0x69   : > { %899 = vmatprep.subr.bf16.mxu0 %v1277_v16  ;;  %v1298_v16 = vcombine.low %v457_v6, %v461_v7  ;;  %v1291_v18 = vcombine.high %v449_v13, %v453_v14  ;;  %v496_v36 = vld [vmem:[%s1669_s26 + $0x210] sm:$0xff] }
  0x6a   : > { %v500_v37 = vld [vmem:[%s1669_s26 + $0x230] sm:$0xff] }
  0x6b   : > { %943 = vmatpush1.bf16.msra.mxu1 %v1278_v23  ;;  %v1288_v23 = vcombine.low %v448_v11, %v452_v12  ;;  %v1336_v44 = vcombine.low %v496_v36, %v500_v37  ;;  %v1077_v55 = vld [vmem:[%s1764_s6 + $0x10] sm:$0xff] }
  0x6c   : > { %900 = vmatpush1.bf16.msra.mxu0 %v1276_v22  ;;  %944 = vmatprep.subr.bf16.mxu1 %v1271_v26  ;;  %v445_v22 = vld [vmem:[%s1669_s26 + $0x78] sm:$0xff]  ;;  %v1281_v26 = vcombine.high %v440_v19, %v444_v20 }
  0x6d   : > { %901 = vmatprep.subr.bf16.mxu0 %v1269_v25  ;;  %v1290_v25 = vcombine.low %v449_v13, %v453_v14  ;;  %v1283_v27 = vcombine.high %v441_v21, %v445_v22  ;;  %v1084_v14 = vld [vmem:[%s1764_s6 + $0x48] sm:$0xff] }
  0x6f   : > { %945 = vmatpush1.bf16.msra.mxu1 %v1270_v32  ;;  %v1280_v32 = vcombine.low %v440_v19, %v444_v20 }
  0x70   : > { %902 = vmatpush1.bf16.msra.mxu0 %v1268_v31  ;;  %960 = vmatprep.subr.bf16.mxu1 %v1335_v34  ;;  %v437_v31 = vld [vmem:[%s1669_s26 + $0x38] sm:$0xff]  ;;  %v1273_v34 = vcombine.high %v432_v28, %v436_v29 }
  0x71   : > { %917 = vmatprep.subr.bf16.mxu0 %v1333_v33  ;;  %v1282_v33 = vcombine.low %v441_v21, %v445_v22  ;;  %v1275_v35 = vcombine.high %v433_v30, %v437_v31 }
  0x73   : > { %961 = vmatpush2.bf16.msra.mxu1 %v1334_v40  ;;  %v1272_v40 = vcombine.low %v432_v28, %v436_v29 }
  0x74   : > { %918 = vmatpush2.bf16.msra.mxu0 %v1332_v39  ;;  %1016 = vmatprep.subr.bf16.mxu1 %v1331_v42  ;;  %v501_v39 = vld [vmem:[%s1669_s26 + $0x238] sm:$0xff]  ;;  %v1337_v42 = vcombine.high %v496_v36, %v500_v37 }
  0x75   : > { %973 = vmatprep.subr.bf16.mxu0 %v1329_v41  ;;  %v1274_v41 = vcombine.low %v433_v30, %v437_v31  ;;  %v1339_v43 = vcombine.high %v497_v38, %v501_v39  ;;  %v1338_v46 = vcombine.low %v497_v38, %v501_v39  ;;  %v1081_v31 = vld [vmem:[%s1764_s6 + $0x30] sm:$0xff] }
  0x76   : > { %963 = vmatmul.mubr.bf16.vlgmr.msra.gmra.mxu1 %v1719_v45 }
  0x77   : > { %920 = vmatmul.mubr.bf16.vlgmr.msra.gmra.mxu0 %v1719_v45  ;;  %1017 = vmatpush1.bf16.msra.mxu1 %v1330_v49 }
  0x78   : > { %974 = vmatpush1.bf16.msra.mxu0 %v1328_v48  ;;  %1018 = vmatprep.subr.bf16.mxu1 %v1323_v51  ;;  %v1075_v51 = vld [vmem:[%s1764_s6] sm:$0xff] }
  0x79   : > { %975 = vmatprep.subr.bf16.mxu0 %v1321_v50  ;;  %1342 = vmatprep.mubr.msk.bf16.mxu0 %vm883_vm0, %v1658_v24 }
  0x7a   : > { %1343 = vmatprep.mubr.msk.bf16.mxu1 %vm883_vm0, %v1658_v24  ;;  %v1306_v24 = vcombine.low %v465_v62, %v469_v63 }
  0x7b   : > { %1019 = vmatpush1.bf16.msra.mxu1 %v1322_v57 }
  0x7c   : > { %976 = vmatpush1.bf16.msra.mxu0 %v1320_v56  ;;  %1020 = vmatprep.subr.bf16.mxu1 %v1315_v59  ;;  %v1076_v59 = vld [vmem:[%s1764_s6 + $0x8] sm:$0xff] }
  0x7d   : > { %977 = vmatprep.subr.bf16.mxu0 %v1313_v58 }
  0x7f   : > { %1021 = vmatpush1.bf16.msra.mxu1 %v1314_v1 }
  0x80   : > { %978 = vmatpush1.bf16.msra.mxu0 %v1312_v0  ;;  %1022 = vmatprep.subr.bf16.mxu1 %v1307_v3  ;;  %v1078_v0 = vld [vmem:[%s1764_s6 + $0x18] sm:$0xff] }
  0x81   : > { %979 = vmatprep.subr.bf16.mxu0 %v1305_v2 }
  0x83   : > { %1023 = vmatpush1.bf16.msra.mxu1 %v1306_v24 }
  0x84   : > { %980 = vmatpush1.bf16.msra.mxu0 %v1304_v8  ;;  %1024 = vmatprep.subr.bf16.mxu1 %v1299_v10 }
  0x85   : > { %981 = vmatprep.subr.bf16.mxu0 %v1297_v9  ;;  %v1085_v9 = vld [vmem:[%s1764_s6 + $0x50] sm:$0xff] }
  0x87   : > { %1025 = vmatpush1.bf16.msra.mxu1 %v1298_v16 }
  0x88   : > { %982 = vmatpush1.bf16.msra.mxu0 %v1296_v15  ;;  %1026 = vmatprep.subr.bf16.mxu1 %v1291_v18  ;;  %v1086_v18 = vld [vmem:[%s1764_s6 + $0x58] sm:$0xff] }
  0x89   : > { %983 = vmatprep.subr.bf16.mxu0 %v1289_v17 }
  0x8b   : > { %1027 = vmatpush1.bf16.msra.mxu1 %v1290_v25 }
  0x8c   : > { %984 = vmatpush1.bf16.msra.mxu0 %v1288_v23  ;;  %1028 = vmatprep.subr.bf16.mxu1 %v1283_v27  ;;  %v1079_v27 = vld [vmem:[%s1764_s6 + $0x20] sm:$0xff] }
  0x8d   : > { %985 = vmatprep.subr.bf16.mxu0 %v1281_v26 }
  0x8f   : > { %1029 = vmatpush1.bf16.msra.mxu1 %v1282_v33 }
  0x90   : > { %986 = vmatpush1.bf16.msra.mxu0 %v1280_v32  ;;  %1030 = vmatprep.subr.bf16.mxu1 %v1275_v35  ;;  %v1080_v35 = vld [vmem:[%s1764_s6 + $0x28] sm:$0xff] }
  0x91   : > { %987 = vmatprep.subr.bf16.mxu0 %v1273_v34 }
  0x93   : > { %1031 = vmatpush1.bf16.msra.mxu1 %v1274_v41 }
  0x94   : > { %988 = vmatpush1.bf16.msra.mxu0 %v1272_v40  ;;  %1046 = vmatprep.subr.bf16.mxu1 %v1339_v43  ;;  %v1082_v40 = vld [vmem:[%s1764_s6 + $0x38] sm:$0xff] }
  0x95   : > { %1003 = vmatprep.subr.bf16.mxu0 %v1337_v42 }
  0x97   : > { %1047 = vmatpush2.bf16.msra.mxu1 %v1338_v46  ;;  %v1087_v46 = vld [vmem:[%s1764_s6 + $0x60] sm:$0xff] }
  0x98   : > { %1004 = vmatpush2.bf16.msra.mxu0 %v1336_v44 }
  0x9a   : > { %1049 = vmatmul.mubr.bf16.vlgmr.msra.gmra.mxu1 %v1719_v45 }
  0x9b   : > { %1006 = vmatmul.mubr.bf16.vlgmr.msra.gmra.mxu0 %v1719_v45 }
  0xcb   : > { %v1759_v47 = vpop.permute.xlu0 %506 }
  0xd0   : > { %v1768_v54 = vpop.permute.xlu0 %511 }
 0x136   : > { %v964_v50 = vpop.f32.mrf.mxu1 }
 0x137   : > { %v921_v48 = vpop.f32.mrf.mxu0  ;;  %v965_v52 = vadd.f32 %v964_v50, %v1759_v47 }
 0x138   : > { %v922_v49 = vadd.f32 %v921_v48, %v1759_v47  ;;  %v966_v57 = vpop.f32.mrf.mxu1 }
 0x139   : > { %v923_v53 = vpop.f32.mrf.mxu0  ;;  %v1061_v58 = vmax.f32 %v965_v52, 0.0  ;;  %v967_v60 = vadd.f32 %v966_v57, %v1759_v47 }
 0x13a   : > { %v1059_v45 = vmax.f32 %v922_v49, 0.0  ;;  %v924_v56 = vadd.f32 %v923_v53, %v1759_v47  ;;  %v968_v2 = vpop.f32.mrf.mxu1 }
 0x13b   : > { %v925_v61 = vpop.f32.mrf.mxu0  ;;  %v1093_v3 = vadd.f32 %v1077_v55, %v1061_v58  ;;  %v1062_v4 = vmax.f32 %v967_v60, 0.0  ;;  %v969_v6 = vadd.f32 %v968_v2, %v1768_v54  ;;  %v1090_v60 = vld [vmem:[%s1764_s6 + $0x78] sm:$0xff] }
 0x13c   : > { %v1091_v62 = vadd.f32 %v1075_v51, %v1059_v45  ;;  %v1060_v63 = vmax.f32 %v924_v56, 0.0  ;;  %v926_v1 = vadd.f32 %v925_v61, %v1768_v54  ;;  %v970_v11 = vpop.f32.mrf.mxu1  ;;  %v1089_v51 = vld [vmem:[%s1764_s6 + $0x70] sm:$0xff]  ;;  %v1088_v56 = vld [vmem:[%s1764_s6 + $0x68] sm:$0xff] }
 0x13d   : > { %v927_v7 = vpop.f32.mrf.mxu0  ;;  %1109 = vst [vmem:[%s1778_s15 + $0x10] sm:$0xff] %v1093_v3  ;;  %v1094_v12 = vadd.f32 %v1078_v0, %v1062_v4  ;;  %v1069_v13 = vmax.f32 %v969_v6, 0.0  ;;  %v971_v15 = vadd.f32 %v970_v11, %v1768_v54 }
 0x13e   : > { %1107 = vst [vmem:[%s1778_s15] sm:$0xff] %v1091_v62  ;;  %v1092_v8 = vadd.f32 %v1076_v59, %v1060_v63  ;;  %v1067_v24 = vmax.f32 %v926_v1, 0.0  ;;  %v928_v10 = vadd.f32 %v927_v7, %v1768_v54 }
 0x13f   : > { %1110 = vst [vmem:[%s1778_s15 + $0x18] sm:$0xff] %v1094_v12  ;;  %v1101_v19 = vadd.f32 %v1085_v9, %v1069_v13  ;;  %v1070_v20 = vmax.f32 %v971_v15, 0.0 }
 0x140   : > { %1108 = vst [vmem:[%s1778_s15 + $0x8] sm:$0xff] %v1092_v8  ;;  %v1099_v16 = vadd.f32 %v1083_v5, %v1067_v24  ;;  %v1068_v17 = vmax.f32 %v928_v10, 0.0 }
 0x141   : > { %1117 = vst [vmem:[%s1778_s15 + $0x50] sm:$0xff] %v1101_v19  ;;  %v1102_v22 = vadd.f32 %v1086_v18, %v1070_v20 }
 0x142   : > { %1115 = vst [vmem:[%s1778_s15 + $0x40] sm:$0xff] %v1099_v16  ;;  %v1100_v21 = vadd.f32 %v1084_v14, %v1068_v17 }
 0x143   : > { %1118 = vst [vmem:[%s1778_s15 + $0x58] sm:$0xff] %v1102_v22 }
 0x144   : > { %1116 = vst [vmem:[%s1778_s15 + $0x48] sm:$0xff] %v1100_v21  ;;  %v1149_v2 = vld [vmem:[%s1778_s15 + $0x10] sm:$0xff] (%p1467_p5) }
 0x145   : > { %1150 = vst [vmem:[%s1132_s24 + $0x10] sm:$0xff] (%p1467_p5), %v1149_v2 }
 0x146   : > { %v1151_v3 = vld [vmem:[%s1778_s15 + $0x18] sm:$0xff] (%p1467_p5) }
 0x147   : > { %v1147_v1 = vld [vmem:[%s1778_s15 + $0x8] sm:$0xff] (%p1467_p5)  ;;  %1152 = vst [vmem:[%s1132_s24 + $0x18] sm:$0xff] (%p1467_p5), %v1151_v3 }
 0x148   : > { %1148 = vst [vmem:[%s1132_s24 + $0x8] sm:$0xff] (%p1467_p5), %v1147_v1  ;;  %v1165_v9 = vld [vmem:[%s1778_s15 + $0x50] sm:$0xff] (%p1467_p5) }
 0x149   : > { %v1161_v8 = vld [vmem:[%s1778_s15 + $0x40] sm:$0xff] (%p1467_p5)  ;;  %1166 = vst [vmem:[%s1132_s24 + $0x90] sm:$0xff] (%p1467_p5), %v1165_v9 }
 0x14a   : > { %1162 = vst [vmem:[%s1132_s24 + $0x80] sm:$0xff] (%p1467_p5), %v1161_v8  ;;  %v1167_v10 = vld [vmem:[%s1778_s15 + $0x58] sm:$0xff] (%p1467_p5) }
 0x14b   : > { %v1163_v24 = vld [vmem:[%s1778_s15 + $0x48] sm:$0xff] (%p1467_p5)  ;;  %1168 = vst [vmem:[%s1132_s24 + $0x98] sm:$0xff] (%p1467_p5), %v1167_v10 }
 0x14c   : > { %1164 = vst [vmem:[%s1132_s24 + $0x88] sm:$0xff] (%p1467_p5), %v1163_v24 }
 0x15a   : > { %v1050_v26 = vpop.f32.mrf.mxu1 }
 0x15b   : > { %v1007_v23 = vpop.f32.mrf.mxu0  ;;  %v1051_v28 = vadd.f32 %v1050_v26, %v1759_v47 }
 0x15c   : > { %v1008_v25 = vadd.f32 %v1007_v23, %v1759_v47  ;;  %v1052_v33 = vpop.f32.mrf.mxu1 }
 0x15d   : > { %v1009_v29 = vpop.f32.mrf.mxu0  ;;  %v1065_v34 = vmax.f32 %v1051_v28, 0.0  ;;  %v1053_v36 = vadd.f32 %v1052_v33, %v1759_v47 }
 0x15e   : > { %v1063_v30 = vmax.f32 %v1008_v25, 0.0  ;;  %v1010_v32 = vadd.f32 %v1009_v29, %v1759_v47  ;;  %v1054_v42 = vpop.f32.mrf.mxu1 }
 0x15f   : > { %v1011_v37 = vpop.f32.mrf.mxu0  ;;  %v1097_v43 = vadd.f32 %v1081_v31, %v1065_v34  ;;  %v1066_v44 = vmax.f32 %v1053_v36, 0.0  ;;  %v1055_v48 = vadd.f32 %v1054_v42, %v1768_v54 }
 0x160   : > { %v1095_v38 = vadd.f32 %v1079_v27, %v1063_v30  ;;  %v1064_v39 = vmax.f32 %v1010_v32, 0.0  ;;  %v1012_v41 = vadd.f32 %v1011_v37, %v1768_v54  ;;  %v1056_v53 = vpop.f32.mrf.mxu1 }
 0x161   : > { %v1013_v49 = vpop.f32.mrf.mxu0  ;;  %1113 = vst [vmem:[%s1778_s15 + $0x30] sm:$0xff] %v1097_v43  ;;  %v1098_v45 = vadd.f32 %v1082_v40, %v1066_v44  ;;  %v1073_v55 = vmax.f32 %v1055_v48, 0.0  ;;  %v1057_v57 = vadd.f32 %v1056_v53, %v1768_v54 }
 0x162   : > { %1111 = vst [vmem:[%s1778_s15 + $0x20] sm:$0xff] %v1095_v38  ;;  %v1096_v47 = vadd.f32 %v1080_v35, %v1064_v39  ;;  %v1071_v50 = vmax.f32 %v1012_v41, 0.0  ;;  %v1014_v52 = vadd.f32 %v1013_v49, %v1768_v54  ;;  %v1145_v54 = vld [vmem:[%s1778_s15] sm:$0xff] (%p1467_p5) }
 0x163   : > { %1114 = vst [vmem:[%s1778_s15 + $0x38] sm:$0xff] %v1098_v45  ;;  %v1105_v61 = vadd.f32 %v1089_v51, %v1073_v55  ;;  %v1074_v62 = vmax.f32 %v1057_v57, 0.0  ;;  %1146 = vst [vmem:[%s1132_s24] sm:$0xff] (%p1467_p5), %v1145_v54 }
 0x164   : > { %1112 = vst [vmem:[%s1778_s15 + $0x28] sm:$0xff] %v1096_v47  ;;  %v1103_v58 = vadd.f32 %v1087_v46, %v1071_v50  ;;  %v1072_v59 = vmax.f32 %v1014_v52, 0.0  ;;  %1129 = sbr.rel (!%p1467_p5) target bundleno = 369 (0x171), region = 86 }
 0x165   : > { %1121 = vst [vmem:[%s1778_s15 + $0x70] sm:$0xff] %v1105_v61  ;;  %v1106_v0 = vadd.f32 %v1090_v60, %v1074_v62 }
 0x166   : > { %1119 = vst [vmem:[%s1778_s15 + $0x60] sm:$0xff] %v1103_v58  ;;  %v1104_v63 = vadd.f32 %v1088_v56, %v1072_v59 }
 0x167   : > { %1122 = vst [vmem:[%s1778_s15 + $0x78] sm:$0xff] %v1106_v0 }
 0x168   : > { %1120 = vst [vmem:[%s1778_s15 + $0x68] sm:$0xff] %v1104_v63  ;;  %v1157_v6 = vld [vmem:[%s1778_s15 + $0x30] sm:$0xff] (%p1467_p5) }
 0x169   : > { %v1153_v4 = vld [vmem:[%s1778_s15 + $0x20] sm:$0xff]  ;;  %1158 = vst [vmem:[%s1132_s24 + $0x30] sm:$0xff] %v1157_v6 }
 0x16a   : > { %1154 = vst [vmem:[%s1132_s24 + $0x20] sm:$0xff] %v1153_v4  ;;  %v1159_v7 = vld [vmem:[%s1778_s15 + $0x38] sm:$0xff] }
 0x16b   : > { %v1155_v5 = vld [vmem:[%s1778_s15 + $0x28] sm:$0xff]  ;;  %1160 = vst [vmem:[%s1132_s24 + $0x38] sm:$0xff] %v1159_v7 }
 0x16c   : > { %1156 = vst [vmem:[%s1132_s24 + $0x28] sm:$0xff] %v1155_v5  ;;  %v1173_v13 = vld [vmem:[%s1778_s15 + $0x70] sm:$0xff] }
 0x16d   : > { %v1169_v11 = vld [vmem:[%s1778_s15 + $0x60] sm:$0xff]  ;;  %1174 = vst [vmem:[%s1132_s24 + $0xb0] sm:$0xff] %v1173_v13 }
 0x16e   : > { %1170 = vst [vmem:[%s1132_s24 + $0xa0] sm:$0xff] %v1169_v11  ;;  %v1175_v14 = vld [vmem:[%s1778_s15 + $0x78] sm:$0xff] }
 0x16f   : > { %v1171_v12 = vld [vmem:[%s1778_s15 + $0x68] sm:$0xff]  ;;  %1176 = vst [vmem:[%s1132_s24 + $0xb8] sm:$0xff] %v1175_v14 }
 0x170   : > { %1172 = vst [vmem:[%s1132_s24 + $0xa8] sm:$0xff] %v1171_v12 }
 0x171 PF: > { %p11_p10 = scmp.ge.s32.totalorder %s1450_s19, 4   ;;  %s1857_s15 = smov %s1401_s16 }
 0x172   : > { %s1858_s16 = smov %s1461_s22  ;;  %s1859_s17 = smov %s1450_s19 }
 0x173   :  { %13 = sbr.rel (!%p11_p10) target bundleno = 2 (0x2), region = 148 }

// kernel: net_forward.9
= control target key start
LH: loop header
LB: loop body
LE: loop exit
PB: predicated region body
PF: predicated region fallthrough
CT: control target
= control target key end

     0   :  { %s1275_s12 = smov 0   ;;  %s1277_s13 = smov 0   ;;  %s1623_s0 = inlined_call_operand.vmem [shape: bf16[144,2048], index: 0, kind: input, shape index: {}]   ;;  %s1624_s1 = inlined_call_operand.vmem [shape: bf16[16,144], index: 1, kind: input, shape index: {}]   ;;  %s1625_s2 = inlined_call_operand.vmem [shape: f32[16,1], index: 2, kind: input, shape index: {}]   ;;  %s1626_s3 = inlined_call_operand.vmem [shape: f32[16,2048], index: 3, kind: output, shape index: {}]  }
   0x1   :  { %s1279_s14 = smov 0  }
   0x2 LB: > { %s1106_s15 = sadd.s32 4294967295, %s1252_s14   ;;  %s1292_s16 = sadd.s32 1, %s1252_s14   ;;  %s1252_s14 = sphi %s1279_s14, %s1630_s14   ;;  %s1248_s13 = sphi %s1277_s13, %s1629_s13   ;;  %s1244_s12 = sphi %s1275_s12, %s1628_s12  }
   0x3   : > { %s17_s17 = ssub.s32 %s1252_s14, %s1292_s16  ;;  %s20_s18 = sadd.s32 1, %s1248_s13 }
   0x4   : > { %p18_p0 = scmp.eq.s32.totalorder %s17_s17, 0  ;;  %p27_p1 = scmp.ne.s32.totalorder %s1248_s13, %s1244_s12 }
   0x5   : > { %p28_p2 = scmp.eq.s32.totalorder %s1252_s14, 0  ;;  %p99_p3 = scmp.eq.s32.totalorder %s1106_s15, 1 }
   0x6   : > { %s1303_s19 = scalar_select %p18_p0, %s1248_s13, %s20_s18  }
   0x7   : > { %p29_p4 = por %p28_p2, %p27_p1  ;;  %p1305_p5 = por %p99_p3, %p27_p1 }
   0x8   : > { %p1109_p6 = scmp.ge.s32.totalorder %s1252_s14, 2 }
   0xa   : > { %127 = sbr.rel (%p1109_p6) target bundleno = 56 (0x38), region = 24 }
   0xf   : > { %130 = sbr.rel (!%p29_p4) target bundleno = 56 (0x38), region = 28  ;;  %s132_s21 = sand.u32 (%p29_p4), 1, %s1248_s13  }
  0x10   : > { %s1197_s22 = sshll.u32 (%p29_p4), %s1252_s14, 5  ;;  %s1199_s23 = smul.u32 (%p29_p4), 576, %s132_s21 }
  0x11   : > { %s1315_s26 = scalar_lea.vmem (%p29_p4), %s1623_s0, %s1197_s22 }
  0x12   : > { %v150_v0 = vld [vmem:[%s1315_s26] sm:$0xff] (%p29_p4)  ;;  %v152_v1 = vld [vmem:[%s1315_s26 + $0x8] sm:$0xff] (%p29_p4)  ;;  %v154_v2 = vld [vmem:[%s1315_s26 + $0x10] sm:$0xff] (%p29_p4)  ;;  %s1323_s27 = scalar_lea.vmem (%p29_p4), [#allocation2], %s1199_s23 }
  0x13   : > { %v156_v3 = vld [vmem:[%s1315_s26 + $0x18] sm:$0xff] (%p29_p4)  ;;  %v158_v4 = vld [vmem:[%s1315_s26 + $0x40] sm:$0xff] (%p29_p4)  ;;  %v160_v5 = vld [vmem:[%s1315_s26 + $0x48] sm:$0xff] (%p29_p4)  ;;  %151 = vst [vmem:[%s1323_s27] sm:$0xff] (%p29_p4), %v150_v0 }
  0x14   : > { %153 = vst [vmem:[%s1323_s27 + $0x8] sm:$0xff] %v152_v1  ;;  %155 = vst [vmem:[%s1323_s27 + $0x10] sm:$0xff] %v154_v2  ;;  %v162_v6 = vld [vmem:[%s1315_s26 + $0x50] sm:$0xff]  ;;  %v164_v7 = vld [vmem:[%s1315_s26 + $0x58] sm:$0xff] }
  0x15   : > { %157 = vst [vmem:[%s1323_s27 + $0x18] sm:$0xff] %v156_v3  ;;  %159 = vst [vmem:[%s1323_s27 + $0x20] sm:$0xff] %v158_v4  ;;  %v166_v8 = vld [vmem:[%s1315_s26 + $0x80] sm:$0xff]  ;;  %v168_v9 = vld [vmem:[%s1315_s26 + $0x88] sm:$0xff] }
  0x16   : > { %161 = vst [vmem:[%s1323_s27 + $0x28] sm:$0xff] %v160_v5  ;;  %163 = vst [vmem:[%s1323_s27 + $0x30] sm:$0xff] %v162_v6  ;;  %v170_v10 = vld [vmem:[%s1315_s26 + $0x90] sm:$0xff]  ;;  %v172_v11 = vld [vmem:[%s1315_s26 + $0x98] sm:$0xff] }
  0x17   : > { %165 = vst [vmem:[%s1323_s27 + $0x38] sm:$0xff] %v164_v7  ;;  %167 = vst [vmem:[%s1323_s27 + $0x40] sm:$0xff] %v166_v8  ;;  %v174_v12 = vld [vmem:[%s1315_s26 + $0xc0] sm:$0xff]  ;;  %v176_v13 = vld [vmem:[%s1315_s26 + $0xc8] sm:$0xff] }
  0x18   : > { %169 = vst [vmem:[%s1323_s27 + $0x48] sm:$0xff] %v168_v9  ;;  %171 = vst [vmem:[%s1323_s27 + $0x50] sm:$0xff] %v170_v10  ;;  %v178_v14 = vld [vmem:[%s1315_s26 + $0xd0] sm:$0xff]  ;;  %v180_v15 = vld [vmem:[%s1315_s26 + $0xd8] sm:$0xff] }
  0x19   : > { %173 = vst [vmem:[%s1323_s27 + $0x58] sm:$0xff] %v172_v11  ;;  %175 = vst [vmem:[%s1323_s27 + $0x60] sm:$0xff] %v174_v12  ;;  %v182_v16 = vld [vmem:[%s1315_s26 + $0x100] sm:$0xff]  ;;  %v184_v17 = vld [vmem:[%s1315_s26 + $0x108] sm:$0xff] }
  0x1a   : > { %177 = vst [vmem:[%s1323_s27 + $0x68] sm:$0xff] %v176_v13  ;;  %179 = vst [vmem:[%s1323_s27 + $0x70] sm:$0xff] %v178_v14  ;;  %v186_v18 = vld [vmem:[%s1315_s26 + $0x110] sm:$0xff]  ;;  %v188_v19 = vld [vmem:[%s1315_s26 + $0x118] sm:$0xff] }
  0x1b   : > { %181 = vst [vmem:[%s1323_s27 + $0x78] sm:$0xff] %v180_v15  ;;  %183 = vst [vmem:[%s1323_s27 + $0x80] sm:$0xff] %v182_v16  ;;  %v190_v20 = vld [vmem:[%s1315_s26 + $0x140] sm:$0xff]  ;;  %v192_v21 = vld [vmem:[%s1315_s26 + $0x148] sm:$0xff] }
  0x1c   : > { %185 = vst [vmem:[%s1323_s27 + $0x88] sm:$0xff] %v184_v17  ;;  %187 = vst [vmem:[%s1323_s27 + $0x90] sm:$0xff] %v186_v18  ;;  %v194_v22 = vld [vmem:[%s1315_s26 + $0x150] sm:$0xff]  ;;  %v196_v23 = vld [vmem:[%s1315_s26 + $0x158] sm:$0xff] }
  0x1d   : > { %189 = vst [vmem:[%s1323_s27 + $0x98] sm:$0xff] %v188_v19  ;;  %191 = vst [vmem:[%s1323_s27 + $0xa0] sm:$0xff] %v190_v20  ;;  %v198_v24 = vld [vmem:[%s1315_s26 + $0x180] sm:$0xff]  ;;  %v200_v25 = vld [vmem:[%s1315_s26 + $0x188] sm:$0xff] }
  0x1e   : > { %193 = vst [vmem:[%s1323_s27 + $0xa8] sm:$0xff] %v192_v21  ;;  %195 = vst [vmem:[%s1323_s27 + $0xb0] sm:$0xff] %v194_v22  ;;  %v202_v26 = vld [vmem:[%s1315_s26 + $0x190] sm:$0xff]  ;;  %v204_v27 = vld [vmem:[%s1315_s26 + $0x198] sm:$0xff] }
  0x1f   : > { %197 = vst [vmem:[%s1323_s27 + $0xb8] sm:$0xff] %v196_v23  ;;  %199 = vst [vmem:[%s1323_s27 + $0xc0] sm:$0xff] %v198_v24  ;;  %v206_v28 = vld [vmem:[%s1315_s26 + $0x1c0] sm:$0xff]  ;;  %v208_v29 = vld [vmem:[%s1315_s26 + $0x1c8] sm:$0xff] }
  0x20   : > { %201 = vst [vmem:[%s1323_s27 + $0xc8] sm:$0xff] %v200_v25  ;;  %203 = vst [vmem:[%s1323_s27 + $0xd0] sm:$0xff] %v202_v26  ;;  %v210_v30 = vld [vmem:[%s1315_s26 + $0x1d0] sm:$0xff]  ;;  %v212_v31 = vld [vmem:[%s1315_s26 + $0x1d8] sm:$0xff] }
  0x21   : > { %205 = vst [vmem:[%s1323_s27 + $0xd8] sm:$0xff] %v204_v27  ;;  %207 = vst [vmem:[%s1323_s27 + $0xe0] sm:$0xff] %v206_v28  ;;  %v214_v32 = vld [vmem:[%s1315_s26 + $0x200] sm:$0xff]  ;;  %v216_v33 = vld [vmem:[%s1315_s26 + $0x208] sm:$0xff] }
  0x22   : > { %209 = vst [vmem:[%s1323_s27 + $0xe8] sm:$0xff] %v208_v29  ;;  %211 = vst [vmem:[%s1323_s27 + $0xf0] sm:$0xff] %v210_v30  ;;  %v218_v34 = vld [vmem:[%s1315_s26 + $0x210] sm:$0xff]  ;;  %v220_v35 = vld [vmem:[%s1315_s26 + $0x218] sm:$0xff] }
  0x23   : > { %213 = vst [vmem:[%s1323_s27 + $0xf8] sm:$0xff] %v212_v31  ;;  %215 = vst [vmem:[%s1323_s27 + $0x100] sm:$0xff] %v214_v32  ;;  %v222_v36 = vld [vmem:[%s1315_s26 + $0x240] sm:$0xff]  ;;  %v224_v37 = vld [vmem:[%s1315_s26 + $0x248] sm:$0xff] }
  0x24   : > { %217 = vst [vmem:[%s1323_s27 + $0x108] sm:$0xff] %v216_v33  ;;  %219 = vst [vmem:[%s1323_s27 + $0x110] sm:$0xff] %v218_v34  ;;  %v226_v38 = vld [vmem:[%s1315_s26 + $0x250] sm:$0xff]  ;;  %v228_v39 = vld [vmem:[%s1315_s26 + $0x258] sm:$0xff] }
  0x25   : > { %221 = vst [vmem:[%s1323_s27 + $0x118] sm:$0xff] %v220_v35  ;;  %223 = vst [vmem:[%s1323_s27 + $0x120] sm:$0xff] %v222_v36  ;;  %v230_v40 = vld [vmem:[%s1315_s26 + $0x280] sm:$0xff]  ;;  %v232_v41 = vld [vmem:[%s1315_s26 + $0x288] sm:$0xff] }
  0x26   : > { %225 = vst [vmem:[%s1323_s27 + $0x128] sm:$0xff] %v224_v37  ;;  %227 = vst [vmem:[%s1323_s27 + $0x130] sm:$0xff] %v226_v38  ;;  %v234_v42 = vld [vmem:[%s1315_s26 + $0x290] sm:$0xff]  ;;  %v236_v43 = vld [vmem:[%s1315_s26 + $0x298] sm:$0xff] }
  0x27   : > { %229 = vst [vmem:[%s1323_s27 + $0x138] sm:$0xff] %v228_v39  ;;  %231 = vst [vmem:[%s1323_s27 + $0x140] sm:$0xff] %v230_v40  ;;  %v238_v44 = vld [vmem:[%s1315_s26 + $0x2c0] sm:$0xff]  ;;  %v240_v45 = vld [vmem:[%s1315_s26 + $0x2c8] sm:$0xff] }
  0x28   : > { %233 = vst [vmem:[%s1323_s27 + $0x148] sm:$0xff] %v232_v41  ;;  %235 = vst [vmem:[%s1323_s27 + $0x150] sm:$0xff] %v234_v42  ;;  %v242_v46 = vld [vmem:[%s1315_s26 + $0x2d0] sm:$0xff]  ;;  %v244_v47 = vld [vmem:[%s1315_s26 + $0x2d8] sm:$0xff] }
  0x29   : > { %237 = vst [vmem:[%s1323_s27 + $0x158] sm:$0xff] %v236_v43  ;;  %239 = vst [vmem:[%s1323_s27 + $0x160] sm:$0xff] %v238_v44  ;;  %v246_v48 = vld [vmem:[%s1315_s26 + $0x300] sm:$0xff]  ;;  %v248_v49 = vld [vmem:[%s1315_s26 + $0x308] sm:$0xff] }
  0x2a   : > { %241 = vst [vmem:[%s1323_s27 + $0x168] sm:$0xff] %v240_v45  ;;  %243 = vst [vmem:[%s1323_s27 + $0x170] sm:$0xff] %v242_v46  ;;  %v250_v50 = vld [vmem:[%s1315_s26 + $0x310] sm:$0xff]  ;;  %v252_v51 = vld [vmem:[%s1315_s26 + $0x318] sm:$0xff] }
  0x2b   : > { %245 = vst [vmem:[%s1323_s27 + $0x178] sm:$0xff] %v244_v47  ;;  %247 = vst [vmem:[%s1323_s27 + $0x180] sm:$0xff] %v246_v48  ;;  %v254_v52 = vld [vmem:[%s1315_s26 + $0x340] sm:$0xff]  ;;  %v256_v53 = vld [vmem:[%s1315_s26 + $0x348] sm:$0xff] }
  0x2c   : > { %249 = vst [vmem:[%s1323_s27 + $0x188] sm:$0xff] %v248_v49  ;;  %251 = vst [vmem:[%s1323_s27 + $0x190] sm:$0xff] %v250_v50  ;;  %v258_v54 = vld [vmem:[%s1315_s26 + $0x350] sm:$0xff]  ;;  %v260_v55 = vld [vmem:[%s1315_s26 + $0x358] sm:$0xff] }
  0x2d   : > { %253 = vst [vmem:[%s1323_s27 + $0x198] sm:$0xff] %v252_v51  ;;  %255 = vst [vmem:[%s1323_s27 + $0x1a0] sm:$0xff] %v254_v52  ;;  %v262_v56 = vld [vmem:[%s1315_s26 + $0x380] sm:$0xff]  ;;  %v264_v57 = vld [vmem:[%s1315_s26 + $0x388] sm:$0xff] }
  0x2e   : > { %257 = vst [vmem:[%s1323_s27 + $0x1a8] sm:$0xff] %v256_v53  ;;  %259 = vst [vmem:[%s1323_s27 + $0x1b0] sm:$0xff] %v258_v54  ;;  %v266_v58 = vld [vmem:[%s1315_s26 + $0x390] sm:$0xff]  ;;  %v268_v59 = vld [vmem:[%s1315_s26 + $0x398] sm:$0xff] }
  0x2f   : > { %261 = vst [vmem:[%s1323_s27 + $0x1b8] sm:$0xff] %v260_v55  ;;  %263 = vst [vmem:[%s1323_s27 + $0x1c0] sm:$0xff] %v262_v56  ;;  %v270_v60 = vld [vmem:[%s1315_s26 + $0x3c0] sm:$0xff]  ;;  %v272_v61 = vld [vmem:[%s1315_s26 + $0x3c8] sm:$0xff] }
  0x30   : > { %265 = vst [vmem:[%s1323_s27 + $0x1c8] sm:$0xff] %v264_v57  ;;  %267 = vst [vmem:[%s1323_s27 + $0x1d0] sm:$0xff] %v266_v58  ;;  %v274_v62 = vld [vmem:[%s1315_s26 + $0x3d0] sm:$0xff]  ;;  %v276_v63 = vld [vmem:[%s1315_s26 + $0x3d8] sm:$0xff] }
  0x31   : > { %269 = vst [vmem:[%s1323_s27 + $0x1d8] sm:$0xff] %v268_v59  ;;  %271 = vst [vmem:[%s1323_s27 + $0x1e0] sm:$0xff] %v270_v60  ;;  %v278_v0 = vld [vmem:[%s1315_s26 + $0x400] sm:$0xff]  ;;  %v280_v1 = vld [vmem:[%s1315_s26 + $0x408] sm:$0xff] }
  0x32   : > { %273 = vst [vmem:[%s1323_s27 + $0x1e8] sm:$0xff] %v272_v61  ;;  %275 = vst [vmem:[%s1323_s27 + $0x1f0] sm:$0xff] %v274_v62  ;;  %v282_v2 = vld [vmem:[%s1315_s26 + $0x410] sm:$0xff]  ;;  %v284_v3 = vld [vmem:[%s1315_s26 + $0x418] sm:$0xff] }
  0x33   : > { %277 = vst [vmem:[%s1323_s27 + $0x1f8] sm:$0xff] %v276_v63  ;;  %279 = vst [vmem:[%s1323_s27 + $0x200] sm:$0xff] %v278_v0  ;;  %v286_v4 = vld [vmem:[%s1315_s26 + $0x440] sm:$0xff]  ;;  %v288_v5 = vld [vmem:[%s1315_s26 + $0x448] sm:$0xff] }
  0x34   : > { %281 = vst [vmem:[%s1323_s27 + $0x208] sm:$0xff] %v280_v1  ;;  %283 = vst [vmem:[%s1323_s27 + $0x210] sm:$0xff] %v282_v2  ;;  %v290_v6 = vld [vmem:[%s1315_s26 + $0x450] sm:$0xff]  ;;  %v292_v7 = vld [vmem:[%s1315_s26 + $0x458] sm:$0xff] }
  0x35   : > { %285 = vst [vmem:[%s1323_s27 + $0x218] sm:$0xff] %v284_v3  ;;  %287 = vst [vmem:[%s1323_s27 + $0x220] sm:$0xff] %v286_v4 }
  0x36   : > { %289 = vst [vmem:[%s1323_s27 + $0x228] sm:$0xff] %v288_v5  ;;  %291 = vst [vmem:[%s1323_s27 + $0x230] sm:$0xff] %v290_v6 }
  0x37   : > { %293 = vst [vmem:[%s1323_s27 + $0x238] sm:$0xff] %v292_v7 }
  0x38 PF: > { %p1112_p7 = scmp.ge.s32.totalorder %s1252_s14, 1  ;;  %p298_p8 = scmp.lt.s32.totalorder %s1252_s14, 3 }
  0x3a   : > { %p299_p9 = pnand %p1112_p7, %p298_p8 }
  0x3b   : > { %s305_s28 = sand.u32 (!%p299_p9), 1, %s1244_s12  }
  0x3c   : > { %302 = sbr.rel (%p299_p9) target bundleno = 355 (0x163), region = 51  ;;  %s1113_s17 = sshll.u32 (!%p299_p9), %s305_s28, 7 }
  0x3d   : > { %s1200_s4 = smul.u32 (!%p299_p9), 576, %s305_s28  ;;  %s1572_s18 = scalar_lea.vmem (!%p299_p9), [#allocation3], %s1113_s17 }
  0x3f   : > { %s1480_s7 = scalar_lea.vmem (!%p299_p9), [#allocation2], %s1200_s4 }
  0x41   : > { %v1469_v8 = vld [vmem:[%s1624_s1 + $0x4] ss:$8 sps:$4 sm:$0xff]   ;;  %vm785_vm0 = vcmask 130048   ;;  %v1254_v10 = vmov 0   ;;  %s1198_s12 = sshll.u32 (%p1305_p5), %s1106_s15, 6 }
  0x42   : > { %v404_v9 = vld [vmem:[%s1625_s2] sm:$0xff]  ;;  %1188 = vmatprep.mubr.msk.bf16.mxu0 %vm785_vm0, %v1469_v8  ;;  %1189 = vmatprep.mubr.msk.bf16.mxu1 %vm785_vm0, %v1469_v8  ;;  %v389_v13 = vld [vmem:[%s1480_s7 + $0x1c8] sm:$0xff]  ;;  %s1002_s20 = scalar_lea.vmem (%p1305_p5), %s1626_s3, %s1198_s12 }
  0x43   : > { %1226 = vset.pattern.permute.xlu0 %v1254_v10  ;;  %v388_v11 = vld [vmem:[%s1480_s7 + $0x1c0] sm:$0xff]  ;;  %v393_v15 = vld [vmem:[%s1480_s7 + $0x1e8] sm:$0xff] }
  0x44   : > { %v392_v12 = vld [vmem:[%s1480_s7 + $0x1e0] sm:$0xff]  ;;  %408 = vperm.xlu0 %1226, %v404_v9   ;;  %v1175_v19 = vcombine.high %v389_v13, %v393_v15  ;;  %v1174_v20 = vcombine.low %v389_v13, %v393_v15  ;;  %v381_v22 = vld [vmem:[%s1480_s7 + $0x188] sm:$0xff] }
  0x45   : > { %v1173_v14 = vcombine.high %v388_v11, %v392_v12  ;;  %v1172_v16 = vcombine.low %v388_v11, %v392_v12  ;;  %v380_v17 = vld [vmem:[%s1480_s7 + $0x180] sm:$0xff]  ;;  %v385_v23 = vld [vmem:[%s1480_s7 + $0x1a8] sm:$0xff] }
  0x46   : > { %v384_v18 = vld [vmem:[%s1480_s7 + $0x1a0] sm:$0xff]  ;;  %v1167_v25 = vcombine.high %v381_v22, %v385_v23  ;;  %v373_v27 = vld [vmem:[%s1480_s7 + $0x148] sm:$0xff]  ;;  %832 = vmatprep.subr.bf16.mxu1 %v1175_v19  ;;  %v1166_v31 = vcombine.low %v381_v22, %v385_v23  ;;  %v390_v19 = vld [vmem:[%s1480_s7 + $0x1d0] sm:$0xff] }
  0x47   : > { %v1165_v21 = vcombine.high %v380_v17, %v384_v18  ;;  %v372_v24 = vld [vmem:[%s1480_s7 + $0x140] sm:$0xff]  ;;  %789 = vmatprep.subr.bf16.mxu0 %v1173_v14  ;;  %v377_v28 = vld [vmem:[%s1480_s7 + $0x168] sm:$0xff]  ;;  %v1164_v29 = vcombine.low %v380_v17, %v384_v18  ;;  %833 = vmatpush1.bf16.msra.mxu1 %v1174_v20  ;;  %v394_v20 = vld [vmem:[%s1480_s7 + $0x1f0] sm:$0xff] }
  0x48   : > { %v376_v26 = vld [vmem:[%s1480_s7 + $0x160] sm:$0xff]  ;;  %790 = vmatpush1.bf16.msra.mxu0 %v1172_v16  ;;  %v405_v30 = vld [vmem:[%s1625_s2 + $0x8] sm:$0xff]  ;;  %834 = vmatprep.subr.bf16.mxu1 %v1167_v25  ;;  %v1159_v33 = vcombine.high %v373_v27, %v377_v28  ;;  %v1158_v39 = vcombine.low %v373_v27, %v377_v28  ;;  %v395_v22 = vld [vmem:[%s1480_s7 + $0x1f8] sm:$0xff]  ;;  %v1177_v25 = vcombine.high %v390_v19, %v394_v20 }
  0x49   : > { %791 = vmatprep.subr.bf16.mxu0 %v1165_v21  ;;  %v1157_v32 = vcombine.high %v372_v24, %v376_v26  ;;  %v364_v34 = vld [vmem:[%s1480_s7 + $0x100] sm:$0xff]  ;;  %v365_v36 = vld [vmem:[%s1480_s7 + $0x108] sm:$0xff]  ;;  %413 = vperm.xlu0 %1226, %v405_v30   ;;  %v1156_v38 = vcombine.low %v372_v24, %v376_v26  ;;  %v391_v21 = vld [vmem:[%s1480_s7 + $0x1d8] sm:$0xff] }
  0x4a   : > { %v368_v35 = vld [vmem:[%s1480_s7 + $0x120] sm:$0xff]  ;;  %v369_v37 = vld [vmem:[%s1480_s7 + $0x128] sm:$0xff]  ;;  %v1179_v26 = vcombine.high %v391_v21, %v395_v22  ;;  %v382_v27 = vld [vmem:[%s1480_s7 + $0x190] sm:$0xff] }
  0x4b   : > { %835 = vmatpush1.bf16.msra.mxu1 %v1166_v31  ;;  %v1149_v40 = vcombine.high %v364_v34, %v368_v35  ;;  %v1151_v41 = vcombine.high %v365_v36, %v369_v37  ;;  %v356_v42 = vld [vmem:[%s1480_s7 + $0xc0] sm:$0xff]  ;;  %v357_v44 = vld [vmem:[%s1480_s7 + $0xc8] sm:$0xff]  ;;  %v1148_v46 = vcombine.low %v364_v34, %v368_v35  ;;  %v1150_v47 = vcombine.low %v365_v36, %v369_v37  ;;  %v386_v28 = vld [vmem:[%s1480_s7 + $0x1b0] sm:$0xff] }
  0x4c   : > { %792 = vmatpush1.bf16.msra.mxu0 %v1164_v29  ;;  %836 = vmatprep.subr.bf16.mxu1 %v1159_v33  ;;  %v360_v43 = vld [vmem:[%s1480_s7 + $0xe0] sm:$0xff]  ;;  %v361_v45 = vld [vmem:[%s1480_s7 + $0xe8] sm:$0xff]  ;;  %v383_v30 = vld [vmem:[%s1480_s7 + $0x198] sm:$0xff]  ;;  %v1178_v33 = vcombine.low %v391_v21, %v395_v22  ;;  %v1169_v34 = vcombine.high %v382_v27, %v386_v28 }
  0x4d   : > { %793 = vmatprep.subr.bf16.mxu0 %v1157_v32  ;;  %v1141_v48 = vcombine.high %v356_v42, %v360_v43  ;;  %v1143_v49 = vcombine.high %v357_v44, %v361_v45  ;;  %v348_v50 = vld [vmem:[%s1480_s7 + $0x80] sm:$0xff]  ;;  %v349_v52 = vld [vmem:[%s1480_s7 + $0x88] sm:$0xff]  ;;  %v1140_v54 = vcombine.low %v356_v42, %v360_v43  ;;  %v1142_v55 = vcombine.low %v357_v44, %v361_v45  ;;  %v387_v31 = vld [vmem:[%s1480_s7 + $0x1b8] sm:$0xff] }
  0x4e   : > { %v352_v51 = vld [vmem:[%s1480_s7 + $0xa0] sm:$0xff]  ;;  %v353_v53 = vld [vmem:[%s1480_s7 + $0xa8] sm:$0xff]  ;;  %v1176_v32 = vcombine.low %v390_v19, %v394_v20  ;;  %v1171_v35 = vcombine.high %v383_v30, %v387_v31  ;;  %v374_v36 = vld [vmem:[%s1480_s7 + $0x150] sm:$0xff] }
  0x4f   : > { %837 = vmatpush1.bf16.msra.mxu1 %v1158_v39  ;;  %v1133_v56 = vcombine.high %v348_v50, %v352_v51  ;;  %v1135_v57 = vcombine.high %v349_v52, %v353_v53  ;;  %v340_v58 = vld [vmem:[%s1480_s7 + $0x40] sm:$0xff]  ;;  %v341_v60 = vld [vmem:[%s1480_s7 + $0x48] sm:$0xff]  ;;  %v1132_v62 = vcombine.low %v348_v50, %v352_v51  ;;  %v1134_v63 = vcombine.low %v349_v52, %v353_v53  ;;  %v378_v37 = vld [vmem:[%s1480_s7 + $0x170] sm:$0xff] }
  0x50   : > { %794 = vmatpush1.bf16.msra.mxu0 %v1156_v38  ;;  %838 = vmatprep.subr.bf16.mxu1 %v1151_v41  ;;  %v344_v59 = vld [vmem:[%s1480_s7 + $0x60] sm:$0xff]  ;;  %v345_v61 = vld [vmem:[%s1480_s7 + $0x68] sm:$0xff]  ;;  %v375_v38 = vld [vmem:[%s1480_s7 + $0x158] sm:$0xff]  ;;  %v1170_v41 = vcombine.low %v383_v30, %v387_v31  ;;  %v1161_v42 = vcombine.high %v374_v36, %v378_v37 }
  0x51   : > { %795 = vmatprep.subr.bf16.mxu0 %v1149_v40  ;;  %v1125_v0 = vcombine.high %v340_v58, %v344_v59  ;;  %v1127_v1 = vcombine.high %v341_v60, %v345_v61  ;;  %v332_v2 = vld [vmem:[%s1480_s7] sm:$0xff]  ;;  %v333_v4 = vld [vmem:[%s1480_s7 + $0x8] sm:$0xff]  ;;  %v1124_v6 = vcombine.low %v340_v58, %v344_v59  ;;  %v1126_v7 = vcombine.low %v341_v60, %v345_v61  ;;  %v379_v39 = vld [vmem:[%s1480_s7 + $0x178] sm:$0xff] }
  0x52   : > { %v336_v3 = vld [vmem:[%s1480_s7 + $0x20] sm:$0xff]  ;;  %v337_v5 = vld [vmem:[%s1480_s7 + $0x28] sm:$0xff]  ;;  %v1168_v40 = vcombine.low %v382_v27, %v386_v28  ;;  %v1163_v43 = vcombine.high %v375_v38, %v379_v39  ;;  %v366_v44 = vld [vmem:[%s1480_s7 + $0x110] sm:$0xff] }
  0x53   : > { %839 = vmatpush1.bf16.msra.mxu1 %v1150_v47  ;;  %v1117_v9 = vcombine.high %v332_v2, %v336_v3  ;;  %v1119_v10 = vcombine.high %v333_v4, %v337_v5  ;;  %v396_v11 = vld [vmem:[%s1480_s7 + $0x200] sm:$0xff]  ;;  %v397_v13 = vld [vmem:[%s1480_s7 + $0x208] sm:$0xff]  ;;  %v1116_v15 = vcombine.low %v332_v2, %v336_v3  ;;  %v1118_v16 = vcombine.low %v333_v4, %v337_v5  ;;  %v370_v45 = vld [vmem:[%s1480_s7 + $0x130] sm:$0xff] }
  0x54   : > { %796 = vmatpush1.bf16.msra.mxu0 %v1148_v46  ;;  %840 = vmatprep.subr.bf16.mxu1 %v1143_v49  ;;  %v400_v12 = vld [vmem:[%s1480_s7 + $0x220] sm:$0xff]  ;;  %v401_v14 = vld [vmem:[%s1480_s7 + $0x228] sm:$0xff]  ;;  %v367_v46 = vld [vmem:[%s1480_s7 + $0x118] sm:$0xff]  ;;  %v1162_v49 = vcombine.low %v375_v38, %v379_v39  ;;  %v1153_v50 = vcombine.high %v366_v44, %v370_v45 }
  0x55   : > { %797 = vmatprep.subr.bf16.mxu0 %v1141_v48  ;;  %v1181_v17 = vcombine.high %v396_v11, %v400_v12  ;;  %v1183_v18 = vcombine.high %v397_v13, %v401_v14  ;;  %v1180_v23 = vcombine.low %v396_v11, %v400_v12  ;;  %v1182_v24 = vcombine.low %v397_v13, %v401_v14  ;;  %v1530_v29 = vld [vmem:[%s1624_s1] ss:$8 sps:$4 sm:$0xff]   ;;  %v371_v47 = vld [vmem:[%s1480_s7 + $0x138] sm:$0xff]  ;;  %v358_v52 = vld [vmem:[%s1480_s7 + $0xd0] sm:$0xff] }
  0x56   : > { %v1160_v48 = vcombine.low %v374_v36, %v378_v37  ;;  %v1155_v51 = vcombine.high %v367_v46, %v371_v47  ;;  %v362_v53 = vld [vmem:[%s1480_s7 + $0xf0] sm:$0xff]  ;;  %v351_v61 = vld [vmem:[%s1480_s7 + $0x98] sm:$0xff] }
  0x57   : > { %841 = vmatpush1.bf16.msra.mxu1 %v1142_v55  ;;  %v363_v55 = vld [vmem:[%s1480_s7 + $0xf8] sm:$0xff]  ;;  %v350_v59 = vld [vmem:[%s1480_s7 + $0x90] sm:$0xff] }
  0x58   : > { %798 = vmatpush1.bf16.msra.mxu0 %v1140_v54  ;;  %842 = vmatprep.subr.bf16.mxu1 %v1135_v57  ;;  %v359_v54 = vld [vmem:[%s1480_s7 + $0xd8] sm:$0xff]  ;;  %v1145_v57 = vcombine.high %v358_v52, %v362_v53  ;;  %v354_v60 = vld [vmem:[%s1480_s7 + $0xb0] sm:$0xff] }
  0x59   : > { %799 = vmatprep.subr.bf16.mxu0 %v1133_v56  ;;  %v1152_v56 = vcombine.low %v366_v44, %v370_v45  ;;  %v1147_v58 = vcombine.high %v359_v54, %v363_v55  ;;  %v342_v3 = vld [vmem:[%s1480_s7 + $0x50] sm:$0xff]  ;;  %v343_v5 = vld [vmem:[%s1480_s7 + $0x58] sm:$0xff] }
  0x5a   : > { %v346_v4 = vld [vmem:[%s1480_s7 + $0x70] sm:$0xff]  ;;  %v335_v14 = vld [vmem:[%s1480_s7 + $0x18] sm:$0xff] }
  0x5b   : > { %843 = vmatpush1.bf16.msra.mxu1 %v1134_v63  ;;  %v1144_v63 = vcombine.low %v358_v52, %v362_v53  ;;  %v334_v12 = vld [vmem:[%s1480_s7 + $0x10] sm:$0xff]  ;;  %v399_v22 = vld [vmem:[%s1480_s7 + $0x218] sm:$0xff] }
  0x5c   : > { %800 = vmatpush1.bf16.msra.mxu0 %v1132_v62  ;;  %844 = vmatprep.subr.bf16.mxu1 %v1127_v1  ;;  %v355_v62 = vld [vmem:[%s1480_s7 + $0xb8] sm:$0xff]  ;;  %v1137_v1 = vcombine.high %v350_v59, %v354_v60  ;;  %v338_v13 = vld [vmem:[%s1480_s7 + $0x30] sm:$0xff] }
  0x5d   : > { %801 = vmatprep.subr.bf16.mxu0 %v1125_v0  ;;  %v1146_v0 = vcombine.low %v359_v54, %v363_v55  ;;  %v1139_v2 = vcombine.high %v351_v61, %v355_v62  ;;  %v398_v20 = vld [vmem:[%s1480_s7 + $0x210] sm:$0xff] }
  0x5e   : > { %v402_v21 = vld [vmem:[%s1480_s7 + $0x230] sm:$0xff] }
  0x5f   : > { %845 = vmatpush1.bf16.msra.mxu1 %v1126_v7  ;;  %v1136_v7 = vcombine.low %v350_v59, %v354_v60  ;;  %v1184_v28 = vcombine.low %v398_v20, %v402_v21 }
  0x60   : > { %802 = vmatpush1.bf16.msra.mxu0 %v1124_v6  ;;  %846 = vmatprep.subr.bf16.mxu1 %v1119_v10  ;;  %v347_v6 = vld [vmem:[%s1480_s7 + $0x78] sm:$0xff]  ;;  %v1129_v10 = vcombine.high %v342_v3, %v346_v4 }
  0x61   : > { %803 = vmatprep.subr.bf16.mxu0 %v1117_v9  ;;  %v1138_v9 = vcombine.low %v351_v61, %v355_v62  ;;  %v1131_v11 = vcombine.high %v343_v5, %v347_v6 }
  0x63   : > { %847 = vmatpush1.bf16.msra.mxu1 %v1118_v16  ;;  %v1128_v16 = vcombine.low %v342_v3, %v346_v4 }
  0x64   : > { %804 = vmatpush1.bf16.msra.mxu0 %v1116_v15  ;;  %862 = vmatprep.subr.bf16.mxu1 %v1183_v18  ;;  %v339_v15 = vld [vmem:[%s1480_s7 + $0x38] sm:$0xff]  ;;  %v1121_v18 = vcombine.high %v334_v12, %v338_v13 }
  0x65   : > { %819 = vmatprep.subr.bf16.mxu0 %v1181_v17  ;;  %v1130_v17 = vcombine.low %v343_v5, %v347_v6  ;;  %v1123_v19 = vcombine.high %v335_v14, %v339_v15 }
  0x67   : > { %863 = vmatpush2.bf16.msra.mxu1 %v1182_v24  ;;  %v1120_v24 = vcombine.low %v334_v12, %v338_v13 }
  0x68   : > { %820 = vmatpush2.bf16.msra.mxu0 %v1180_v23  ;;  %918 = vmatprep.subr.bf16.mxu1 %v1179_v26  ;;  %v403_v23 = vld [vmem:[%s1480_s7 + $0x238] sm:$0xff]  ;;  %v1185_v26 = vcombine.high %v398_v20, %v402_v21 }
  0x69   : > { %875 = vmatprep.subr.bf16.mxu0 %v1177_v25  ;;  %v1122_v25 = vcombine.low %v335_v14, %v339_v15  ;;  %v1187_v27 = vcombine.high %v399_v22, %v403_v23  ;;  %v1186_v30 = vcombine.low %v399_v22, %v403_v23 }
  0x6a   : > { %865 = vmatmul.mubr.bf16.vlgmr.msra.gmra.mxu1 %v1530_v29 }
  0x6b   : > { %822 = vmatmul.mubr.bf16.vlgmr.msra.gmra.mxu0 %v1530_v29  ;;  %919 = vmatpush1.bf16.msra.mxu1 %v1178_v33 }
  0x6c   : > { %876 = vmatpush1.bf16.msra.mxu0 %v1176_v32  ;;  %920 = vmatprep.subr.bf16.mxu1 %v1171_v35 }
  0x6d   : > { %877 = vmatprep.subr.bf16.mxu0 %v1169_v34  ;;  %1190 = vmatprep.mubr.msk.bf16.mxu0 %vm785_vm0, %v1469_v8 }
  0x6e   : > { %1191 = vmatprep.mubr.msk.bf16.mxu1 %vm785_vm0, %v1469_v8  ;;  %v1154_v8 = vcombine.low %v367_v46, %v371_v47 }
  0x6f   : > { %921 = vmatpush1.bf16.msra.mxu1 %v1170_v41 }
  0x70   : > { %878 = vmatpush1.bf16.msra.mxu0 %v1168_v40  ;;  %922 = vmatprep.subr.bf16.mxu1 %v1163_v43 }
  0x71   : > { %879 = vmatprep.subr.bf16.mxu0 %v1161_v42 }
  0x73   : > { %923 = vmatpush1.bf16.msra.mxu1 %v1162_v49 }
  0x74   : > { %880 = vmatpush1.bf16.msra.mxu0 %v1160_v48  ;;  %924 = vmatprep.subr.bf16.mxu1 %v1155_v51 }
  0x75   : > { %881 = vmatprep.subr.bf16.mxu0 %v1153_v50 }
  0x77   : > { %925 = vmatpush1.bf16.msra.mxu1 %v1154_v8 }
  0x78   : > { %882 = vmatpush1.bf16.msra.mxu0 %v1152_v56  ;;  %926 = vmatprep.subr.bf16.mxu1 %v1147_v58 }
  0x79   : > { %883 = vmatprep.subr.bf16.mxu0 %v1145_v57 }
  0x7b   : > { %927 = vmatpush1.bf16.msra.mxu1 %v1146_v0 }
  0x7c   : > { %884 = vmatpush1.bf16.msra.mxu0 %v1144_v63  ;;  %928 = vmatprep.subr.bf16.mxu1 %v1139_v2 }
  0x7d   : > { %885 = vmatprep.subr.bf16.mxu0 %v1137_v1 }
  0x7f   : > { %929 = vmatpush1.bf16.msra.mxu1 %v1138_v9 }
  0x80   : > { %886 = vmatpush1.bf16.msra.mxu0 %v1136_v7  ;;  %930 = vmatprep.subr.bf16.mxu1 %v1131_v11 }
  0x81   : > { %887 = vmatprep.subr.bf16.mxu0 %v1129_v10 }
  0x83   : > { %931 = vmatpush1.bf16.msra.mxu1 %v1130_v17 }
  0x84   : > { %888 = vmatpush1.bf16.msra.mxu0 %v1128_v16  ;;  %932 = vmatprep.subr.bf16.mxu1 %v1123_v19 }
  0x85   : > { %889 = vmatprep.subr.bf16.mxu0 %v1121_v18 }
  0x87   : > { %933 = vmatpush1.bf16.msra.mxu1 %v1122_v25 }
  0x88   : > { %890 = vmatpush1.bf16.msra.mxu0 %v1120_v24  ;;  %948 = vmatprep.subr.bf16.mxu1 %v1187_v27 }
  0x89   : > { %905 = vmatprep.subr.bf16.mxu0 %v1185_v26 }
  0x8b   : > { %949 = vmatpush2.bf16.msra.mxu1 %v1186_v30 }
  0x8c   : > { %906 = vmatpush2.bf16.msra.mxu0 %v1184_v28 }
  0x8e   : > { %951 = vmatmul.mubr.bf16.vlgmr.msra.gmra.mxu1 %v1530_v29 }
  0x8f   : > { %908 = vmatmul.mubr.bf16.vlgmr.msra.gmra.mxu0 %v1530_v29 }
  0xbf   : > { %v409_v31 = vpop.permute.xlu0 %408 }
  0xc4   : > { %v414_v37 = vpop.permute.xlu0 %413 }
 0x12a   : > { %v866_v34 = vpop.f32.mrf.mxu1 }
 0x12b   : > { %v823_v32 = vpop.f32.mrf.mxu0  ;;  %v867_v35 = vadd.f32 %v866_v34, %v409_v31 }
 0x12c   : > { %v824_v33 = vadd.f32 %v823_v32, %v409_v31  ;;  %v868_v40 = vpop.f32.mrf.mxu1 }
 0x12d   : > { %v825_v36 = vpop.f32.mrf.mxu0  ;;  %v963_v41 = vmax.f32 %v867_v35, 0.0  ;;  %v869_v42 = vadd.f32 %v868_v40, %v409_v31 }
 0x12e   : > { %v961_v38 = vmax.f32 %v824_v33, 0.0  ;;  %v826_v39 = vadd.f32 %v825_v36, %v409_v31  ;;  %v870_v45 = vpop.f32.mrf.mxu1 }
 0x12f   : > { %v827_v43 = vpop.f32.mrf.mxu0  ;;  %979 = vst [vmem:[%s1572_s18 + $0x10] sm:$0xff] %v963_v41  ;;  %v964_v46 = vmax.f32 %v869_v42, 0.0  ;;  %v871_v47 = vadd.f32 %v870_v45, %v414_v37 }
 0x130   : > { %977 = vst [vmem:[%s1572_s18] sm:$0xff] %v961_v38  ;;  %v962_v29 = vmax.f32 %v826_v39, 0.0  ;;  %v828_v44 = vadd.f32 %v827_v43, %v414_v37  ;;  %v872_v51 = vpop.f32.mrf.mxu1 }
 0x131   : > { %v829_v48 = vpop.f32.mrf.mxu0  ;;  %980 = vst [vmem:[%s1572_s18 + $0x18] sm:$0xff] %v964_v46  ;;  %v971_v52 = vmax.f32 %v871_v47, 0.0  ;;  %v873_v53 = vadd.f32 %v872_v51, %v414_v37 }
 0x132   : > { %978 = vst [vmem:[%s1572_s18 + $0x8] sm:$0xff] %v962_v29  ;;  %v969_v49 = vmax.f32 %v828_v44, 0.0  ;;  %v830_v50 = vadd.f32 %v829_v48, %v414_v37 }
 0x133   : > { %987 = vst [vmem:[%s1572_s18 + $0x50] sm:$0xff] %v971_v52  ;;  %v972_v55 = vmax.f32 %v873_v53, 0.0 }
 0x134   : > { %985 = vst [vmem:[%s1572_s18 + $0x40] sm:$0xff] %v969_v49  ;;  %v970_v54 = vmax.f32 %v830_v50, 0.0 }
 0x135   : > { %988 = vst [vmem:[%s1572_s18 + $0x58] sm:$0xff] %v972_v55 }
 0x136   : > { %986 = vst [vmem:[%s1572_s18 + $0x48] sm:$0xff] %v970_v54  ;;  %v1019_v18 = vld [vmem:[%s1572_s18 + $0x10] sm:$0xff] (%p1305_p5) }
 0x137   : > { %v1015_v16 = vld [vmem:[%s1572_s18] sm:$0xff] (%p1305_p5)  ;;  %1020 = vst [vmem:[%s1002_s20 + $0x10] sm:$0xff] (%p1305_p5), %v1019_v18 }
 0x138   : > { %v1021_v19 = vld [vmem:[%s1572_s18 + $0x18] sm:$0xff] (%p1305_p5)  ;;  %1016 = vst [vmem:[%s1002_s20] sm:$0xff] (%p1305_p5), %v1015_v16 }
 0x139   : > { %v1017_v17 = vld [vmem:[%s1572_s18 + $0x8] sm:$0xff] (%p1305_p5)  ;;  %1022 = vst [vmem:[%s1002_s20 + $0x18] sm:$0xff] (%p1305_p5), %v1021_v19 }
 0x13a   : > { %1018 = vst [vmem:[%s1002_s20 + $0x8] sm:$0xff] (%p1305_p5), %v1017_v17  ;;  %v1035_v26 = vld [vmem:[%s1572_s18 + $0x50] sm:$0xff] (%p1305_p5) }
 0x13b   : > { %v1031_v24 = vld [vmem:[%s1572_s18 + $0x40] sm:$0xff] (%p1305_p5)  ;;  %1036 = vst [vmem:[%s1002_s20 + $0x90] sm:$0xff] (%p1305_p5), %v1035_v26 }
 0x13c   : > { %1032 = vst [vmem:[%s1002_s20 + $0x80] sm:$0xff] (%p1305_p5), %v1031_v24  ;;  %v1037_v27 = vld [vmem:[%s1572_s18 + $0x58] sm:$0xff] (%p1305_p5) }
 0x13d   : > { %v1033_v25 = vld [vmem:[%s1572_s18 + $0x48] sm:$0xff] (%p1305_p5)  ;;  %1038 = vst [vmem:[%s1002_s20 + $0x98] sm:$0xff] (%p1305_p5), %v1037_v27 }
 0x13e   : > { %1034 = vst [vmem:[%s1002_s20 + $0x88] sm:$0xff] (%p1305_p5), %v1033_v25 }
 0x14e   : > { %v952_v57 = vpop.f32.mrf.mxu1 }
 0x14f   : > { %v909_v56 = vpop.f32.mrf.mxu0  ;;  %v953_v58 = vadd.f32 %v952_v57, %v409_v31 }
 0x150   : > { %v910_v8 = vadd.f32 %v909_v56, %v409_v31  ;;  %v954_v62 = vpop.f32.mrf.mxu1 }
 0x151   : > { %v911_v59 = vpop.f32.mrf.mxu0  ;;  %v967_v63 = vmax.f32 %v953_v58, 0.0  ;;  %v955_v0 = vadd.f32 %v954_v62, %v409_v31 }
 0x152   : > { %v965_v60 = vmax.f32 %v910_v8, 0.0  ;;  %v912_v61 = vadd.f32 %v911_v59, %v409_v31  ;;  %v956_v4 = vpop.f32.mrf.mxu1 }
 0x153   : > { %v913_v1 = vpop.f32.mrf.mxu0  ;;  %983 = vst [vmem:[%s1572_s18 + $0x30] sm:$0xff] %v967_v63  ;;  %v968_v5 = vmax.f32 %v955_v0, 0.0  ;;  %v957_v6 = vadd.f32 %v956_v4, %v414_v37 }
 0x154   : > { %981 = vst [vmem:[%s1572_s18 + $0x20] sm:$0xff] %v965_v60  ;;  %v966_v2 = vmax.f32 %v912_v61, 0.0  ;;  %v914_v3 = vadd.f32 %v913_v1, %v414_v37  ;;  %v958_v11 = vpop.f32.mrf.mxu1 }
 0x155   : > { %v915_v7 = vpop.f32.mrf.mxu0  ;;  %984 = vst [vmem:[%s1572_s18 + $0x38] sm:$0xff] %v968_v5  ;;  %v975_v12 = vmax.f32 %v957_v6, 0.0  ;;  %v959_v13 = vadd.f32 %v958_v11, %v414_v37 }
 0x156   : > { %982 = vst [vmem:[%s1572_s18 + $0x28] sm:$0xff] %v966_v2  ;;  %v973_v9 = vmax.f32 %v914_v3, 0.0  ;;  %v916_v10 = vadd.f32 %v915_v7, %v414_v37  ;;  %999 = sbr.rel (!%p1305_p5) target bundleno = 355 (0x163), region = 59 }
 0x157   : > { %991 = vst [vmem:[%s1572_s18 + $0x70] sm:$0xff] %v975_v12  ;;  %v976_v15 = vmax.f32 %v959_v13, 0.0 }
 0x158   : > { %989 = vst [vmem:[%s1572_s18 + $0x60] sm:$0xff] %v973_v9  ;;  %v974_v14 = vmax.f32 %v916_v10, 0.0 }
 0x159   : > { %992 = vst [vmem:[%s1572_s18 + $0x78] sm:$0xff] %v976_v15 }
 0x15a   : > { %990 = vst [vmem:[%s1572_s18 + $0x68] sm:$0xff] %v974_v14  ;;  %v1027_v22 = vld [vmem:[%s1572_s18 + $0x30] sm:$0xff] (%p1305_p5) }
 0x15b   : > { %v1023_v20 = vld [vmem:[%s1572_s18 + $0x20] sm:$0xff]  ;;  %1028 = vst [vmem:[%s1002_s20 + $0x30] sm:$0xff] %v1027_v22 }
 0x15c   : > { %1024 = vst [vmem:[%s1002_s20 + $0x20] sm:$0xff] %v1023_v20  ;;  %v1029_v23 = vld [vmem:[%s1572_s18 + $0x38] sm:$0xff] }
 0x15d   : > { %v1025_v21 = vld [vmem:[%s1572_s18 + $0x28] sm:$0xff]  ;;  %1030 = vst [vmem:[%s1002_s20 + $0x38] sm:$0xff] %v1029_v23 }
 0x15e   : > { %1026 = vst [vmem:[%s1002_s20 + $0x28] sm:$0xff] %v1025_v21  ;;  %v1043_v31 = vld [vmem:[%s1572_s18 + $0x70] sm:$0xff] }
 0x15f   : > { %v1039_v28 = vld [vmem:[%s1572_s18 + $0x60] sm:$0xff]  ;;  %1044 = vst [vmem:[%s1002_s20 + $0xb0] sm:$0xff] %v1043_v31 }
 0x160   : > { %1040 = vst [vmem:[%s1002_s20 + $0xa0] sm:$0xff] %v1039_v28  ;;  %v1045_v32 = vld [vmem:[%s1572_s18 + $0x78] sm:$0xff] }
 0x161   : > { %v1041_v30 = vld [vmem:[%s1572_s18 + $0x68] sm:$0xff]  ;;  %1046 = vst [vmem:[%s1002_s20 + $0xb8] sm:$0xff] %v1045_v32 }
 0x162   : > { %1042 = vst [vmem:[%s1002_s20 + $0xa8] sm:$0xff] %v1041_v30 }
 0x163 PF: > { %p10_p10 = scmp.ge.s32.totalorder %s1292_s16, 4   ;;  %s1628_s12 = smov %s1248_s13 }
 0x164   : > { %s1629_s13 = smov %s1303_s19  ;;  %s1630_s14 = smov %s1292_s16 }
 0x165   :  { %12 = sbr.rel (!%p10_p10) target bundleno = 2 (0x2), region = 113 }

// kernel: net_forward.11
= control target key start
LH: loop header
LB: loop body
LE: loop exit
PB: predicated region body
PF: predicated region fallthrough
CT: control target
= control target key end

     0   :  { %v533_v1 = vmov 0   ;;  %vm277_vm0 = vcmask 130048   ;;  %s738_s0 = inlined_call_operand.vmem [shape: bf16[144,512], index: 0, kind: input, shape index: {}]   ;;  %s739_s1 = inlined_call_operand.vmem [shape: bf16[32,144], index: 1, kind: input, shape index: {}]   ;;  %s740_s2 = inlined_call_operand.vmem [shape: f32[32,1], index: 2, kind: input, shape index: {}]   ;;  %s741_s3 = inlined_call_operand.vmem [shape: f32[32,512], index: 3, kind: output, shape index: {}]  }
   0x1   :  { %v473_v0 = vld [vmem:[%s738_s0 + $0xe4] ss:$16 sps:$4 sm:$0xff]   ;;  %471 = vset.pattern.permute.xlu0 %v533_v1  ;;  %472 = vset.pattern.permute.xlu1 %v533_v1  ;;  %v475_v2 = vld [vmem:[%s738_s0 + $0xec] ss:$16 sps:$4 sm:$0xff]   ;;  %v477_v3 = vld [vmem:[%s738_s0 + $0xe0] ss:$16 sps:$4 sm:$0xff]  }
   0x2   :  { %284 = vmatprep.subr.bf16.mxu0 %v473_v0  ;;  %v478_v4 = vld [vmem:[%s738_s0 + $0xe8] ss:$16 sps:$4 sm:$0xff]   ;;  %337 = vmatprep.subr.bf16.mxu1 %v475_v2  ;;  %v479_v5 = vld [vmem:[%s738_s0 + $0xc4] ss:$16 sps:$4 sm:$0xff]   ;;  %v481_v6 = vld [vmem:[%s738_s0 + $0xcc] ss:$16 sps:$4 sm:$0xff]  }
   0x3   :  { %285 = vmatpush1.bf16.msra.mxu0 %v477_v3  ;;  %338 = vmatpush1.bf16.msra.mxu1 %v478_v4  ;;  %v483_v7 = vld [vmem:[%s738_s0 + $0xc0] ss:$16 sps:$4 sm:$0xff]   ;;  %v484_v8 = vld [vmem:[%s738_s0 + $0xc8] ss:$16 sps:$4 sm:$0xff]   ;;  %v485_v9 = vld [vmem:[%s738_s0 + $0xa4] ss:$16 sps:$4 sm:$0xff]  }
   0x4   :  { %286 = vmatprep.subr.bf16.mxu0 %v479_v5  ;;  %339 = vmatprep.subr.bf16.mxu1 %v481_v6  ;;  %v487_v10 = vld [vmem:[%s738_s0 + $0xac] ss:$16 sps:$4 sm:$0xff]   ;;  %v489_v11 = vld [vmem:[%s738_s0 + $0xa0] ss:$16 sps:$4 sm:$0xff]   ;;  %v490_v12 = vld [vmem:[%s738_s0 + $0xa8] ss:$16 sps:$4 sm:$0xff]  }
   0x5   :  { %v491_v13 = vld [vmem:[%s738_s0 + $0x84] ss:$16 sps:$4 sm:$0xff]   ;;  %v493_v14 = vld [vmem:[%s738_s0 + $0x8c] ss:$16 sps:$4 sm:$0xff]   ;;  %v495_v15 = vld [vmem:[%s738_s0 + $0x80] ss:$16 sps:$4 sm:$0xff]  }
   0x6   :  { %v496_v16 = vld [vmem:[%s738_s0 + $0x88] ss:$16 sps:$4 sm:$0xff]   ;;  %v497_v17 = vld [vmem:[%s738_s0 + $0x64] ss:$16 sps:$4 sm:$0xff]   ;;  %v499_v18 = vld [vmem:[%s738_s0 + $0x6c] ss:$16 sps:$4 sm:$0xff]  }
   0x7   :  { %287 = vmatpush1.bf16.msra.mxu0 %v483_v7  ;;  %340 = vmatpush1.bf16.msra.mxu1 %v484_v8  ;;  %v501_v19 = vld [vmem:[%s738_s0 + $0x60] ss:$16 sps:$4 sm:$0xff]   ;;  %v502_v20 = vld [vmem:[%s738_s0 + $0x68] ss:$16 sps:$4 sm:$0xff]   ;;  %v503_v21 = vld [vmem:[%s738_s0 + $0x44] ss:$16 sps:$4 sm:$0xff]  }
   0x8   :  { %288 = vmatprep.subr.bf16.mxu0 %v485_v9  ;;  %341 = vmatprep.subr.bf16.mxu1 %v487_v10  ;;  %v505_v22 = vld [vmem:[%s738_s0 + $0x4c] ss:$16 sps:$4 sm:$0xff]   ;;  %v507_v23 = vld [vmem:[%s738_s0 + $0x40] ss:$16 sps:$4 sm:$0xff]   ;;  %v508_v24 = vld [vmem:[%s738_s0 + $0x48] ss:$16 sps:$4 sm:$0xff]  }
   0x9   :  { %v509_v25 = vld [vmem:[%s738_s0 + $0x24] ss:$16 sps:$4 sm:$0xff]   ;;  %v511_v26 = vld [vmem:[%s738_s0 + $0x2c] ss:$16 sps:$4 sm:$0xff]   ;;  %v513_v27 = vld [vmem:[%s738_s0 + $0x20] ss:$16 sps:$4 sm:$0xff]  }
   0xa   :  { %v514_v28 = vld [vmem:[%s738_s0 + $0x28] ss:$16 sps:$4 sm:$0xff]   ;;  %v515_v29 = vld [vmem:[%s738_s0 + $0x4] ss:$16 sps:$4 sm:$0xff]   ;;  %v517_v30 = vld [vmem:[%s738_s0 + $0xc] ss:$16 sps:$4 sm:$0xff]  }
   0xb   :  { %289 = vmatpush1.bf16.msra.mxu0 %v489_v11  ;;  %342 = vmatpush1.bf16.msra.mxu1 %v490_v12  ;;  %v529_v31 = vld [vmem:[%s739_s1 + $0x4] ss:$8 sps:$4 sm:$0xff]   ;;  %v57_v33 = vld [vmem:[%s740_s2 + $0x10] sm:$0xff]  ;;  %v520_v35 = vld [vmem:[%s738_s0 + $0x8] ss:$16 sps:$4 sm:$0xff]  }
   0xc   :  { %290 = vmatprep.subr.bf16.mxu0 %v491_v13  ;;  %343 = vmatprep.subr.bf16.mxu1 %v493_v14  ;;  %v55_v32 = vld [vmem:[%s740_s2] sm:$0xff]  ;;  %v523_v37 = vld [vmem:[%s738_s0 + $0x10c] ss:$16 sps:$4 sm:$0xff]   ;;  %v526_v41 = vld [vmem:[%s738_s0 + $0x108] ss:$16 sps:$4 sm:$0xff]  }
   0xd   :  { %466 = vmatprep.mubr.msk.bf16.mxu0 %vm277_vm0, %v529_v31  ;;  %468 = vmatprep.mubr.msk.bf16.mxu1 %vm277_vm0, %v529_v31  ;;  %v519_v34 = vld [vmem:[%s738_s0] ss:$16 sps:$4 sm:$0xff]   ;;  %v521_v36 = vld [vmem:[%s738_s0 + $0x104] ss:$16 sps:$4 sm:$0xff]   ;;  %v56_v38 = vld [vmem:[%s740_s2 + $0x8] sm:$0xff] }
   0xe   :  { %61 = vperm.xlu0 %471, %v55_v32   ;;  %71 = vperm.xlu1 %472, %v57_v33   ;;  %v58_v39 = vld [vmem:[%s740_s2 + $0x18] sm:$0xff]  ;;  %v525_v40 = vld [vmem:[%s738_s0 + $0x100] ss:$16 sps:$4 sm:$0xff]  }
   0xf   :  { %291 = vmatpush1.bf16.msra.mxu0 %v495_v15  ;;  %344 = vmatpush1.bf16.msra.mxu1 %v496_v16  ;;  %v527_v42 = vld [vmem:[%s739_s1] ss:$8 sps:$4 sm:$0xff]   ;;  %v530_v43 = vld [vmem:[%s739_s1 + $0x14] ss:$8 sps:$4 sm:$0xff]   ;;  %v532_v44 = vld [vmem:[%s739_s1 + $0x10] ss:$8 sps:$4 sm:$0xff]  }
  0x10   :  { %292 = vmatprep.subr.bf16.mxu0 %v497_v17  ;;  %345 = vmatprep.subr.bf16.mxu1 %v499_v18 }
  0x12   :  { %66 = vperm.xlu0 %471, %v56_v38   ;;  %76 = vperm.xlu1 %472, %v58_v39  }
  0x13   :  { %293 = vmatpush1.bf16.msra.mxu0 %v501_v19  ;;  %346 = vmatpush1.bf16.msra.mxu1 %v502_v20 }
  0x14   :  { %294 = vmatprep.subr.bf16.mxu0 %v503_v21  ;;  %347 = vmatprep.subr.bf16.mxu1 %v505_v22 }
  0x17   :  { %295 = vmatpush1.bf16.msra.mxu0 %v507_v23  ;;  %348 = vmatpush1.bf16.msra.mxu1 %v508_v24 }
  0x18   :  { %296 = vmatprep.subr.bf16.mxu0 %v509_v25  ;;  %349 = vmatprep.subr.bf16.mxu1 %v511_v26 }
  0x1b   :  { %297 = vmatpush1.bf16.msra.mxu0 %v513_v27  ;;  %350 = vmatpush1.bf16.msra.mxu1 %v514_v28 }
  0x1c   :  { %298 = vmatprep.subr.bf16.mxu0 %v515_v29  ;;  %351 = vmatprep.subr.bf16.mxu1 %v517_v30 }
  0x1f   :  { %299 = vmatpush1.bf16.msra.mxu0 %v519_v34  ;;  %352 = vmatpush1.bf16.msra.mxu1 %v520_v35 }
  0x20   :  { %314 = vmatprep.subr.bf16.mxu0 %v521_v36  ;;  %367 = vmatprep.subr.bf16.mxu1 %v523_v37 }
  0x23   :  { %315 = vmatpush2.bf16.msra.mxu0 %v525_v40  ;;  %368 = vmatpush2.bf16.msra.mxu1 %v526_v41 }
  0x26   :  { %317 = vmatmul.mubr.bf16.vlgmr.msra.gmra.mxu0 %v527_v42  ;;  %370 = vmatmul.mubr.bf16.vlgmr.msra.gmra.mxu1 %v527_v42 }
  0x27   :  { %467 = vmatprep.mubr.msk.bf16.mxu0 %vm277_vm0, %v530_v43  ;;  %469 = vmatprep.mubr.msk.bf16.mxu1 %vm277_vm0, %v530_v43 }
  0x2e   :  { %327 = vmatmul.mubr.bf16.gmra.mxu0 %v532_v44  ;;  %380 = vmatmul.mubr.bf16.gmra.mxu1 %v532_v44 }
  0x89   :  { %v62_v45 = vpop.permute.xlu0 %61  ;;  %v72_v63 = vpop.permute.xlu1 %71 }
  0x8d   :  { %v67_v50 = vpop.permute.xlu0 %66  ;;  %v77_v16 = vpop.permute.xlu1 %76 }
  0xe6   :  { %v318_v46 = vpop.f32.mrf.mxu0  ;;  %v371_v47 = vpop.f32.mrf.mxu1 }
  0xe7   :  { %v319_v48 = vadd.f32 %v318_v46, %v62_v45  ;;  %v372_v49 = vadd.f32 %v371_v47, %v62_v45 }
  0xe8   :  { %v320_v51 = vpop.f32.mrf.mxu0  ;;  %v373_v52 = vpop.f32.mrf.mxu1 }
  0xe9   :  { %v390_v53 = vmax.f32 %v319_v48, 0.0  ;;  %v392_v54 = vmax.f32 %v372_v49, 0.0  ;;  %v321_v55 = vadd.f32 %v320_v51, %v62_v45  ;;  %v374_v56 = vadd.f32 %v373_v52, %v62_v45 }
  0xea   :  { %v322_v57 = vpop.f32.mrf.mxu0  ;;  %v375_v58 = vpop.f32.mrf.mxu1 }
  0xeb   :  { %406 = vst [vmem:[%s741_s3] sm:$0xff] %v390_v53  ;;  %408 = vst [vmem:[%s741_s3 + $0x10] sm:$0xff] %v392_v54  ;;  %v391_v59 = vmax.f32 %v321_v55, 0.0  ;;  %v393_v60 = vmax.f32 %v374_v56, 0.0  ;;  %v323_v61 = vadd.f32 %v322_v57, %v67_v50  ;;  %v376_v62 = vadd.f32 %v375_v58, %v67_v50 }
  0xec   :  { %v324_v0 = vpop.f32.mrf.mxu0  ;;  %v377_v1 = vpop.f32.mrf.mxu1 }
  0xed   :  { %407 = vst [vmem:[%s741_s3 + $0x8] sm:$0xff] %v391_v59  ;;  %409 = vst [vmem:[%s741_s3 + $0x18] sm:$0xff] %v393_v60  ;;  %v394_v2 = vmax.f32 %v323_v61, 0.0  ;;  %v396_v3 = vmax.f32 %v376_v62, 0.0  ;;  %v325_v4 = vadd.f32 %v324_v0, %v67_v50  ;;  %v378_v5 = vadd.f32 %v377_v1, %v67_v50 }
  0xee   :  { %v328_v6 = vpop.f32.mrf.mxu0  ;;  %v381_v7 = vpop.f32.mrf.mxu1 }
  0xef   :  { %410 = vst [vmem:[%s741_s3 + $0x20] sm:$0xff] %v394_v2  ;;  %412 = vst [vmem:[%s741_s3 + $0x30] sm:$0xff] %v396_v3  ;;  %v395_v8 = vmax.f32 %v325_v4, 0.0  ;;  %v397_v9 = vmax.f32 %v378_v5, 0.0  ;;  %v329_v10 = vadd.f32 %v328_v6, %v72_v63  ;;  %v382_v11 = vadd.f32 %v381_v7, %v72_v63 }
  0xf0   :  { %v330_v12 = vpop.f32.mrf.mxu0  ;;  %v383_v13 = vpop.f32.mrf.mxu1 }
  0xf1   :  { %411 = vst [vmem:[%s741_s3 + $0x28] sm:$0xff] %v395_v8  ;;  %413 = vst [vmem:[%s741_s3 + $0x38] sm:$0xff] %v397_v9  ;;  %v398_v14 = vmax.f32 %v329_v10, 0.0  ;;  %v400_v15 = vmax.f32 %v382_v11, 0.0  ;;  %v331_v17 = vadd.f32 %v330_v12, %v72_v63  ;;  %v384_v18 = vadd.f32 %v383_v13, %v72_v63 }
  0xf2   :  { %v332_v19 = vpop.f32.mrf.mxu0  ;;  %v385_v20 = vpop.f32.mrf.mxu1 }
  0xf3   :  { %414 = vst [vmem:[%s741_s3 + $0x40] sm:$0xff] %v398_v14  ;;  %416 = vst [vmem:[%s741_s3 + $0x50] sm:$0xff] %v400_v15  ;;  %v399_v21 = vmax.f32 %v331_v17, 0.0  ;;  %v401_v22 = vmax.f32 %v384_v18, 0.0  ;;  %v333_v23 = vadd.f32 %v332_v19, %v77_v16  ;;  %v386_v24 = vadd.f32 %v385_v20, %v77_v16 }
  0xf4   :  { %v334_v25 = vpop.f32.mrf.mxu0  ;;  %v387_v26 = vpop.f32.mrf.mxu1 }
  0xf5   :  { %415 = vst [vmem:[%s741_s3 + $0x48] sm:$0xff] %v399_v21  ;;  %417 = vst [vmem:[%s741_s3 + $0x58] sm:$0xff] %v401_v22  ;;  %v402_v27 = vmax.f32 %v333_v23, 0.0  ;;  %v404_v28 = vmax.f32 %v386_v24, 0.0  ;;  %v335_v29 = vadd.f32 %v334_v25, %v77_v16  ;;  %v388_v30 = vadd.f32 %v387_v26, %v77_v16 }
  0xf7   :  { %418 = vst [vmem:[%s741_s3 + $0x60] sm:$0xff] %v402_v27  ;;  %420 = vst [vmem:[%s741_s3 + $0x70] sm:$0xff] %v404_v28  ;;  %v403_v31 = vmax.f32 %v335_v29, 0.0  ;;  %v405_v32 = vmax.f32 %v388_v30, 0.0 }
  0xf9   :  { %419 = vst [vmem:[%s741_s3 + $0x68] sm:$0xff] %v403_v31  ;;  %421 = vst [vmem:[%s741_s3 + $0x78] sm:$0xff] %v405_v32 }

// kernel: net_forward.12
= control target key start
LH: loop header
LB: loop body
LE: loop exit
PB: predicated region body
PF: predicated region fallthrough
CT: control target
= control target key end

     0   :  { %v1000_v1 = vmov 0   ;;  %vm512_vm0 = vcmask 261120   ;;  %s1410_s0 = inlined_call_operand.vmem [shape: bf16[288,512], index: 0, kind: input, shape index: {}]   ;;  %s1411_s1 = inlined_call_operand.vmem [shape: bf16[32,288], index: 1, kind: input, shape index: {}]   ;;  %s1412_s2 = inlined_call_operand.vmem [shape: f32[32,1], index: 2, kind: input, shape index: {}]   ;;  %s1413_s3 = inlined_call_operand.vmem [shape: f32[32,512], index: 3, kind: input, shape index: {}]   ;;  %s1414_s4 = inlined_call_operand.vmem [shape: f32[32,512], index: 4, kind: output, shape index: {}]  }
   0x1   :  { %v884_v0 = vld [vmem:[%s1410_s0 + $0xe4] ss:$16 sps:$4 sm:$0xff]   ;;  %604 = vmatprep.mubr.bf16.mxu1 %v1000_v1  ;;  %882 = vset.pattern.permute.xlu0 %v1000_v1  ;;  %v886_v2 = vld [vmem:[%s1410_s0 + $0xe0] ss:$16 sps:$4 sm:$0xff]   ;;  %v899_v11 = vld [vmem:[%s1410_s0 + $0xe8] ss:$16 sps:$4 sm:$0xff]  }
   0x2   :  { %883 = vset.pattern.permute.xlu1 %v1000_v1  ;;  %519 = vmatprep.subr.bf16.mxu0 %v884_v0  ;;  %v887_v3 = vld [vmem:[%s1410_s0 + $0x224] ss:$16 sps:$4 sm:$0xff]   ;;  %v889_v4 = vld [vmem:[%s1410_s0 + $0x220] ss:$16 sps:$4 sm:$0xff]   ;;  %v901_v12 = vld [vmem:[%s1410_s0 + $0xec] ss:$16 sps:$4 sm:$0xff]  }
   0x3   :  { %520 = vmatpush1.bf16.msra.mxu0 %v886_v2  ;;  %v890_v5 = vld [vmem:[%s1410_s0 + $0xc4] ss:$16 sps:$4 sm:$0xff]   ;;  %v892_v6 = vld [vmem:[%s1410_s0 + $0xc0] ss:$16 sps:$4 sm:$0xff]   ;;  %584 = vmatprep.subr.bf16.mxu1 %v887_v3  ;;  %v908_v16 = vld [vmem:[%s1410_s0 + $0xcc] ss:$16 sps:$4 sm:$0xff]  }
   0x4   :  { %v893_v7 = vld [vmem:[%s1410_s0 + $0x204] ss:$16 sps:$4 sm:$0xff]   ;;  %585 = vmatpush1.bf16.msra.mxu1 %v889_v4  ;;  %521 = vmatprep.subr.bf16.mxu0 %v890_v5  ;;  %v895_v8 = vld [vmem:[%s1410_s0 + $0x200] ss:$16 sps:$4 sm:$0xff]   ;;  %v906_v18 = vld [vmem:[%s1410_s0 + $0xc8] ss:$16 sps:$4 sm:$0xff]  }
   0x5   :  { %586 = vmatprep.subr.bf16.mxu1 %v893_v7  ;;  %v896_v9 = vld [vmem:[%s1410_s0 + $0xa4] ss:$16 sps:$4 sm:$0xff]   ;;  %v898_v10 = vld [vmem:[%s1410_s0 + $0xa0] ss:$16 sps:$4 sm:$0xff]   ;;  %v914_v19 = vld [vmem:[%s1410_s0 + $0xac] ss:$16 sps:$4 sm:$0xff]  }
   0x6   :  { %v1068_v13 = vld [vmem:[%s1411_s1 + $0x8] ss:$12 sps:$4 sm:$0xff]   ;;  %v905_v15 = vld [vmem:[%s1410_s0 + $0x80] ss:$16 sps:$4 sm:$0xff]   ;;  %v920_v23 = vld [vmem:[%s1410_s0 + $0x8c] ss:$16 sps:$4 sm:$0xff]  }
   0x7   :  { %522 = vmatpush1.bf16.msra.mxu0 %v892_v6  ;;  %v903_v14 = vld [vmem:[%s1410_s0 + $0x84] ss:$16 sps:$4 sm:$0xff]   ;;  %v911_v20 = vld [vmem:[%s1410_s0 + $0x60] ss:$16 sps:$4 sm:$0xff]   ;;  %v912_v22 = vld [vmem:[%s1410_s0 + $0xa8] ss:$16 sps:$4 sm:$0xff]  }
   0x8   :  { %523 = vmatprep.subr.bf16.mxu0 %v896_v9  ;;  %587 = vmatpush1.bf16.msra.mxu1 %v895_v8  ;;  %v909_v17 = vld [vmem:[%s1410_s0 + $0x64] ss:$16 sps:$4 sm:$0xff]   ;;  %v917_v24 = vld [vmem:[%s1410_s0 + $0x40] ss:$16 sps:$4 sm:$0xff]   ;;  %v918_v26 = vld [vmem:[%s1410_s0 + $0x88] ss:$16 sps:$4 sm:$0xff]  }
   0x9   :  { %625 = vmatprep.subr.bf16.mxu1 %v901_v12  ;;  %v915_v21 = vld [vmem:[%s1410_s0 + $0x44] ss:$16 sps:$4 sm:$0xff]   ;;  %v926_v27 = vld [vmem:[%s1410_s0 + $0x6c] ss:$16 sps:$4 sm:$0xff]   ;;  %v923_v28 = vld [vmem:[%s1410_s0 + $0x20] ss:$16 sps:$4 sm:$0xff]  }
   0xa   :  { %v921_v25 = vld [vmem:[%s1410_s0 + $0x24] ss:$16 sps:$4 sm:$0xff]   ;;  %v924_v30 = vld [vmem:[%s1410_s0 + $0x68] ss:$16 sps:$4 sm:$0xff]   ;;  %v932_v31 = vld [vmem:[%s1410_s0 + $0x4c] ss:$16 sps:$4 sm:$0xff]  }
   0xb   :  { %524 = vmatpush1.bf16.msra.mxu0 %v898_v10  ;;  %877 = vmatmul.mubr.msk.bf16.vlgmr.msra.gmra.mxu1 %vm512_vm0, %v1068_v13  ;;  %v927_v29 = vld [vmem:[%s1410_s0 + $0x4] ss:$16 sps:$4 sm:$0xff]   ;;  %v929_v32 = vld [vmem:[%s1410_s0] ss:$16 sps:$4 sm:$0xff]   ;;  %v930_v34 = vld [vmem:[%s1410_s0 + $0x48] ss:$16 sps:$4 sm:$0xff]  }
   0xc   :  { %525 = vmatprep.subr.bf16.mxu0 %v903_v14  ;;  %626 = vmatpush1.bf16.msra.mxu1 %v899_v11  ;;  %v933_v33 = vld [vmem:[%s1410_s0 + $0x1e4] ss:$16 sps:$4 sm:$0xff]   ;;  %v938_v35 = vld [vmem:[%s1410_s0 + $0x2c] ss:$16 sps:$4 sm:$0xff]   ;;  %v935_v36 = vld [vmem:[%s1410_s0 + $0x1e0] ss:$16 sps:$4 sm:$0xff]  }
   0xd   :  { %614 = vmatprep.mubr.bf16.mxu1 %v1000_v1  ;;  %627 = vmatprep.subr.bf16.mxu1 %v908_v16  ;;  %v939_v37 = vld [vmem:[%s1410_s0 + $0x1c4] ss:$16 sps:$4 sm:$0xff]   ;;  %v936_v38 = vld [vmem:[%s1410_s0 + $0x28] ss:$16 sps:$4 sm:$0xff]   ;;  %v944_v39 = vld [vmem:[%s1410_s0 + $0xc] ss:$16 sps:$4 sm:$0xff]  }
   0xe   :  { %v941_v40 = vld [vmem:[%s1410_s0 + $0x1c0] ss:$16 sps:$4 sm:$0xff]   ;;  %v945_v41 = vld [vmem:[%s1410_s0 + $0x1a4] ss:$16 sps:$4 sm:$0xff]   ;;  %v942_v42 = vld [vmem:[%s1410_s0 + $0x8] ss:$16 sps:$4 sm:$0xff]  }
   0xf   :  { %526 = vmatpush1.bf16.msra.mxu0 %v905_v15  ;;  %v950_v43 = vld [vmem:[%s1410_s0 + $0x1ec] ss:$16 sps:$4 sm:$0xff]   ;;  %v947_v44 = vld [vmem:[%s1410_s0 + $0x1a0] ss:$16 sps:$4 sm:$0xff]   ;;  %v951_v45 = vld [vmem:[%s1410_s0 + $0x184] ss:$16 sps:$4 sm:$0xff]  }
  0x10   :  { %527 = vmatprep.subr.bf16.mxu0 %v909_v17  ;;  %628 = vmatpush1.bf16.msra.mxu1 %v906_v18  ;;  %v948_v46 = vld [vmem:[%s1410_s0 + $0x1e8] ss:$16 sps:$4 sm:$0xff]   ;;  %v956_v47 = vld [vmem:[%s1410_s0 + $0x1cc] ss:$16 sps:$4 sm:$0xff]   ;;  %v953_v48 = vld [vmem:[%s1410_s0 + $0x180] ss:$16 sps:$4 sm:$0xff]  }
  0x11   :  { %629 = vmatprep.subr.bf16.mxu1 %v914_v19  ;;  %v954_v49 = vld [vmem:[%s1410_s0 + $0x1c8] ss:$16 sps:$4 sm:$0xff]   ;;  %v957_v50 = vld [vmem:[%s1410_s0 + $0x164] ss:$16 sps:$4 sm:$0xff]   ;;  %v959_v52 = vld [vmem:[%s1410_s0 + $0x160] ss:$16 sps:$4 sm:$0xff]  }
  0x12   :  { %v983_v51 = vld [vmem:[%s1411_s1 + $0x4] ss:$12 sps:$4 sm:$0xff]   ;;  %v962_v53 = vld [vmem:[%s1410_s0 + $0x1ac] ss:$16 sps:$4 sm:$0xff]   ;;  %v960_v56 = vld [vmem:[%s1410_s0 + $0x1a8] ss:$16 sps:$4 sm:$0xff]  }
  0x13   :  { %528 = vmatpush1.bf16.msra.mxu0 %v911_v20  ;;  %551 = vmatprep.mubr.bf16.mxu0 %v983_v51  ;;  %v1196_v54 = vld [vmem:[%s1411_s1 + $0x20] ss:$12 sps:$4 sm:$0xff]   ;;  %v963_v55 = vld [vmem:[%s1410_s0 + $0x144] ss:$16 sps:$4 sm:$0xff]   ;;  %v966_v61 = vld [vmem:[%s1410_s0 + $0x188] ss:$16 sps:$4 sm:$0xff]  }
  0x14   :  { %529 = vmatprep.subr.bf16.mxu0 %v915_v21  ;;  %630 = vmatpush1.bf16.msra.mxu1 %v912_v22  ;;  %v968_v57 = vld [vmem:[%s1410_s0 + $0x18c] ss:$16 sps:$4 sm:$0xff]   ;;  %v965_v58 = vld [vmem:[%s1410_s0 + $0x140] ss:$16 sps:$4 sm:$0xff]   ;;  %v969_v59 = vld [vmem:[%s1410_s0 + $0x124] ss:$16 sps:$4 sm:$0xff]  }
  0x15   :  { %631 = vmatprep.subr.bf16.mxu1 %v920_v23  ;;  %878 = vmatmul.mubr.msk.bf16.gmra.mxu1 %vm512_vm0, %v1196_v54  ;;  %v98_v60 = vld [vmem:[%s1412_s2] sm:$0xff]  ;;  %v100_v62 = vld [vmem:[%s1412_s2 + $0x10] sm:$0xff]  ;;  %v974_v63 = vld [vmem:[%s1410_s0 + $0x16c] ss:$16 sps:$4 sm:$0xff]  }
  0x16   :  { %657 = vmatprep.mubr.bf16.mxu1 %v983_v51  ;;  %104 = vperm.xlu0 %882, %v98_v60   ;;  %v99_v0 = vld [vmem:[%s1412_s2 + $0x8] sm:$0xff]  ;;  %v971_v2 = vld [vmem:[%s1410_s0 + $0x120] ss:$16 sps:$4 sm:$0xff]   ;;  %v101_v3 = vld [vmem:[%s1412_s2 + $0x18] sm:$0xff] }
  0x17   :  { %530 = vmatpush1.bf16.msra.mxu0 %v917_v24  ;;  %114 = vperm.xlu1 %883, %v100_v62   ;;  %v975_v4 = vld [vmem:[%s1410_s0 + $0x104] ss:$16 sps:$4 sm:$0xff]   ;;  %v972_v5 = vld [vmem:[%s1410_s0 + $0x168] ss:$16 sps:$4 sm:$0xff]   ;;  %v980_v6 = vld [vmem:[%s1410_s0 + $0x14c] ss:$16 sps:$4 sm:$0xff]  }
  0x18   :  { %531 = vmatprep.subr.bf16.mxu0 %v921_v25  ;;  %632 = vmatpush1.bf16.msra.mxu1 %v918_v26  ;;  %v977_v7 = vld [vmem:[%s1410_s0 + $0x100] ss:$16 sps:$4 sm:$0xff]   ;;  %v986_v8 = vld [vmem:[%s1410_s0 + $0x22c] ss:$16 sps:$4 sm:$0xff]   ;;  %v978_v9 = vld [vmem:[%s1410_s0 + $0x148] ss:$16 sps:$4 sm:$0xff]  }
  0x19   :  { %633 = vmatprep.subr.bf16.mxu1 %v926_v27  ;;  %v981_v10 = vld [vmem:[%s1411_s1] ss:$12 sps:$4 sm:$0xff]   ;;  %v984_v12 = vld [vmem:[%s1410_s0 + $0x228] ss:$16 sps:$4 sm:$0xff]  }
  0x1a   :  { %109 = vperm.xlu0 %882, %v99_v0   ;;  %v990_v11 = vld [vmem:[%s1410_s0 + $0x12c] ss:$16 sps:$4 sm:$0xff]   ;;  %v988_v16 = vld [vmem:[%s1410_s0 + $0x128] ss:$16 sps:$4 sm:$0xff]  }
  0x1b   :  { %532 = vmatpush1.bf16.msra.mxu0 %v923_v28  ;;  %119 = vperm.xlu1 %883, %v101_v3   ;;  %v994_v14 = vld [vmem:[%s1411_s1 + $0x1c] ss:$12 sps:$4 sm:$0xff]   ;;  %v996_v20 = vld [vmem:[%s1411_s1 + $0x18] ss:$12 sps:$4 sm:$0xff]  }
  0x1c   :  { %533 = vmatprep.subr.bf16.mxu0 %v927_v29  ;;  %634 = vmatpush1.bf16.msra.mxu1 %v924_v30  ;;  %v999_v15 = vld [vmem:[%s1410_s0 + $0x20c] ss:$16 sps:$4 sm:$0xff]   ;;  %v997_v18 = vld [vmem:[%s1410_s0 + $0x208] ss:$16 sps:$4 sm:$0xff]  }
  0x1d   :  { %635 = vmatprep.subr.bf16.mxu1 %v932_v31  ;;  %v993_v17 = vld [vmem:[%s1410_s0 + $0x10c] ss:$16 sps:$4 sm:$0xff]   ;;  %v991_v19 = vld [vmem:[%s1410_s0 + $0x108] ss:$16 sps:$4 sm:$0xff]  }
  0x1f   :  { %534 = vmatpush1.bf16.msra.mxu0 %v929_v32 }
  0x20   :  { %535 = vmatprep.subr.bf16.mxu0 %v933_v33  ;;  %636 = vmatpush1.bf16.msra.mxu1 %v930_v34  ;;  %v747_v34 = vld [vmem:[%s1413_s3] sm:$0xff] }
  0x21   :  { %637 = vmatprep.subr.bf16.mxu1 %v938_v35 }
  0x23   :  { %536 = vmatpush2.bf16.msra.mxu0 %v935_v36 }
  0x24   :  { %537 = vmatprep.subr.bf16.mxu0 %v939_v37  ;;  %638 = vmatpush1.bf16.msra.mxu1 %v936_v38 }
  0x25   :  { %639 = vmatprep.subr.bf16.mxu1 %v944_v39  ;;  %v748_v39 = vld [vmem:[%s1413_s3 + $0x8] sm:$0xff] }
  0x27   :  { %538 = vmatpush2.bf16.msra.mxu0 %v941_v40 }
  0x28   :  { %539 = vmatprep.subr.bf16.mxu0 %v945_v41  ;;  %640 = vmatpush1.bf16.msra.mxu1 %v942_v42 }
  0x29   :  { %641 = vmatprep.subr.bf16.mxu1 %v950_v43 }
  0x2b   :  { %540 = vmatpush2.bf16.msra.mxu0 %v947_v44 }
  0x2c   :  { %541 = vmatprep.subr.bf16.mxu0 %v951_v45  ;;  %642 = vmatpush2.bf16.msra.mxu1 %v948_v46  ;;  %v751_v46 = vld [vmem:[%s1413_s3 + $0x20] sm:$0xff] }
  0x2d   :  { %643 = vmatprep.subr.bf16.mxu1 %v956_v47 }
  0x2f   :  { %542 = vmatpush2.bf16.msra.mxu0 %v953_v48 }
  0x30   :  { %543 = vmatprep.subr.bf16.mxu0 %v957_v50  ;;  %644 = vmatpush2.bf16.msra.mxu1 %v954_v49 }
  0x31   :  { %645 = vmatprep.subr.bf16.mxu1 %v962_v53  ;;  %v752_v53 = vld [vmem:[%s1413_s3 + $0x28] sm:$0xff] }
  0x33   :  { %544 = vmatpush2.bf16.msra.mxu0 %v959_v52 }
  0x34   :  { %545 = vmatprep.subr.bf16.mxu0 %v963_v55  ;;  %646 = vmatpush2.bf16.msra.mxu1 %v960_v56 }
  0x35   :  { %647 = vmatprep.subr.bf16.mxu1 %v968_v57 }
  0x37   :  { %546 = vmatpush2.bf16.msra.mxu0 %v965_v58 }
  0x38   :  { %547 = vmatprep.subr.bf16.mxu0 %v969_v59  ;;  %648 = vmatpush2.bf16.msra.mxu1 %v966_v61  ;;  %v755_v59 = vld [vmem:[%s1413_s3 + $0x40] sm:$0xff] }
  0x39   :  { %649 = vmatprep.subr.bf16.mxu1 %v974_v63 }
  0x3b   :  { %548 = vmatpush2.bf16.msra.mxu0 %v971_v2 }
  0x3c   :  { %549 = vmatprep.subr.bf16.mxu0 %v975_v4  ;;  %650 = vmatpush2.bf16.msra.mxu1 %v972_v5 }
  0x3d   :  { %651 = vmatprep.subr.bf16.mxu1 %v980_v6 }
  0x3f   :  { %550 = vmatpush2.bf16.msra.mxu0 %v977_v7 }
  0x40   :  { %690 = vmatprep.subr.bf16.mxu0 %v986_v8  ;;  %652 = vmatpush2.bf16.msra.mxu1 %v978_v9  ;;  %v756_v8 = vld [vmem:[%s1413_s3 + $0x48] sm:$0xff] }
  0x41   :  { %653 = vmatprep.subr.bf16.mxu1 %v990_v11 }
  0x42   :  { %552 = vmatmul.mubr.bf16.vlgmr.msra.gmra.mxu0 %v981_v10 }
  0x43   :  { %691 = vmatpush1.bf16.msra.mxu0 %v984_v12  ;;  %561 = vmatprep.mubr.bf16.mxu0 %v994_v14  ;;  %v759_v12 = vld [vmem:[%s1413_s3 + $0x60] sm:$0xff] }
  0x44   :  { %692 = vmatprep.subr.bf16.mxu0 %v999_v15  ;;  %654 = vmatpush2.bf16.msra.mxu1 %v988_v16 }
  0x45   :  { %655 = vmatprep.subr.bf16.mxu1 %v993_v17 }
  0x47   :  { %693 = vmatpush1.bf16.msra.mxu0 %v997_v18 }
  0x48   :  { %656 = vmatpush2.bf16.msra.mxu1 %v991_v19 }
  0x4a   :  { %562 = vmatmul.mubr.bf16.gmra.mxu0 %v996_v20 }
  0x4b   :  { %710 = vmatprep.mubr.bf16.mxu0 %v1000_v1  ;;  %658 = vmatmul.mubr.bf16.vlgmr.msra.gmra.mxu1 %v981_v10 }
  0x4c   :  { %667 = vmatprep.mubr.bf16.mxu1 %v994_v14 }
  0x52   :  { %879 = vmatmul.mubr.msk.bf16.vlgmr.msra.gmra.mxu0 %vm512_vm0, %v1068_v13 }
  0x53   :  { %720 = vmatprep.mubr.bf16.mxu0 %v1000_v1  ;;  %668 = vmatmul.mubr.bf16.gmra.mxu1 %v996_v20 }
  0x5a   :  { %880 = vmatmul.mubr.msk.bf16.gmra.mxu0 %vm512_vm0, %v1196_v54 }
  0x91   :  { %v1290_v26 = vpop.permute.xlu0 %104 }
  0x92   :  { %v1296_v33 = vpop.permute.xlu1 %114 }
  0x95   :  { %v1293_v30 = vpop.permute.xlu0 %109 }
  0x96   :  { %v1313_v52 = vpop.permute.xlu1 %119 }
  0xcb   :  { %v606_v21 = vpop.f32.mrf.mxu1 }
  0xcd   :  { %v608_v22 = vpop.f32.mrf.mxu1 }
  0xcf   :  { %v610_v23 = vpop.f32.mrf.mxu1 }
  0xd1   :  { %v612_v24 = vpop.f32.mrf.mxu1 }
  0xd5   :  { %v616_v25 = vpop.f32.mrf.mxu1 }
  0xd7   :  { %v618_v27 = vpop.f32.mrf.mxu1 }
  0xd9   :  { %v620_v31 = vpop.f32.mrf.mxu1 }
  0xdb   :  { %v622_v41 = vpop.f32.mrf.mxu1 }
 0x102   :  { %v553_v28 = vpop.f32.mrf.mxu0 }
 0x103   :  { %v554_v29 = vadd.f32 %v553_v28, %v1290_v26 }
 0x104   :  { %v555_v13 = vpop.f32.mrf.mxu0 }
 0x105   :  { %v607_v1 = vadd.f32 %v606_v21, %v554_v29  ;;  %v556_v32 = vadd.f32 %v555_v13, %v1290_v26  ;;  %v760_v21 = vld [vmem:[%s1413_s3 + $0x68] sm:$0xff] }
 0x106   :  { %v557_v35 = vpop.f32.mrf.mxu0 }
 0x107   :  { %v731_v36 = vmax.f32 %v607_v1, 0.0  ;;  %v609_v37 = vadd.f32 %v608_v22, %v556_v32  ;;  %v558_v38 = vadd.f32 %v557_v35, %v1293_v30  ;;  %v749_v22 = vld [vmem:[%s1413_s3 + $0x10] sm:$0xff] }
 0x108   :  { %v559_v40 = vpop.f32.mrf.mxu0 }
 0x109   :  { %v763_v42 = vadd.f32 %v747_v34, %v731_v36  ;;  %v732_v43 = vmax.f32 %v609_v37, 0.0  ;;  %v611_v44 = vadd.f32 %v610_v23, %v558_v38  ;;  %v560_v45 = vadd.f32 %v559_v40, %v1293_v30  ;;  %v750_v36 = vld [vmem:[%s1413_s3 + $0x18] sm:$0xff] }
 0x10a   :  { %v563_v47 = vpop.f32.mrf.mxu0 }
 0x10b   :  { %779 = vst [vmem:[%s1414_s4] sm:$0xff] %v763_v42  ;;  %v764_v48 = vadd.f32 %v748_v39, %v732_v43  ;;  %v735_v49 = vmax.f32 %v611_v44, 0.0  ;;  %v613_v50 = vadd.f32 %v612_v24, %v560_v45  ;;  %v564_v51 = vadd.f32 %v563_v47, %v1296_v33  ;;  %v659_v54 = vpop.f32.mrf.mxu1  ;;  %v754_v44 = vld [vmem:[%s1413_s3 + $0x38] sm:$0xff] }
 0x10c   :  { %v565_v55 = vpop.f32.mrf.mxu0  ;;  %v660_v2 = vadd.f32 %v659_v54, %v1290_v26 }
 0x10d   :  { %780 = vst [vmem:[%s1414_s4 + $0x8] sm:$0xff] %v764_v48  ;;  %v767_v56 = vadd.f32 %v751_v46, %v735_v49  ;;  %v736_v57 = vmax.f32 %v613_v50, 0.0  ;;  %v617_v58 = vadd.f32 %v616_v25, %v564_v51  ;;  %v566_v60 = vadd.f32 %v565_v55, %v1296_v33  ;;  %v661_v61 = vpop.f32.mrf.mxu1  ;;  %v757_v51 = vld [vmem:[%s1413_s3 + $0x50] sm:$0xff] }
 0x10e   :  { %v567_v62 = vpop.f32.mrf.mxu0  ;;  %v662_v20 = vadd.f32 %v661_v61, %v1290_v26 }
 0x10f   :  { %783 = vst [vmem:[%s1414_s4 + $0x20] sm:$0xff] %v767_v56  ;;  %v768_v63 = vadd.f32 %v752_v53, %v736_v57  ;;  %v739_v0 = vmax.f32 %v617_v58, 0.0  ;;  %v568_v3 = vadd.f32 %v567_v62, %v1313_v52  ;;  %v619_v4 = vadd.f32 %v618_v27, %v566_v60  ;;  %v663_v5 = vpop.f32.mrf.mxu1  ;;  %v758_v57 = vld [vmem:[%s1413_s3 + $0x58] sm:$0xff] }
 0x110   :  { %v569_v6 = vpop.f32.mrf.mxu0  ;;  %v664_v27 = vadd.f32 %v663_v5, %v1293_v30  ;;  %v762_v5 = vld [vmem:[%s1413_s3 + $0x78] sm:$0xff] }
 0x111   :  { %784 = vst [vmem:[%s1414_s4 + $0x28] sm:$0xff] %v768_v63  ;;  %v771_v7 = vadd.f32 %v755_v59, %v739_v0  ;;  %v621_v9 = vadd.f32 %v620_v31, %v568_v3  ;;  %v570_v10 = vadd.f32 %v569_v6, %v1313_v52  ;;  %v740_v11 = vmax.f32 %v619_v4, 0.0  ;;  %v665_v14 = vpop.f32.mrf.mxu1  ;;  %v761_v63 = vld [vmem:[%s1413_s3 + $0x70] sm:$0xff] }
 0x112   :  { %v712_v15 = vpop.f32.mrf.mxu0  ;;  %v666_v26 = vadd.f32 %v665_v14, %v1293_v30  ;;  %v753_v30 = vld [vmem:[%s1413_s3 + $0x30] sm:$0xff] }
 0x113   :  { %787 = vst [vmem:[%s1414_s4 + $0x40] sm:$0xff] %v771_v7  ;;  %v743_v16 = vmax.f32 %v621_v9, 0.0  ;;  %v623_v17 = vadd.f32 %v622_v41, %v570_v10  ;;  %v713_v18 = vadd.f32 %v712_v15, %v660_v2  ;;  %v772_v19 = vadd.f32 %v756_v8, %v740_v11  ;;  %v669_v23 = vpop.f32.mrf.mxu1 }
 0x114   :  { %v714_v24 = vpop.f32.mrf.mxu0  ;;  %v670_v35 = vadd.f32 %v669_v23, %v1296_v33 }
 0x115   :  { %v775_v25 = vadd.f32 %v759_v12, %v743_v16  ;;  %v744_v28 = vmax.f32 %v623_v17, 0.0  ;;  %v733_v29 = vmax.f32 %v713_v18, 0.0  ;;  %788 = vst [vmem:[%s1414_s4 + $0x48] sm:$0xff] %v772_v19  ;;  %v715_v13 = vadd.f32 %v714_v24, %v662_v20  ;;  %v671_v31 = vpop.f32.mrf.mxu1 }
 0x116   :  { %v716_v1 = vpop.f32.mrf.mxu0  ;;  %v672_v46 = vadd.f32 %v671_v31, %v1296_v33 }
 0x117   :  { %791 = vst [vmem:[%s1414_s4 + $0x60] sm:$0xff] %v775_v25  ;;  %v776_v32 = vadd.f32 %v760_v21, %v744_v28  ;;  %v765_v34 = vadd.f32 %v749_v22, %v733_v29  ;;  %v717_v37 = vadd.f32 %v716_v1, %v664_v27  ;;  %v734_v38 = vmax.f32 %v715_v13, 0.0  ;;  %v673_v39 = vpop.f32.mrf.mxu1 }
 0x118   :  { %v718_v40 = vpop.f32.mrf.mxu0  ;;  %v674_v54 = vadd.f32 %v673_v39, %v1313_v52 }
 0x119   :  { %792 = vst [vmem:[%s1414_s4 + $0x68] sm:$0xff] %v776_v32  ;;  %781 = vst [vmem:[%s1414_s4 + $0x10] sm:$0xff] %v765_v34  ;;  %v737_v41 = vmax.f32 %v717_v37, 0.0  ;;  %v719_v42 = vadd.f32 %v718_v40, %v666_v26  ;;  %v766_v43 = vadd.f32 %v750_v36, %v734_v38  ;;  %v675_v50 = vpop.f32.mrf.mxu1 }
 0x11a   :  { %v722_v45 = vpop.f32.mrf.mxu0  ;;  %v676_v59 = vadd.f32 %v675_v50, %v1313_v52 }
 0x11b   :  { %v769_v47 = vadd.f32 %v753_v30, %v737_v41  ;;  %v738_v48 = vmax.f32 %v719_v42, 0.0  ;;  %v723_v49 = vadd.f32 %v722_v45, %v670_v35  ;;  %782 = vst [vmem:[%s1414_s4 + $0x18] sm:$0xff] %v766_v43 }
 0x11c   :  { %v724_v53 = vpop.f32.mrf.mxu0 }
 0x11d   :  { %785 = vst [vmem:[%s1414_s4 + $0x30] sm:$0xff] %v769_v47  ;;  %v770_v33 = vadd.f32 %v754_v44, %v738_v48  ;;  %v741_v55 = vmax.f32 %v723_v49, 0.0  ;;  %v725_v56 = vadd.f32 %v724_v53, %v672_v46 }
 0x11e   :  { %v726_v58 = vpop.f32.mrf.mxu0 }
 0x11f   :  { %786 = vst [vmem:[%s1414_s4 + $0x38] sm:$0xff] %v770_v33  ;;  %v773_v60 = vadd.f32 %v757_v51, %v741_v55  ;;  %v742_v61 = vmax.f32 %v725_v56, 0.0  ;;  %v727_v62 = vadd.f32 %v726_v58, %v674_v54 }
 0x120   :  { %v728_v0 = vpop.f32.mrf.mxu0 }
 0x121   :  { %789 = vst [vmem:[%s1414_s4 + $0x50] sm:$0xff] %v773_v60  ;;  %v774_v2 = vadd.f32 %v758_v57, %v742_v61  ;;  %v745_v3 = vmax.f32 %v727_v62, 0.0  ;;  %v729_v4 = vadd.f32 %v728_v0, %v676_v59 }
 0x123   :  { %790 = vst [vmem:[%s1414_s4 + $0x58] sm:$0xff] %v774_v2  ;;  %v777_v52 = vadd.f32 %v761_v63, %v745_v3  ;;  %v746_v6 = vmax.f32 %v729_v4, 0.0 }
 0x125   :  { %793 = vst [vmem:[%s1414_s4 + $0x70] sm:$0xff] %v777_v52  ;;  %v778_v7 = vadd.f32 %v762_v5, %v746_v6 }
 0x127   :  { %794 = vst [vmem:[%s1414_s4 + $0x78] sm:$0xff] %v778_v7 }

// kernel: net_forward.13
= control target key start
LH: loop header
LB: loop body
LE: loop exit
PB: predicated region body
PF: predicated region fallthrough
CT: control target
= control target key end

     0   :  { %v591_v1 = vmov 0   ;;  %vm283_vm0 = vcmask 261120   ;;  %s754_s0 = inlined_call_operand.vmem [shape: bf16[288,128], index: 0, kind: input, shape index: {}]   ;;  %s755_s1 = inlined_call_operand.vmem [shape: bf16[64,288], index: 1, kind: input, shape index: {}]   ;;  %s756_s2 = inlined_call_operand.vmem [shape: f32[64,1], index: 2, kind: input, shape index: {}]   ;;  %s757_s3 = inlined_call_operand.vmem [shape: f32[64,128], index: 3, kind: output, shape index: {}]  }
   0x1   :  { %v557_v0 = vld [vmem:[%s754_s0 + $0x78] sm:$0xff]   ;;  %555 = vset.pattern.permute.xlu0 %v591_v1  ;;  %556 = vset.pattern.permute.xlu1 %v591_v1  ;;  %v559_v3 = vld [vmem:[%s754_s0 + $0x70] sm:$0xff]   ;;  %v561_v5 = vld [vmem:[%s754_s0 + $0x68] sm:$0xff]  }
   0x2   :  { %v558_v2 = vld [vmem:[%s754_s0 + $0x38] sm:$0xff]   ;;  %480 = vmatprep.subr.bf16.mxu0 %v557_v0  ;;  %538 = vmatprep.subr.bf16.mxu1 %v557_v0  ;;  %v560_v4 = vld [vmem:[%s754_s0 + $0x30] sm:$0xff]   ;;  %v562_v6 = vld [vmem:[%s754_s0 + $0x28] sm:$0xff]  }
   0x3   :  { %481 = vmatpush3.bf16.msra.mxu0 %v558_v2  ;;  %546 = vmatpush3.bf16.msra.mxu1 %v558_v2  ;;  %v563_v7 = vld [vmem:[%s754_s0 + $0x60] sm:$0xff]   ;;  %v565_v9 = vld [vmem:[%s754_s0 + $0x58] sm:$0xff]   ;;  %v567_v11 = vld [vmem:[%s754_s0 + $0x50] sm:$0xff]  }
   0x4   :  { %482 = vmatprep.subr.bf16.mxu0 %v559_v3  ;;  %539 = vmatprep.subr.bf16.mxu1 %v559_v3  ;;  %v564_v8 = vld [vmem:[%s754_s0 + $0x20] sm:$0xff]   ;;  %v566_v10 = vld [vmem:[%s754_s0 + $0x18] sm:$0xff]   ;;  %v568_v14 = vld [vmem:[%s754_s0 + $0x10] sm:$0xff]  }
   0x5   :  { %v575_v12 = vld [vmem:[%s755_s1 + $0x4] ss:$12 sps:$4 sm:$0xff]   ;;  %v578_v13 = vld [vmem:[%s755_s1 + $0x4c] ss:$12 sps:$4 sm:$0xff]   ;;  %v576_v23 = vld [vmem:[%s755_s1 + $0x48] ss:$12 sps:$4 sm:$0xff]  }
   0x6   :  { %v569_v15 = vld [vmem:[%s754_s0 + $0x48] sm:$0xff]   ;;  %328 = vmatprep.mubr.bf16.mxu0 %v575_v12  ;;  %352 = vmatprep.mubr.bf16.mxu1 %v578_v13  ;;  %v571_v17 = vld [vmem:[%s754_s0 + $0x40] sm:$0xff]   ;;  %v69_v20 = vld [vmem:[%s756_s2 + $0x10] sm:$0xff] }
   0x7   :  { %483 = vmatpush3.bf16.msra.mxu0 %v560_v4  ;;  %547 = vmatpush3.bf16.msra.mxu1 %v560_v4  ;;  %v570_v16 = vld [vmem:[%s754_s0 + $0x8] sm:$0xff]   ;;  %v572_v18 = vld [vmem:[%s754_s0] sm:$0xff]   ;;  %v70_v25 = vld [vmem:[%s756_s2 + $0x18] sm:$0xff] }
   0x8   :  { %484 = vmatprep.subr.bf16.mxu0 %v561_v5  ;;  %540 = vmatprep.subr.bf16.mxu1 %v561_v5  ;;  %v67_v19 = vld [vmem:[%s756_s2] sm:$0xff]  ;;  %v579_v21 = vld [vmem:[%s754_s0 + $0x88] sm:$0xff]   ;;  %v73_v33 = vld [vmem:[%s756_s2 + $0x30] sm:$0xff] }
   0x9   :  { %v573_v22 = vld [vmem:[%s755_s1] ss:$12 sps:$4 sm:$0xff]   ;;  %77 = vperm.xlu0 %555, %v67_v19   ;;  %87 = vperm.xlu1 %556, %v69_v20   ;;  %v581_v26 = vld [vmem:[%s755_s1 + $0x1c] ss:$12 sps:$4 sm:$0xff]   ;;  %v584_v31 = vld [vmem:[%s755_s1 + $0x18] ss:$12 sps:$4 sm:$0xff]  }
   0xa   :  { %v68_v24 = vld [vmem:[%s756_s2 + $0x8] sm:$0xff]  ;;  %v580_v27 = vld [vmem:[%s754_s0 + $0x80] sm:$0xff]   ;;  %v74_v34 = vld [vmem:[%s756_s2 + $0x38] sm:$0xff] }
   0xb   :  { %485 = vmatpush3.bf16.msra.mxu0 %v562_v6  ;;  %548 = vmatpush3.bf16.msra.mxu1 %v562_v6  ;;  %v583_v28 = vld [vmem:[%s755_s1 + $0x8] ss:$12 sps:$4 sm:$0xff]   ;;  %v71_v29 = vld [vmem:[%s756_s2 + $0x20] sm:$0xff]  ;;  %v589_v37 = vld [vmem:[%s755_s1 + $0x30] ss:$12 sps:$4 sm:$0xff]  }
   0xc   :  { %486 = vmatprep.subr.bf16.mxu0 %v563_v7  ;;  %541 = vmatprep.subr.bf16.mxu1 %v563_v7  ;;  %v72_v30 = vld [vmem:[%s756_s2 + $0x28] sm:$0xff]  ;;  %v586_v35 = vld [vmem:[%s755_s1 + $0x34] ss:$12 sps:$4 sm:$0xff]   ;;  %v588_v36 = vld [vmem:[%s755_s1 + $0x38] ss:$12 sps:$4 sm:$0xff]  }
   0xd   :  { %82 = vperm.xlu0 %555, %v68_v24   ;;  %92 = vperm.xlu1 %556, %v70_v25   ;;  %v585_v32 = vld [vmem:[%s755_s1 + $0x20] ss:$12 sps:$4 sm:$0xff]   ;;  %v590_v38 = vld [vmem:[%s755_s1 + $0x50] ss:$12 sps:$4 sm:$0xff]  }
   0xf   :  { %487 = vmatpush3.bf16.msra.mxu0 %v564_v8  ;;  %549 = vmatpush3.bf16.msra.mxu1 %v564_v8 }
  0x10   :  { %488 = vmatprep.subr.bf16.mxu0 %v565_v9  ;;  %542 = vmatprep.subr.bf16.mxu1 %v565_v9 }
  0x11   :  { %97 = vperm.xlu0 %555, %v71_v29   ;;  %102 = vperm.xlu1 %556, %v72_v30  }
  0x13   :  { %489 = vmatpush3.bf16.msra.mxu0 %v566_v10  ;;  %550 = vmatpush3.bf16.msra.mxu1 %v566_v10 }
  0x14   :  { %490 = vmatprep.subr.bf16.mxu0 %v567_v11  ;;  %543 = vmatprep.subr.bf16.mxu1 %v567_v11 }
  0x15   :  { %107 = vperm.xlu0 %555, %v73_v33   ;;  %112 = vperm.xlu1 %556, %v74_v34  }
  0x17   :  { %491 = vmatpush3.bf16.msra.mxu0 %v568_v14  ;;  %551 = vmatpush3.bf16.msra.mxu1 %v568_v14 }
  0x18   :  { %492 = vmatprep.subr.bf16.mxu0 %v569_v15  ;;  %544 = vmatprep.subr.bf16.mxu1 %v569_v15 }
  0x1b   :  { %493 = vmatpush3.bf16.msra.mxu0 %v570_v16  ;;  %552 = vmatpush3.bf16.msra.mxu1 %v570_v16 }
  0x1c   :  { %494 = vmatprep.subr.bf16.mxu0 %v571_v17  ;;  %545 = vmatprep.subr.bf16.mxu1 %v571_v17 }
  0x1f   :  { %495 = vmatpush3.bf16.msra.mxu0 %v572_v18  ;;  %553 = vmatpush3.bf16.msra.mxu1 %v572_v18 }
  0x20   :  { %526 = vmatprep.subr.bf16.mxu1 %v579_v21 }
  0x22   :  { %329 = vmatmul.mubr.bf16.vlgmr.msra.gmra.mxu0 %v573_v22  ;;  %353 = vmatmul.mubr.bf16.vlgmr.msra.gmra.mxu1 %v576_v23 }
  0x23   :  { %527 = vmatpush3.bf16.msra.mxu1 %v579_v21  ;;  %336 = vmatprep.mubr.bf16.mxu0 %v581_v26 }
  0x24   :  { %528 = vmatprep.subr.bf16.mxu1 %v580_v27  ;;  %530 = vmatprep.mubr.msk.bf16.mxu1 %vm283_vm0, %v583_v28 }
  0x27   :  { %529 = vmatpush3.bf16.msra.mxu1 %v580_v27 }
  0x2a   :  { %337 = vmatmul.mubr.bf16.gmra.mxu0 %v584_v31  ;;  %531 = vmatmul.mubr.msk.bf16.vlgmr.msra.gmra.mxu1 %vm283_vm0, %v585_v32 }
  0x2b   :  { %344 = vmatprep.mubr.bf16.mxu0 %v586_v35  ;;  %534 = vmatprep.mubr.msk.bf16.mxu1 %vm283_vm0, %v588_v36 }
  0x32   :  { %345 = vmatmul.mubr.bf16.gmra.mxu0 %v589_v37  ;;  %535 = vmatmul.mubr.msk.bf16.gmra.mxu1 %vm283_vm0, %v590_v38 }
  0x84   :  { %v78_v39 = vpop.permute.xlu0 %77  ;;  %v88_v40 = vpop.permute.xlu1 %87 }
  0x88   :  { %v83_v41 = vpop.permute.xlu0 %82  ;;  %v93_v46 = vpop.permute.xlu1 %92 }
  0x8c   :  { %v98_v49 = vpop.permute.xlu0 %97  ;;  %v103_v55 = vpop.permute.xlu1 %102 }
  0x90   :  { %v108_v61 = vpop.permute.xlu0 %107  ;;  %v113_v9 = vpop.permute.xlu1 %112 }
  0xe2   :  { %v496_v42 = vpop.f32.mrf.mxu0  ;;  %v514_v43 = vpop.f32.mrf.mxu1 }
  0xe4   :  { %v497_v44 = vpop.f32.mrf.mxu0  ;;  %v515_v45 = vpop.f32.mrf.mxu1 }
  0xe5   :  { %v498_v50 = vadd.f32 %v497_v44, %v496_v42  ;;  %v516_v58 = vadd.f32 %v515_v45, %v514_v43 }
  0xe6   :  { %v499_v47 = vpop.f32.mrf.mxu0  ;;  %v517_v48 = vpop.f32.mrf.mxu1 }
  0xe7   :  { %v331_v57 = vadd.f32 %v498_v50, %v78_v39  ;;  %v355_v5 = vadd.f32 %v516_v58, %v108_v61 }
  0xe8   :  { %v500_v51 = vpop.f32.mrf.mxu0  ;;  %v518_v52 = vpop.f32.mrf.mxu1 }
  0xe9   :  { %v501_v56 = vadd.f32 %v500_v51, %v499_v47  ;;  %v519_v8 = vadd.f32 %v518_v52, %v517_v48 }
  0xea   :  { %v502_v53 = vpop.f32.mrf.mxu0  ;;  %v532_v54 = vpop.f32.mrf.mxu1 }
  0xeb   :  { %v334_v4 = vadd.f32 %v501_v56, %v83_v41  ;;  %v358_v21 = vadd.f32 %v519_v8, %v113_v9 }
  0xec   :  { %v503_v59 = vpop.f32.mrf.mxu0  ;;  %v395_v60 = vpop.f32.mrf.mxu1 }
  0xed   :  { %v504_v62 = vadd.f32 %v503_v59, %v502_v53  ;;  %v396_v63 = vadd.f32 %v395_v60, %v331_v57 }
  0xee   :  { %v505_v0 = vpop.f32.mrf.mxu0  ;;  %v533_v1 = vpop.f32.mrf.mxu1 }
  0xef   :  { %v339_v2 = vadd.f32 %v504_v62, %v88_v40  ;;  %v426_v3 = vmax.f32 %v396_v63, 0.0 }
  0xf0   :  { %v506_v6 = vpop.f32.mrf.mxu0  ;;  %v398_v7 = vpop.f32.mrf.mxu1 }
  0xf1   :  { %v404_v10 = vadd.f32 %v532_v54, %v339_v2  ;;  %434 = vst [vmem:[%s757_s3] sm:$0xff] %v426_v3  ;;  %v507_v11 = vadd.f32 %v506_v6, %v505_v0  ;;  %v399_v12 = vadd.f32 %v398_v7, %v334_v4 }
  0xf2   :  { %v508_v13 = vpop.f32.mrf.mxu0  ;;  %v536_v14 = vpop.f32.mrf.mxu1 }
  0xf3   :  { %v428_v15 = vmax.f32 %v404_v10, 0.0  ;;  %v342_v16 = vadd.f32 %v507_v11, %v93_v46  ;;  %v427_v17 = vmax.f32 %v399_v12, 0.0  ;;  %v420_v18 = vadd.f32 %v536_v14, %v355_v5 }
  0xf4   :  { %v509_v19 = vpop.f32.mrf.mxu0  ;;  %v411_v20 = vpop.f32.mrf.mxu1 }
  0xf5   :  { %436 = vst [vmem:[%s757_s3 + $0x10] sm:$0xff] %v428_v15  ;;  %v407_v22 = vadd.f32 %v533_v1, %v342_v16  ;;  %435 = vst [vmem:[%s757_s3 + $0x8] sm:$0xff] %v427_v17  ;;  %v432_v23 = vmax.f32 %v420_v18, 0.0  ;;  %v510_v24 = vadd.f32 %v509_v19, %v508_v13 }
  0xf6   :  { %v511_v25 = vpop.f32.mrf.mxu0  ;;  %v537_v26 = vpop.f32.mrf.mxu1 }
  0xf7   :  { %v429_v27 = vmax.f32 %v407_v22, 0.0  ;;  %440 = vst [vmem:[%s757_s3 + $0x30] sm:$0xff] %v432_v23  ;;  %v347_v28 = vadd.f32 %v510_v24, %v98_v49  ;;  %v423_v29 = vadd.f32 %v537_v26, %v358_v21 }
  0xf8   :  { %v512_v30 = vpop.f32.mrf.mxu0  ;;  %v414_v36 = vpop.f32.mrf.mxu1 }
  0xf9   :  { %437 = vst [vmem:[%s757_s3 + $0x18] sm:$0xff] %v429_v27  ;;  %v412_v31 = vadd.f32 %v411_v20, %v347_v28  ;;  %v433_v32 = vmax.f32 %v423_v29, 0.0  ;;  %v513_v33 = vadd.f32 %v512_v30, %v511_v25 }
  0xfb   :  { %v430_v34 = vmax.f32 %v412_v31, 0.0  ;;  %441 = vst [vmem:[%s757_s3 + $0x38] sm:$0xff] %v433_v32  ;;  %v350_v35 = vadd.f32 %v513_v33, %v103_v55 }
  0xfd   :  { %438 = vst [vmem:[%s757_s3 + $0x20] sm:$0xff] %v430_v34  ;;  %v415_v37 = vadd.f32 %v414_v36, %v350_v35 }
  0xff   :  { %v431_v38 = vmax.f32 %v415_v37, 0.0 }
 0x101   :  { %439 = vst [vmem:[%s757_s3 + $0x28] sm:$0xff] %v431_v38 }

// kernel: net_forward.14
= control target key start
LH: loop header
LB: loop body
LE: loop exit
PB: predicated region body
PF: predicated region fallthrough
CT: control target
= control target key end

     0   :  { %v961_v1 = vmov 0   ;;  %vm478_vm0 = vcmask 523264   ;;  %s1234_s0 = inlined_call_operand.vmem [shape: bf16[576,128], index: 0, kind: input, shape index: {}]   ;;  %s1235_s1 = inlined_call_operand.vmem [shape: bf16[64,576], index: 1, kind: input, shape index: {}]   ;;  %s1236_s2 = inlined_call_operand.vmem [shape: f32[64,1], index: 2, kind: input, shape index: {}]   ;;  %s1237_s3 = inlined_call_operand.vmem [shape: f32[64,128], index: 3, kind: input, shape index: {}]   ;;  %s1238_s4 = inlined_call_operand.vmem [shape: f32[64,128], index: 4, kind: output, shape index: {}]  }
   0x1   :  { %v897_v0 = vld [vmem:[%s1234_s0 + $0x78] sm:$0xff]   ;;  %895 = vset.pattern.permute.xlu0 %v961_v1  ;;  %896 = vset.pattern.permute.xlu1 %v961_v1  ;;  %v901_v5 = vld [vmem:[%s1234_s0 + $0x70] sm:$0xff]   ;;  %v905_v9 = vld [vmem:[%s1234_s0 + $0x68] sm:$0xff]  }
   0x2   :  { %v898_v2 = vld [vmem:[%s1234_s0 + $0xf8] sm:$0xff]   ;;  %782 = vmatprep.subr.bf16.mxu0 %v897_v0  ;;  %v902_v6 = vld [vmem:[%s1234_s0 + $0xf0] sm:$0xff]   ;;  %v906_v10 = vld [vmem:[%s1234_s0 + $0xe8] sm:$0xff]  }
   0x3   :  { %v899_v3 = vld [vmem:[%s1234_s0 + $0x38] sm:$0xff]   ;;  %822 = vmatprep.subr.bf16.mxu1 %v898_v2  ;;  %v903_v7 = vld [vmem:[%s1234_s0 + $0x30] sm:$0xff]   ;;  %v907_v11 = vld [vmem:[%s1234_s0 + $0x28] sm:$0xff]  }
   0x4   :  { %v900_v4 = vld [vmem:[%s1234_s0 + $0xb8] sm:$0xff]   ;;  %783 = vmatpush3.bf16.msra.mxu0 %v899_v3  ;;  %v904_v8 = vld [vmem:[%s1234_s0 + $0xb0] sm:$0xff]   ;;  %v908_v12 = vld [vmem:[%s1234_s0 + $0xa8] sm:$0xff]  }
   0x5   :  { %823 = vmatpush3.bf16.msra.mxu1 %v900_v4  ;;  %784 = vmatprep.subr.bf16.mxu0 %v901_v5  ;;  %v909_v13 = vld [vmem:[%s1234_s0 + $0x60] sm:$0xff]   ;;  %v913_v17 = vld [vmem:[%s1234_s0 + $0x58] sm:$0xff]   ;;  %v917_v21 = vld [vmem:[%s1234_s0 + $0x50] sm:$0xff]  }
   0x6   :  { %824 = vmatprep.subr.bf16.mxu1 %v902_v6  ;;  %v910_v14 = vld [vmem:[%s1234_s0 + $0xe0] sm:$0xff]   ;;  %v914_v18 = vld [vmem:[%s1234_s0 + $0xd8] sm:$0xff]   ;;  %v918_v22 = vld [vmem:[%s1234_s0 + $0xd0] sm:$0xff]  }
   0x7   :  { %v911_v15 = vld [vmem:[%s1234_s0 + $0x20] sm:$0xff]   ;;  %v915_v19 = vld [vmem:[%s1234_s0 + $0x18] sm:$0xff]   ;;  %v919_v23 = vld [vmem:[%s1234_s0 + $0x10] sm:$0xff]  }
   0x8   :  { %785 = vmatpush3.bf16.msra.mxu0 %v903_v7  ;;  %v912_v16 = vld [vmem:[%s1234_s0 + $0xa0] sm:$0xff]   ;;  %v916_v20 = vld [vmem:[%s1234_s0 + $0x98] sm:$0xff]   ;;  %v920_v24 = vld [vmem:[%s1234_s0 + $0x90] sm:$0xff]  }
   0x9   :  { %825 = vmatpush3.bf16.msra.mxu1 %v904_v8  ;;  %786 = vmatprep.subr.bf16.mxu0 %v905_v9  ;;  %v921_v25 = vld [vmem:[%s1234_s0 + $0x48] sm:$0xff]   ;;  %v925_v29 = vld [vmem:[%s1234_s0 + $0x40] sm:$0xff]   ;;  %v935_v37 = vld [vmem:[%s1234_s0 + $0x118] sm:$0xff]  }
   0xa   :  { %826 = vmatprep.subr.bf16.mxu1 %v906_v10  ;;  %v922_v26 = vld [vmem:[%s1234_s0 + $0xc8] sm:$0xff]   ;;  %v926_v30 = vld [vmem:[%s1234_s0 + $0xc0] sm:$0xff]   ;;  %v942_v40 = vld [vmem:[%s1234_s0 + $0x110] sm:$0xff]  }
   0xb   :  { %v923_v27 = vld [vmem:[%s1234_s0 + $0x8] sm:$0xff]   ;;  %v927_v31 = vld [vmem:[%s1234_s0] sm:$0xff]   ;;  %v945_v44 = vld [vmem:[%s1235_s1 + $0x5c] ss:$20 sps:$4 sm:$0xff]  }
   0xc   :  { %787 = vmatpush3.bf16.msra.mxu0 %v907_v11  ;;  %v924_v28 = vld [vmem:[%s1234_s0 + $0x88] sm:$0xff]   ;;  %v928_v32 = vld [vmem:[%s1234_s0 + $0x80] sm:$0xff]   ;;  %v950_v49 = vld [vmem:[%s1235_s1 + $0x7c] ss:$20 sps:$4 sm:$0xff]  }
   0xd   :  { %827 = vmatpush3.bf16.msra.mxu1 %v908_v12  ;;  %788 = vmatprep.subr.bf16.mxu0 %v909_v13  ;;  %v929_v33 = vld [vmem:[%s1235_s1] ss:$20 sps:$4 sm:$0xff]   ;;  %v931_v34 = vld [vmem:[%s1235_s1 + $0x4] ss:$20 sps:$4 sm:$0xff]   ;;  %v932_v35 = vld [vmem:[%s1235_s1 + $0x8] ss:$20 sps:$4 sm:$0xff]  }
   0xe   :  { %828 = vmatprep.subr.bf16.mxu1 %v910_v14  ;;  %v934_v36 = vld [vmem:[%s1235_s1 + $0xc] ss:$20 sps:$4 sm:$0xff]   ;;  %523 = vmatprep.mubr.bf16.mxu0 %v931_v34  ;;  %v938_v39 = vld [vmem:[%s1235_s1 + $0x34] ss:$20 sps:$4 sm:$0xff]   ;;  %v941_v42 = vld [vmem:[%s1235_s1 + $0x30] ss:$20 sps:$4 sm:$0xff]  }
   0xf   :  { %588 = vmatprep.mubr.bf16.mxu1 %v934_v36  ;;  %v936_v38 = vld [vmem:[%s1235_s1 + $0x2c] ss:$20 sps:$4 sm:$0xff]   ;;  %v940_v41 = vld [vmem:[%s1235_s1 + $0x28] ss:$20 sps:$4 sm:$0xff]   ;;  %v947_v47 = vld [vmem:[%s1235_s1 + $0x50] ss:$20 sps:$4 sm:$0xff]  }
  0x10   :  { %789 = vmatpush3.bf16.msra.mxu0 %v911_v15  ;;  %v943_v43 = vld [vmem:[%s1235_s1 + $0x54] ss:$20 sps:$4 sm:$0xff]   ;;  %v956_v46 = vld [vmem:[%s1234_s0 + $0x100] sm:$0xff]   ;;  %v948_v48 = vld [vmem:[%s1235_s1 + $0x58] ss:$20 sps:$4 sm:$0xff]  }
  0x11   :  { %829 = vmatpush3.bf16.msra.mxu1 %v912_v16  ;;  %790 = vmatprep.subr.bf16.mxu0 %v913_v17  ;;  %v949_v45 = vld [vmem:[%s1234_s0 + $0x108] sm:$0xff]   ;;  %v952_v50 = vld [vmem:[%s1235_s1 + $0x84] ss:$20 sps:$4 sm:$0xff]   ;;  %v116_v52 = vld [vmem:[%s1236_s2 + $0x10] sm:$0xff] }
  0x12   :  { %830 = vmatprep.subr.bf16.mxu1 %v914_v18  ;;  %v114_v51 = vld [vmem:[%s1236_s2] sm:$0xff]  ;;  %v115_v53 = vld [vmem:[%s1236_s2 + $0x8] sm:$0xff]  ;;  %134 = vperm.xlu1 %896, %v116_v52   ;;  %v117_v54 = vld [vmem:[%s1236_s2 + $0x18] sm:$0xff] }
  0x13   :  { %124 = vperm.xlu0 %895, %v114_v51   ;;  %v954_v55 = vld [vmem:[%s1235_s1 + $0x78] ss:$20 sps:$4 sm:$0xff]   ;;  %v955_v56 = vld [vmem:[%s1235_s1 + $0x80] ss:$20 sps:$4 sm:$0xff]   ;;  %v957_v57 = vld [vmem:[%s1235_s1 + $0x10] ss:$20 sps:$4 sm:$0xff]  }
  0x14   :  { %791 = vmatpush3.bf16.msra.mxu0 %v915_v19  ;;  %v118_v58 = vld [vmem:[%s1236_s2 + $0x20] sm:$0xff]  ;;  %v119_v60 = vld [vmem:[%s1236_s2 + $0x28] sm:$0xff]  ;;  %v120_v61 = vld [vmem:[%s1236_s2 + $0x30] sm:$0xff] }
  0x15   :  { %831 = vmatpush3.bf16.msra.mxu1 %v916_v20  ;;  %792 = vmatprep.subr.bf16.mxu0 %v917_v21  ;;  %v958_v59 = vld [vmem:[%s1235_s1 + $0x60] ss:$20 sps:$4 sm:$0xff]   ;;  %v121_v62 = vld [vmem:[%s1236_s2 + $0x38] sm:$0xff] }
  0x16   :  { %832 = vmatprep.subr.bf16.mxu1 %v918_v22  ;;  %139 = vperm.xlu1 %896, %v117_v54   ;;  %v959_v63 = vld [vmem:[%s1235_s1 + $0x38] ss:$20 sps:$4 sm:$0xff]   ;;  %v960_v0 = vld [vmem:[%s1235_s1 + $0x88] ss:$20 sps:$4 sm:$0xff]  }
  0x17   :  { %129 = vperm.xlu0 %895, %v115_v53  }
  0x18   :  { %793 = vmatpush3.bf16.msra.mxu0 %v919_v23 }
  0x19   :  { %833 = vmatpush3.bf16.msra.mxu1 %v920_v24  ;;  %794 = vmatprep.subr.bf16.mxu0 %v921_v25 }
  0x1a   :  { %834 = vmatprep.subr.bf16.mxu1 %v922_v26  ;;  %149 = vperm.xlu1 %896, %v119_v60  }
  0x1b   :  { %144 = vperm.xlu0 %895, %v118_v58  }
  0x1c   :  { %795 = vmatpush3.bf16.msra.mxu0 %v923_v27 }
  0x1d   :  { %835 = vmatpush3.bf16.msra.mxu1 %v924_v28  ;;  %796 = vmatprep.subr.bf16.mxu0 %v925_v29 }
  0x1e   :  { %836 = vmatprep.subr.bf16.mxu1 %v926_v30  ;;  %159 = vperm.xlu1 %896, %v121_v62  }
  0x1f   :  { %154 = vperm.xlu0 %895, %v120_v61  }
  0x20   :  { %797 = vmatpush3.bf16.msra.mxu0 %v927_v31 }
  0x21   :  { %837 = vmatpush3.bf16.msra.mxu1 %v928_v32  ;;  %870 = vmatprep.subr.bf16.mxu0 %v935_v37 }
  0x22   :  { %886 = vmatprep.subr.bf16.mxu1 %v935_v37 }
  0x23   :  { %524 = vmatmul.mubr.bf16.vlgmr.msra.gmra.mxu0 %v929_v33 }
  0x24   :  { %589 = vmatmul.mubr.bf16.vlgmr.msra.gmra.mxu1 %v932_v35  ;;  %871 = vmatpush3.bf16.msra.mxu0 %v935_v37 }
  0x25   :  { %890 = vmatpush3.bf16.msra.mxu1 %v935_v37  ;;  %531 = vmatprep.mubr.bf16.mxu0 %v936_v38 }
  0x26   :  { %596 = vmatprep.mubr.bf16.mxu1 %v938_v39  ;;  %872 = vmatprep.subr.bf16.mxu0 %v942_v40 }
  0x27   :  { %887 = vmatprep.subr.bf16.mxu1 %v942_v40 }
  0x28   :  { %873 = vmatpush3.bf16.msra.mxu0 %v942_v40 }
  0x29   :  { %891 = vmatpush3.bf16.msra.mxu1 %v942_v40  ;;  %874 = vmatprep.subr.bf16.mxu0 %v949_v45 }
  0x2a   :  { %888 = vmatprep.subr.bf16.mxu1 %v949_v45 }
  0x2b   :  { %532 = vmatmul.mubr.bf16.gmra.mxu0 %v940_v41 }
  0x2c   :  { %597 = vmatmul.mubr.bf16.gmra.mxu1 %v941_v42  ;;  %539 = vmatprep.mubr.bf16.mxu0 %v943_v43 }
  0x2d   :  { %604 = vmatprep.mubr.bf16.mxu1 %v945_v44  ;;  %875 = vmatpush3.bf16.msra.mxu0 %v949_v45 }
  0x2e   :  { %892 = vmatpush3.bf16.msra.mxu1 %v949_v45  ;;  %876 = vmatprep.subr.bf16.mxu0 %v956_v46 }
  0x2f   :  { %889 = vmatprep.subr.bf16.mxu1 %v956_v46 }
  0x31   :  { %877 = vmatpush3.bf16.msra.mxu0 %v956_v46 }
  0x32   :  { %893 = vmatpush3.bf16.msra.mxu1 %v956_v46 }
  0x33   :  { %540 = vmatmul.mubr.bf16.gmra.mxu0 %v947_v47 }
  0x34   :  { %605 = vmatmul.mubr.bf16.gmra.mxu1 %v948_v48  ;;  %547 = vmatprep.mubr.bf16.mxu0 %v950_v49 }
  0x35   :  { %612 = vmatprep.mubr.bf16.mxu1 %v952_v50 }
  0x3b   :  { %548 = vmatmul.mubr.bf16.gmra.mxu0 %v954_v55 }
  0x3c   :  { %613 = vmatmul.mubr.bf16.gmra.mxu1 %v955_v56  ;;  %878 = vmatprep.mubr.msk.bf16.mxu0 %vm478_vm0, %v957_v57 }
  0x3d   :  { %882 = vmatprep.mubr.msk.bf16.mxu1 %vm478_vm0, %v958_v59 }
  0x43   :  { %879 = vmatmul.mubr.msk.bf16.vlgmr.msra.gmra.mxu0 %vm478_vm0, %v959_v63 }
  0x44   :  { %883 = vmatmul.mubr.msk.bf16.vlgmr.msra.gmra.mxu1 %vm478_vm0, %v960_v0 }
  0x8d   :  { %v135_v16 = vpop.permute.xlu1 %134 }
  0x8e   :  { %v125_v13 = vpop.permute.xlu0 %124 }
  0x91   :  { %v140_v24 = vpop.permute.xlu1 %139 }
  0x92   :  { %v130_v21 = vpop.permute.xlu0 %129 }
  0x95   :  { %v150_v35 = vpop.permute.xlu1 %149 }
  0x96   :  { %v145_v27 = vpop.permute.xlu0 %144 }
  0x99   :  { %v160_v60 = vpop.permute.xlu1 %159 }
  0x9a   :  { %v155_v43 = vpop.permute.xlu0 %154 }
  0xe3   :  { %v798_v1 = vpop.f32.mrf.mxu0 }
  0xe4   :  { %v838_v2 = vpop.f32.mrf.mxu1 }
  0xe5   :  { %v799_v3 = vpop.f32.mrf.mxu0 }
  0xe6   :  { %v839_v4 = vpop.f32.mrf.mxu1  ;;  %v800_v31 = vadd.f32 %v799_v3, %v798_v1 }
  0xe7   :  { %v801_v5 = vpop.f32.mrf.mxu0  ;;  %v840_v49 = vadd.f32 %v839_v4, %v838_v2 }
  0xe8   :  { %v1183_v6 = vpop.f32.mrf.mxu1  ;;  %v526_v41 = vadd.f32 %v800_v31, %v125_v13  ;;  %v700_v13 = vld [vmem:[%s1237_s3 + $0x30] sm:$0xff] }
  0xe9   :  { %v802_v7 = vpop.f32.mrf.mxu0 }
  0xea   :  { %v842_v8 = vpop.f32.mrf.mxu1  ;;  %v803_v42 = vadd.f32 %v802_v7, %v801_v5  ;;  %v591_v62 = vadd.f32 %v840_v49, %v526_v41  ;;  %v696_v7 = vld [vmem:[%s1237_s3 + $0x10] sm:$0xff] }
  0xeb   :  { %v804_v9 = vpop.f32.mrf.mxu0  ;;  %v843_v2 = vadd.f32 %v842_v8, %v1183_v6  ;;  %v694_v6 = vld [vmem:[%s1237_s3] sm:$0xff] }
  0xec   :  { %v844_v10 = vpop.f32.mrf.mxu1  ;;  %v529_v58 = vadd.f32 %v803_v42, %v130_v21 }
  0xed   :  { %v805_v11 = vpop.f32.mrf.mxu0 }
  0xee   :  { %v845_v12 = vpop.f32.mrf.mxu1  ;;  %v806_v29 = vadd.f32 %v805_v11, %v804_v9 }
  0xef   :  { %v807_v14 = vpop.f32.mrf.mxu0  ;;  %v846_v45 = vadd.f32 %v845_v12, %v844_v10 }
  0xf0   :  { %v847_v15 = vpop.f32.mrf.mxu1  ;;  %v534_v37 = vadd.f32 %v806_v29, %v135_v16 }
  0xf1   :  { %v808_v17 = vpop.f32.mrf.mxu0 }
  0xf2   :  { %v848_v18 = vpop.f32.mrf.mxu1  ;;  %v809_v38 = vadd.f32 %v808_v17, %v807_v14  ;;  %v599_v56 = vadd.f32 %v846_v45, %v534_v37 }
  0xf3   :  { %v810_v19 = vpop.f32.mrf.mxu0  ;;  %v849_v63 = vadd.f32 %v848_v18, %v847_v15 }
  0xf4   :  { %v850_v20 = vpop.f32.mrf.mxu1  ;;  %v537_v53 = vadd.f32 %v809_v38, %v140_v24 }
  0xf5   :  { %v811_v22 = vpop.f32.mrf.mxu0 }
  0xf6   :  { %v851_v23 = vpop.f32.mrf.mxu1  ;;  %v812_v34 = vadd.f32 %v811_v22, %v810_v19  ;;  %v602_v16 = vadd.f32 %v849_v63, %v537_v53 }
  0xf7   :  { %v813_v25 = vpop.f32.mrf.mxu0  ;;  %v852_v59 = vadd.f32 %v851_v23, %v850_v20  ;;  %v698_v23 = vld [vmem:[%s1237_s3 + $0x20] sm:$0xff] }
  0xf8   :  { %v853_v26 = vpop.f32.mrf.mxu1  ;;  %v542_v50 = vadd.f32 %v812_v34, %v145_v27  ;;  %v594_v27 = vadd.f32 %v843_v2, %v529_v58 }
  0xf9   :  { %v814_v28 = vpop.f32.mrf.mxu0 }
  0xfa   :  { %v854_v30 = vpop.f32.mrf.mxu1  ;;  %v815_v51 = vadd.f32 %v814_v28, %v813_v25  ;;  %v607_v11 = vadd.f32 %v852_v59, %v542_v50 }
  0xfb   :  { %v816_v32 = vpop.f32.mrf.mxu0  ;;  %v855_v18 = vadd.f32 %v854_v30, %v853_v26  ;;  %v697_v26 = vld [vmem:[%s1237_s3 + $0x18] sm:$0xff] }
  0xfc   :  { %v856_v33 = vpop.f32.mrf.mxu1  ;;  %v545_v4 = vadd.f32 %v815_v51, %v150_v35  ;;  %v701_v35 = vld [vmem:[%s1237_s3 + $0x38] sm:$0xff] }
  0xfd   :  { %v817_v36 = vpop.f32.mrf.mxu0 }
  0xfe   :  { %v818_v39 = vadd.f32 %v817_v36, %v816_v32  ;;  %v857_v40 = vpop.f32.mrf.mxu1  ;;  %v610_v32 = vadd.f32 %v855_v18, %v545_v4 }
  0xff   :  { %v819_v44 = vpop.f32.mrf.mxu0  ;;  %v858_v47 = vadd.f32 %v857_v40, %v856_v33  ;;  %v695_v40 = vld [vmem:[%s1237_s3 + $0x8] sm:$0xff] }
 0x100   :  { %v550_v46 = vadd.f32 %v818_v39, %v155_v43  ;;  %v859_v48 = vpop.f32.mrf.mxu1 }
 0x101   :  { %v820_v52 = vpop.f32.mrf.mxu0 }
 0x102   :  { %v821_v54 = vadd.f32 %v820_v52, %v819_v44  ;;  %v860_v55 = vpop.f32.mrf.mxu1  ;;  %v615_v57 = vadd.f32 %v858_v47, %v550_v46  ;;  %v699_v44 = vld [vmem:[%s1237_s3 + $0x28] sm:$0xff] }
 0x103   :  { %v880_v61 = vpop.f32.mrf.mxu0  ;;  %v861_v1 = vadd.f32 %v860_v55, %v859_v48 }
 0x104   :  { %v553_v0 = vadd.f32 %v821_v54, %v160_v60  ;;  %v664_v3 = vadd.f32 %v880_v61, %v599_v56  ;;  %v884_v5 = vpop.f32.mrf.mxu1 }
 0x105   :  { %v680_v9 = vadd.f32 %v884_v5, %v615_v57  ;;  %v655_v10 = vpop.f32.mrf.mxu0 }
 0x106   :  { %v688_v12 = vmax.f32 %v664_v3, 0.0  ;;  %v656_v14 = vadd.f32 %v655_v10, %v591_v62  ;;  %v671_v15 = vpop.f32.mrf.mxu1  ;;  %v618_v17 = vadd.f32 %v861_v1, %v553_v0 }
 0x107   :  { %v692_v19 = vmax.f32 %v680_v9, 0.0  ;;  %v672_v8 = vadd.f32 %v671_v15, %v607_v11  ;;  %v881_v20 = vpop.f32.mrf.mxu0 }
 0x108   :  { %v704_v21 = vadd.f32 %v696_v7, %v688_v12  ;;  %v686_v22 = vmax.f32 %v656_v14, 0.0  ;;  %v667_v24 = vadd.f32 %v881_v20, %v602_v16  ;;  %v885_v25 = vpop.f32.mrf.mxu1 }
 0x109   :  { %v708_v28 = vadd.f32 %v700_v13, %v692_v19  ;;  %v690_v29 = vmax.f32 %v672_v8, 0.0  ;;  %v683_v30 = vadd.f32 %v885_v25, %v618_v17  ;;  %v658_v31 = vpop.f32.mrf.mxu0 }
 0x10a   :  { %712 = vst [vmem:[%s1238_s4 + $0x10] sm:$0xff] %v704_v21  ;;  %v702_v33 = vadd.f32 %v694_v6, %v686_v22  ;;  %v689_v34 = vmax.f32 %v667_v24, 0.0  ;;  %v659_v36 = vadd.f32 %v658_v31, %v594_v27  ;;  %v674_v37 = vpop.f32.mrf.mxu1 }
 0x10b   :  { %716 = vst [vmem:[%s1238_s4 + $0x30] sm:$0xff] %v708_v28  ;;  %v706_v38 = vadd.f32 %v698_v23, %v690_v29  ;;  %v693_v39 = vmax.f32 %v683_v30, 0.0  ;;  %v675_v41 = vadd.f32 %v674_v37, %v610_v32 }
 0x10c   :  { %710 = vst [vmem:[%s1238_s4] sm:$0xff] %v702_v33  ;;  %v705_v42 = vadd.f32 %v697_v26, %v689_v34  ;;  %v687_v43 = vmax.f32 %v659_v36, 0.0 }
 0x10d   :  { %714 = vst [vmem:[%s1238_s4 + $0x20] sm:$0xff] %v706_v38  ;;  %v709_v45 = vadd.f32 %v701_v35, %v693_v39  ;;  %v691_v46 = vmax.f32 %v675_v41, 0.0 }
 0x10e   :  { %713 = vst [vmem:[%s1238_s4 + $0x18] sm:$0xff] %v705_v42  ;;  %v703_v47 = vadd.f32 %v695_v40, %v687_v43 }
 0x10f   :  { %717 = vst [vmem:[%s1238_s4 + $0x38] sm:$0xff] %v709_v45  ;;  %v707_v48 = vadd.f32 %v699_v44, %v691_v46 }
 0x110   :  { %711 = vst [vmem:[%s1238_s4 + $0x8] sm:$0xff] %v703_v47 }
 0x111   :  { %715 = vst [vmem:[%s1238_s4 + $0x28] sm:$0xff] %v707_v48 }

// kernel: net_forward.15
= control target key start
LH: loop header
LB: loop body
LE: loop exit
PB: predicated region body
PF: predicated region fallthrough
CT: control target
= control target key end

     0   :  { %vm78_vm0 = vcmask 517120   ;;  %vm743_vm1 = vcmask 523264   ;;  %vm672_vm2 = vcmask 1041409   ;;  %vm674_vm3 = vcmask 1042434   ;;  %s1445_s0 = inlined_call_operand.vmem [shape: f32[64,2,64], index: 0, kind: input, shape index: {}]   ;;  %s1446_s1 = inlined_call_operand.vmem [shape: f32[10,64], index: 1, kind: input, shape index: {}]   ;;  %s1447_s2 = inlined_call_operand.vmem [shape: f32[10,1], index: 2, kind: input, shape index: {}]   ;;  %s1448_s3 = inlined_call_operand.vmem [shape: f32[10,2], index: 3, kind: output, shape index: {}]  }
   0x1   :  { %v72_v0 = vld [vmem:[%s1445_s0 + $0x74] sm:$0x3]  ;;  %v70_v1 = vld [vmem:[%s1445_s0 + $0x70] sm:$0x3]  ;;  %v71_v2 = vld [vmem:[%s1445_s0 + $0x72] sm:$0x3] }
   0x2   :  { %v253_v3 = vsel %vm78_vm0, %v72_v0, 0.0  ;;  %v247_v4 = vsel %vm78_vm0, %v70_v1, 0.0  ;;  %v62_v5 = vld [vmem:[%s1445_s0 + $0x60] sm:$0x3]  ;;  %v250_v6 = vsel %vm78_vm0, %v71_v2, 0.0  ;;  %vm676_vm4 = vcmask 1043459  }
   0x3   :  { %254 = vadd.xlane.f32.xlu1 %v253_v3  ;;  %248 = vadd.xlane.f32.xlu0 %v247_v4  ;;  %v223_v7 = vsel %vm78_vm0, %v62_v5, 0.0  ;;  %v63_v8 = vld [vmem:[%s1445_s0 + $0x62] sm:$0x3]  ;;  %v73_v9 = vld [vmem:[%s1445_s0 + $0x76] sm:$0x3]  ;;  %vm678_vm5 = vcmask 1044484  }
   0x4   :  { %v226_v10 = vsel %vm78_vm0, %v63_v8, 0.0  ;;  %v256_v11 = vsel %vm78_vm0, %v73_v9, 0.0  ;;  %v64_v12 = vld [vmem:[%s1445_s0 + $0x64] sm:$0x3]  ;;  %v74_v13 = vld [vmem:[%s1445_s0 + $0x78] sm:$0x3] }
   0x5   :  { %v229_v14 = vsel %vm78_vm0, %v64_v12, 0.0  ;;  %v259_v15 = vsel %vm78_vm0, %v74_v13, 0.0  ;;  %v55_v16 = vld [vmem:[%s1445_s0 + $0x52] sm:$0x3]  ;;  %v54_v17 = vld [vmem:[%s1445_s0 + $0x50] sm:$0x3] }
   0x6   :  { %v75_v18 = vld [vmem:[%s1445_s0 + $0x7a] sm:$0x3]  ;;  %v65_v19 = vld [vmem:[%s1445_s0 + $0x66] sm:$0x3]  ;;  %v66_v20 = vld [vmem:[%s1445_s0 + $0x68] sm:$0x3] }
   0x7   :  { %251 = vadd.xlane.f32.xlu0 %v250_v6  ;;  %224 = vadd.xlane.f32.xlu1 %v223_v7  ;;  %v56_v21 = vld [vmem:[%s1445_s0 + $0x54] sm:$0x3]  ;;  %v76_v22 = vld [vmem:[%s1445_s0 + $0x7c] sm:$0x3]  ;;  %v46_v23 = vld [vmem:[%s1445_s0 + $0x40] sm:$0x3] }
   0x8   :  { %v47_v24 = vld [vmem:[%s1445_s0 + $0x42] sm:$0x3]  ;;  %v57_v25 = vld [vmem:[%s1445_s0 + $0x56] sm:$0x3]  ;;  %v202_v26 = vsel %vm78_vm0, %v55_v16, 0.0  ;;  %v199_v27 = vsel %vm78_vm0, %v54_v17, 0.0 }
   0x9   :  { %v262_v28 = vsel %vm78_vm0, %v75_v18, 0.0  ;;  %v232_v29 = vsel %vm78_vm0, %v65_v19, 0.0  ;;  %v235_v30 = vsel %vm78_vm0, %v66_v20, 0.0  ;;  %v205_v31 = vsel %vm78_vm0, %v56_v21, 0.0  ;;  %v31_v36 = vld [vmem:[%s1445_s0 + $0x22] sm:$0x3] }
   0xa   :  { %v957_v32 = vsel %vm78_vm0, %v76_v22, 0.0  ;;  %v960_v33 = vsel %vm78_vm0, %v46_v23, 0.0  ;;  %v963_v34 = vsel %vm78_vm0, %v47_v24, 0.0  ;;  %v966_v35 = vsel %vm78_vm0, %v57_v25, 0.0  ;;  %v41_v37 = vld [vmem:[%s1445_s0 + $0x36] sm:$0x3] }
   0xb   :  { %227 = vadd.xlane.f32.xlu0 %v226_v10  ;;  %257 = vadd.xlane.f32.xlu1 %v256_v11  ;;  %v975_v38 = vsel %vm78_vm0, %v31_v36, 0.0  ;;  %v978_v39 = vsel %vm78_vm0, %v41_v37, 0.0  ;;  %v51_v40 = vld [vmem:[%s1445_s0 + $0x4a] sm:$0x3]  ;;  %v61_v41 = vld [vmem:[%s1445_s0 + $0x5e] sm:$0x3] }
   0xc   :  { %v987_v42 = vsel %vm78_vm0, %v51_v40, 0.0  ;;  %v990_v43 = vsel %vm78_vm0, %v61_v41, 0.0  ;;  %v32_v44 = vld [vmem:[%s1445_s0 + $0x24] sm:$0x3]  ;;  %v42_v45 = vld [vmem:[%s1445_s0 + $0x38] sm:$0x3] }
   0xd   :  { %v999_v46 = vsel %vm78_vm0, %v32_v44, 0.0  ;;  %v1002_v47 = vsel %vm78_vm0, %v42_v45, 0.0  ;;  %v52_v48 = vld [vmem:[%s1445_s0 + $0x4c] sm:$0x3]  ;;  %v22_v49 = vld [vmem:[%s1445_s0 + $0x10] sm:$0x3] }
   0xe   :  { %v1011_v50 = vsel %vm78_vm0, %v52_v48, 0.0  ;;  %v1014_v51 = vsel %vm78_vm0, %v22_v49, 0.0  ;;  %v23_v52 = vld [vmem:[%s1445_s0 + $0x12] sm:$0x3]  ;;  %v33_v53 = vld [vmem:[%s1445_s0 + $0x26] sm:$0x3] }
   0xf   :  { %230 = vadd.xlane.f32.xlu0 %v229_v14  ;;  %260 = vadd.xlane.f32.xlu1 %v259_v15  ;;  %v1023_v54 = vsel %vm78_vm0, %v23_v52, 0.0  ;;  %v1026_v55 = vsel %vm78_vm0, %v33_v53, 0.0  ;;  %v43_v56 = vld [vmem:[%s1445_s0 + $0x3a] sm:$0x3]  ;;  %v53_v57 = vld [vmem:[%s1445_s0 + $0x4e] sm:$0x3] }
  0x10   :  { %v1035_v58 = vsel %vm78_vm0, %v43_v56, 0.0  ;;  %v1038_v59 = vsel %vm78_vm0, %v53_v57, 0.0  ;;  %v24_v60 = vld [vmem:[%s1445_s0 + $0x14] sm:$0x3]  ;;  %v34_v61 = vld [vmem:[%s1445_s0 + $0x28] sm:$0x3] }
  0x11   :  { %v1047_v62 = vsel %vm78_vm0, %v24_v60, 0.0  ;;  %v1050_v63 = vsel %vm78_vm0, %v34_v61, 0.0  ;;  %v44_v0 = vld [vmem:[%s1445_s0 + $0x3c] sm:$0x3]  ;;  %v14_v1 = vld [vmem:[%s1445_s0] sm:$0x3] }
  0x12   :  { %v1059_v2 = vsel %vm78_vm0, %v44_v0, 0.0  ;;  %v1062_v3 = vsel %vm78_vm0, %v14_v1, 0.0  ;;  %v15_v4 = vld [vmem:[%s1445_s0 + $0x2] sm:$0x3]  ;;  %v25_v5 = vld [vmem:[%s1445_s0 + $0x16] sm:$0x3] }
  0x13   :  { %203 = vadd.xlane.f32.xlu1 %v202_v26  ;;  %200 = vadd.xlane.f32.xlu0 %v199_v27  ;;  %v1071_v6 = vsel %vm78_vm0, %v15_v4, 0.0  ;;  %v1074_v7 = vsel %vm78_vm0, %v25_v5, 0.0  ;;  %v35_v8 = vld [vmem:[%s1445_s0 + $0x2a] sm:$0x3]  ;;  %v45_v9 = vld [vmem:[%s1445_s0 + $0x3e] sm:$0x3] }
  0x14   :  { %v1083_v10 = vsel %vm78_vm0, %v35_v8, 0.0  ;;  %v1086_v11 = vsel %vm78_vm0, %v45_v9, 0.0  ;;  %v16_v12 = vld [vmem:[%s1445_s0 + $0x4] sm:$0x3]  ;;  %v26_v13 = vld [vmem:[%s1445_s0 + $0x18] sm:$0x3] }
  0x15   :  { %v1095_v14 = vsel %vm78_vm0, %v16_v12, 0.0  ;;  %v1098_v15 = vsel %vm78_vm0, %v26_v13, 0.0  ;;  %v36_v16 = vld [vmem:[%s1445_s0 + $0x2c] sm:$0x3]  ;;  %v17_v17 = vld [vmem:[%s1445_s0 + $0x6] sm:$0x3] }
  0x16   :  { %v1107_v18 = vsel %vm78_vm0, %v36_v16, 0.0  ;;  %v1110_v19 = vsel %vm78_vm0, %v17_v17, 0.0  ;;  %v27_v20 = vld [vmem:[%s1445_s0 + $0x1a] sm:$0x3]  ;;  %v37_v21 = vld [vmem:[%s1445_s0 + $0x2e] sm:$0x3] }
  0x17   :  { %263 = vadd.xlane.f32.xlu1 %v262_v28  ;;  %233 = vadd.xlane.f32.xlu0 %v232_v29  ;;  %v1119_v22 = vsel %vm78_vm0, %v27_v20, 0.0  ;;  %v1122_v23 = vsel %vm78_vm0, %v37_v21, 0.0  ;;  %v18_v24 = vld [vmem:[%s1445_s0 + $0x8] sm:$0x3]  ;;  %v28_v25 = vld [vmem:[%s1445_s0 + $0x1c] sm:$0x3] }
  0x18   :  { %v1133_v26 = vsel %vm78_vm0, %v18_v24, 0.0  ;;  %v1136_v27 = vsel %vm78_vm0, %v28_v25, 0.0  ;;  %v19_v28 = vld [vmem:[%s1445_s0 + $0xa] sm:$0x3]  ;;  %v29_v29 = vld [vmem:[%s1445_s0 + $0x1e] sm:$0x3] }
  0x19   :  { %v67_v36 = vld [vmem:[%s1445_s0 + $0x6a] sm:$0x3]  ;;  %v77_v37 = vld [vmem:[%s1445_s0 + $0x7e] sm:$0x3]  ;;  %v48_v48 = vld [vmem:[%s1445_s0 + $0x44] sm:$0x3] }
  0x1a   :  { %v238_v44 = vsel %vm78_vm0, %v67_v36, 0.0  ;;  %v268_v45 = vsel %vm78_vm0, %v77_v37, 0.0  ;;  %v58_v49 = vld [vmem:[%s1445_s0 + $0x58] sm:$0x3]  ;;  %v181_v52 = vsel %vm78_vm0, %v48_v48, 0.0  ;;  %vm680_vm6 = vcmask 1045509  }
  0x1b   :  { %236 = vadd.xlane.f32.xlu1 %v235_v30  ;;  %206 = vadd.xlane.f32.xlu0 %v205_v31  ;;  %v1145_v30 = vsel %vm78_vm0, %v19_v28, 0.0  ;;  %v1148_v31 = vsel %vm78_vm0, %v29_v29, 0.0  ;;  %v38_v53 = vld [vmem:[%s1445_s0 + $0x30] sm:$0x3]  ;;  %v39_v60 = vld [vmem:[%s1445_s0 + $0x32] sm:$0x3] }
  0x1c   :  { %v151_v57 = vsel %vm78_vm0, %v38_v53, 0.0  ;;  %v49_v61 = vld [vmem:[%s1445_s0 + $0x46] sm:$0x3]  ;;  %v154_v0 = vsel %vm78_vm0, %v39_v60, 0.0  ;;  %v59_v4 = vld [vmem:[%s1445_s0 + $0x5a] sm:$0x3] }
  0x1d   :  { %v184_v1 = vsel %vm78_vm0, %v49_v61, 0.0  ;;  %v69_v5 = vld [vmem:[%s1445_s0 + $0x6e] sm:$0x3]  ;;  %v214_v8 = vsel %vm78_vm0, %v59_v4, 0.0  ;;  %v40_v12 = vld [vmem:[%s1445_s0 + $0x34] sm:$0x3] }
  0x1e   :  { %v244_v9 = vsel %vm78_vm0, %v69_v5, 0.0  ;;  %v50_v13 = vld [vmem:[%s1445_s0 + $0x48] sm:$0x3]  ;;  %v157_v16 = vsel %vm78_vm0, %v40_v12, 0.0  ;;  %v60_v20 = vld [vmem:[%s1445_s0 + $0x5c] sm:$0x3] }
  0x1f   :  { %266 = vadd.xlane.f32.xlu0 %v957_v32  ;;  %176 = vadd.xlane.f32.xlu1 %v960_v33  ;;  %v20_v32 = vld [vmem:[%s1445_s0 + $0xc] sm:$0x3]  ;;  %v21_v33 = vld [vmem:[%s1445_s0 + $0xe] sm:$0x3]  ;;  %v187_v17 = vsel %vm78_vm0, %v50_v13, 0.0  ;;  %v217_v24 = vsel %vm78_vm0, %v60_v20, 0.0 }
  0x20   :  { %v1163_v40 = vsel %vm78_vm0, %v20_v32, 0.0  ;;  %v1166_v41 = vsel %vm78_vm0, %v21_v33, 0.0  ;;  %v30_v21 = vld [vmem:[%s1445_s0 + $0x20] sm:$0x3]  ;;  %vm682_vm7 = vcmask 1046534   ;;  %vm684_vm8 = vcmask 1047559  }
  0x21   :  { %v127_v25 = vsel %vm78_vm0, %v30_v21, 0.0  ;;  %vm827_vm9 = vcmask 9216   ;;  %vm825_vm10 = vcmask 15360  }
  0x23   :  { %179 = vadd.xlane.f32.xlu0 %v963_v34  ;;  %209 = vadd.xlane.f32.xlu1 %v966_v35  ;;  %v211_v34 = vsel %vm78_vm0, %v58_v49, 0.0  ;;  %v68_v35 = vld [vmem:[%s1445_s0 + $0x6c] sm:$0x3] }
  0x24   :  { %v241_v56 = vsel %vm78_vm0, %v68_v35, 0.0 }
  0x27   :  { %239 = vadd.xlane.f32.xlu0 %v238_v44  ;;  %269 = vadd.xlane.f32.xlu1 %v268_v45 }
  0x2b   :  { %182 = vadd.xlane.f32.xlu0 %v181_v52  ;;  %212 = vadd.xlane.f32.xlu1 %v211_v34 }
  0x2f   :  { %242 = vadd.xlane.f32.xlu0 %v241_v56  ;;  %152 = vadd.xlane.f32.xlu1 %v151_v57 }
  0x33   :  { %155 = vadd.xlane.f32.xlu0 %v154_v0  ;;  %185 = vadd.xlane.f32.xlu1 %v184_v1 }
  0x37   :  { %215 = vadd.xlane.f32.xlu0 %v214_v8  ;;  %245 = vadd.xlane.f32.xlu1 %v244_v9 }
  0x3b   :  { %158 = vadd.xlane.f32.xlu0 %v157_v16  ;;  %188 = vadd.xlane.f32.xlu1 %v187_v17 }
  0x3f   :  { %218 = vadd.xlane.f32.xlu0 %v217_v24  ;;  %128 = vadd.xlane.f32.xlu1 %v127_v25 }
  0x43   :  { %131 = vadd.xlane.f32.xlu0 %v975_v38  ;;  %161 = vadd.xlane.f32.xlu1 %v978_v39 }
  0x47   :  { %191 = vadd.xlane.f32.xlu0 %v987_v42  ;;  %221 = vadd.xlane.f32.xlu1 %v990_v43  ;;  %v336_v42 = vld [vmem:[%s1446_s1] sm:$0xff] }
  0x48   :  { %861 = vmatprep.mubr.msk.f32.mxu0 %vm743_vm1, %v336_v42 }
  0x4b   :  { %134 = vadd.xlane.f32.xlu0 %v999_v46  ;;  %164 = vadd.xlane.f32.xlu1 %v1002_v47  ;;  %v867_v47 = vmov 0  }
  0x4c   :  { %866 = vset.pattern.permute.xlu1 %v867_v47  ;;  %865 = vset.pattern.permute.xlu0 %v867_v47 }
  0x4f   :  { %194 = vadd.xlane.f32.xlu0 %v1011_v50  ;;  %104 = vadd.xlane.f32.xlu1 %v1014_v51  ;;  %v339_v50 = vld [vmem:[%s1447_s2 + $0x8] sm:$0x3]  ;;  %v338_v51 = vld [vmem:[%s1447_s2] sm:$0xff] }
  0x53   :  { %107 = vadd.xlane.f32.xlu0 %v1023_v54  ;;  %137 = vadd.xlane.f32.xlu1 %v1026_v55 }
  0x57   :  { %167 = vadd.xlane.f32.xlu0 %v1035_v58  ;;  %197 = vadd.xlane.f32.xlu1 %v1038_v59 }
  0x5b   :  { %110 = vadd.xlane.f32.xlu0 %v1047_v62  ;;  %140 = vadd.xlane.f32.xlu1 %v1050_v63 }
  0x5f   :  { %170 = vadd.xlane.f32.xlu0 %v1059_v2  ;;  %80 = vadd.xlane.f32.xlu1 %v1062_v3  ;;  %v414_v2 = vlaneseq }
  0x63   :  { %83 = vadd.xlane.f32.xlu0 %v1071_v6  ;;  %113 = vadd.xlane.f32.xlu1 %v1074_v7  ;;  %v415_v7 = vand.u32 127, %v414_v2 }
  0x67   :  { %143 = vadd.xlane.f32.xlu0 %v1083_v10  ;;  %173 = vadd.xlane.f32.xlu1 %v1086_v11  ;;  %v417_v10 = vshrl.u32 %v414_v2, 7 }
  0x6b   :  { %86 = vadd.xlane.f32.xlu0 %v1095_v14  ;;  %116 = vadd.xlane.f32.xlu1 %v1098_v15 }
  0x6f   :  { %146 = vadd.xlane.f32.xlu0 %v1107_v18  ;;  %89 = vadd.xlane.f32.xlu1 %v1110_v19  ;;  %v1270_v18 = vsub.s32 %v415_v7, %v417_v10 }
  0x73   :  { %119 = vadd.xlane.f32.xlu0 %v1119_v22  ;;  %149 = vadd.xlane.f32.xlu1 %v1122_v23 }
  0x77   :  { %92 = vadd.xlane.f32.xlu0 %v1133_v26  ;;  %122 = vadd.xlane.f32.xlu1 %v1136_v27 }
  0x7b   :  { %95 = vadd.xlane.f32.xlu0 %v1145_v30  ;;  %125 = vadd.xlane.f32.xlu1 %v1148_v31 }
  0x7f   :  { %98 = vadd.xlane.f32.xlu0 %v1163_v40  ;;  %101 = vadd.xlane.f32.xlu1 %v1166_v41 }
  0x8c   :  { %v255_v38 = vpop.xlane.xlu1 %254  ;;  %v249_v39 = vpop.xlane.xlu0 %248 }
  0x8d   :  { %v328_v19 = vmul.f32 0.015625, %v249_v39  ;;  %v330_v28 = vmul.f32 0.015625, %v255_v38 }
  0x8f   :  { %v643_v30 = vrot.slane %v328_v19, %v1270_v18  ;;  %v651_v41 = vrot.slane %v330_v28, %v1270_v18 }
  0x90   :  { %v252_v43 = vpop.xlane.xlu0 %251  ;;  %v1255_v46 = vpop.xlane.xlu1 %224  ;;  %347 = vperm.xlu1 %866, %v339_v50  }
  0x91   :  { %v329_v15 = vmul.f32 0.015625, %v252_v43  ;;  %v320_v13 = vmul.f32 0.015625, %v1255_v46 }
  0x93   :  { %v647_v26 = vrot.slane %v329_v15, %v1270_v18  ;;  %v611_v42 = vrot.slane %v320_v13, %v1270_v18 }
  0x94   :  { %v228_v54 = vpop.xlane.xlu0 %227  ;;  %v258_v55 = vpop.xlane.xlu1 %257 }
  0x95   :  { %342 = vperm.xlu0 %865, %v338_v51   ;;  %v331_v27 = vmul.f32 0.015625, %v258_v55  ;;  %v728_v37 = vsel %vm672_vm2, %v647_v26, %v643_v30  ;;  %v321_v5 = vmul.f32 0.015625, %v228_v54 }
  0x96   :  { %v729_v48 = vsel %vm674_vm3, %v651_v41, %v728_v37 }
  0x97   :  { %v655_v40 = vrot.slane %v331_v27, %v1270_v18  ;;  %v615_v20 = vrot.slane %v321_v5, %v1270_v18 }
  0x98   :  { %v231_v58 = vpop.xlane.xlu0 %230  ;;  %v261_v59 = vpop.xlane.xlu1 %260 }
  0x99   :  { %v332_v29 = vmul.f32 0.015625, %v261_v59  ;;  %v730_v35 = vsel %vm676_vm4, %v655_v40, %v729_v48  ;;  %v322_v8 = vmul.f32 0.015625, %v231_v58  ;;  %v721_v50 = vsel %vm672_vm2, %v615_v20, %v611_v42 }
  0x9b   :  { %v659_v44 = vrot.slane %v332_v29, %v1270_v18  ;;  %v619_v24 = vrot.slane %v322_v8, %v1270_v18 }
  0x9c   :  { %v1264_v62 = vpop.xlane.xlu1 %203  ;;  %v1266_v63 = vpop.xlane.xlu0 %200 }
  0x9d   :  { %v731_v56 = vsel %vm678_vm5, %v659_v44, %v730_v35  ;;  %v722_v51 = vsel %vm674_vm3, %v619_v24, %v721_v50  ;;  %v312_v26 = vmul.f32 0.015625, %v1266_v63 }
  0x9f   :  { %v579_v37 = vrot.slane %v312_v26, %v1270_v18 }
  0xa0   :  { %v264_v3 = vpop.xlane.xlu1 %263  ;;  %v234_v6 = vpop.xlane.xlu0 %233 }
  0xa1   :  { %v333_v31 = vmul.f32 0.015625, %v264_v3  ;;  %v323_v16 = vmul.f32 0.015625, %v234_v6 }
  0xa3   :  { %v663_v45 = vrot.slane %v333_v31, %v1270_v18  ;;  %v623_v43 = vrot.slane %v323_v16, %v1270_v18 }
  0xa4   :  { %v237_v11 = vpop.xlane.xlu1 %236  ;;  %v1268_v14 = vpop.xlane.xlu0 %206 }
  0xa5   :  { %v732_v60 = vsel %vm680_vm6, %v663_v45, %v731_v56  ;;  %v324_v17 = vmul.f32 0.015625, %v237_v11  ;;  %v723_v59 = vsel %vm676_vm4, %v623_v43, %v722_v51  ;;  %v314_v27 = vmul.f32 0.015625, %v1268_v14 }
  0xa7   :  { %v627_v47 = vrot.slane %v324_v17, %v1270_v18  ;;  %v587_v41 = vrot.slane %v314_v27, %v1270_v18 }
  0xa8   :  { %v267_v22 = vpop.xlane.xlu0 %266  ;;  %v1272_v23 = vpop.xlane.xlu1 %176 }
  0xa9   :  { %v334_v32 = vmul.f32 0.015625, %v267_v22  ;;  %v724_v3 = vsel %vm678_vm5, %v627_v47, %v723_v59  ;;  %v313_v22 = vmul.f32 0.015625, %v1264_v62  ;;  %v304_v20 = vmul.f32 0.015625, %v1272_v23 }
  0xab   :  { %v667_v49 = vrot.slane %v334_v32, %v1270_v18  ;;  %v583_v32 = vrot.slane %v313_v22, %v1270_v18 }
  0xac   :  { %v1276_v33 = vpop.xlane.xlu0 %179  ;;  %v1278_v36 = vpop.xlane.xlu1 %209 }
  0xad   :  { %v733_v1 = vsel %vm682_vm7, %v667_v49, %v732_v60  ;;  %v315_v30 = vmul.f32 0.015625, %v1278_v36  ;;  %v714_v48 = vsel %vm672_vm2, %v583_v32, %v579_v37 }
  0xae   :  { %v715_v49 = vsel %vm674_vm3, %v587_v41, %v714_v48 }
  0xaf   :  { %v591_v45 = vrot.slane %v315_v30, %v1270_v18 }
  0xb0   :  { %v240_v52 = vpop.xlane.xlu0 %239  ;;  %v270_v34 = vpop.xlane.xlu1 %269 }
  0xb1   :  { %v335_v53 = vmul.f32 0.015625, %v270_v34  ;;  %v325_v21 = vmul.f32 0.015625, %v240_v52 }
  0xb3   :  { %v671_v57 = vrot.slane %v335_v53, %v1270_v18  ;;  %v631_v46 = vrot.slane %v325_v21, %v1270_v18  ;;  %v716_v53 = vsel %vm676_vm4, %v591_v45, %v715_v49 }
  0xb4   :  { %v1291_v61 = vpop.xlane.xlu0 %182  ;;  %v213_v0 = vpop.xlane.xlu1 %212 }
  0xb5   :  { %v734_v4 = vsel %vm684_vm8, %v671_v57, %v733_v1  ;;  %v725_v7 = vsel %vm680_vm6, %v631_v46, %v724_v3  ;;  %v316_v31 = vmul.f32 0.015625, %v213_v0  ;;  %v306_v13 = vmul.f32 0.015625, %v1291_v61 }
  0xb6   :  { %845 = vmatprep.subr.mxu0 %v734_v4 }
  0xb7   :  { %846 = vmatpush3.msra.mxu0 %v734_v4  ;;  %v595_v14 = vrot.slane %v316_v31, %v1270_v18  ;;  %v555_v43 = vrot.slane %v306_v13, %v1270_v18 }
  0xb8   :  { %v243_v9 = vpop.xlane.xlu0 %242  ;;  %v1295_v12 = vpop.xlane.xlu1 %152 }
  0xb9   :  { %v326_v25 = vmul.f32 0.015625, %v243_v9  ;;  %v717_v57 = vsel %vm678_vm5, %v595_v14, %v716_v53  ;;  %v305_v9 = vmul.f32 0.015625, %v1276_v33  ;;  %v547_v33 = vrot.slane %v304_v20, %v1270_v18 }
  0xba   :  { %v296_v32 = vmul.f32 0.015625, %v1295_v12 }
  0xbb   :  { %v635_v54 = vrot.slane %v326_v25, %v1270_v18  ;;  %v551_v25 = vrot.slane %v305_v9, %v1270_v18 }
  0xbc   :  { %v1300_v38 = vpop.xlane.xlu0 %155  ;;  %v186_v39 = vpop.xlane.xlu1 %185 }
  0xbd   :  { %v726_v15 = vsel %vm682_vm7, %v635_v54, %v725_v7  ;;  %v307_v21 = vmul.f32 0.015625, %v186_v39  ;;  %v707_v54 = vsel %vm672_vm2, %v551_v25, %v547_v33  ;;  %v297_v27 = vmul.f32 0.015625, %v1300_v38 }
  0xbe   :  { %v708_v39 = vsel %vm674_vm3, %v555_v43, %v707_v54  ;;  %v515_v38 = vrot.slane %v296_v32, %v1270_v18 }
  0xbf   :  { %v559_v61 = vrot.slane %v307_v21, %v1270_v18  ;;  %v519_v41 = vrot.slane %v297_v27, %v1270_v18 }
  0xc0   :  { %v216_v55 = vpop.xlane.xlu0 %215  ;;  %v246_v58 = vpop.xlane.xlu1 %245 }
  0xc1   :  { %v327_v2 = vmul.f32 0.015625, %v246_v58  ;;  %v317_v40 = vmul.f32 0.015625, %v216_v55 }
  0xc3   :  { %v639_v6 = vrot.slane %v327_v2, %v1270_v18  ;;  %v599_v36 = vrot.slane %v317_v40, %v1270_v18  ;;  %v709_v2 = vsel %vm676_vm4, %v559_v61, %v708_v39 }
  0xc4   :  { %v1313_v10 = vpop.xlane.xlu0 %158  ;;  %v189_v11 = vpop.xlane.xlu1 %188 }
  0xc5   :  { %v727_v19 = vsel %vm684_vm8, %v639_v6, %v726_v15  ;;  %v718_v0 = vsel %vm680_vm6, %v599_v36, %v717_v57  ;;  %v308_v24 = vmul.f32 0.015625, %v189_v11 }
  0xc6   :  { %847 = vmatprep.subr.mxu0 %v727_v19 }
  0xc7   :  { %848 = vmatpush3.msra.mxu0 %v727_v19  ;;  %v563_v51 = vrot.slane %v308_v24, %v1270_v18 }
  0xc8   :  { %v219_v28 = vpop.xlane.xlu0 %218  ;;  %v1320_v29 = vpop.xlane.xlu1 %128 }
  0xc9   :  { %v318_v44 = vmul.f32 0.015625, %v219_v28  ;;  %v710_v6 = vsel %vm678_vm5, %v563_v51, %v709_v2  ;;  %v298_v28 = vmul.f32 0.015625, %v1313_v10  ;;  %v288_v20 = vmul.f32 0.015625, %v1320_v29 }
  0xcb   :  { %v603_v52 = vrot.slane %v318_v44, %v1270_v18  ;;  %v523_v45 = vrot.slane %v298_v28, %v1270_v18 }
  0xcc   :  { %v1326_v62 = vpop.xlane.xlu0 %131  ;;  %v162_v63 = vpop.xlane.xlu1 %161 }
  0xcd   :  { %v719_v5 = vsel %vm682_vm7, %v603_v52, %v718_v0  ;;  %v299_v37 = vmul.f32 0.015625, %v162_v63  ;;  %v700_v52 = vsel %vm672_vm2, %v519_v41, %v515_v38  ;;  %v289_v0 = vmul.f32 0.015625, %v1326_v62 }
  0xce   :  { %v701_v63 = vsel %vm674_vm3, %v523_v45, %v700_v52 }
  0xcf   :  { %v527_v49 = vrot.slane %v299_v37, %v1270_v18 }
  0xd0   :  { %v192_v34 = vpop.xlane.xlu0 %191  ;;  %v222_v35 = vpop.xlane.xlu1 %221 }
  0xd1   :  { %v319_v56 = vmul.f32 0.015625, %v222_v35  ;;  %v309_v42 = vmul.f32 0.015625, %v192_v34 }
  0xd3   :  { %v607_v60 = vrot.slane %v319_v56, %v1270_v18  ;;  %v567_v23 = vrot.slane %v309_v42, %v1270_v18  ;;  %v702_v56 = vsel %vm676_vm4, %v527_v49, %v701_v63  ;;  %v487_v42 = vrot.slane %v289_v0, %v1270_v18 }
  0xd4   :  { %v1338_v1 = vpop.xlane.xlu0 %134  ;;  %v165_v4 = vpop.xlane.xlu1 %164 }
  0xd5   :  { %v720_v8 = vsel %vm684_vm8, %v607_v60, %v719_v5  ;;  %v711_v11 = vsel %vm680_vm6, %v567_v23, %v710_v6  ;;  %v300_v40 = vmul.f32 0.015625, %v165_v4 }
  0xd6   :  { %849 = vmatprep.subr.mxu0 %v720_v8 }
  0xd7   :  { %850 = vmatpush3.msra.mxu0 %v720_v8  ;;  %v531_v10 = vrot.slane %v300_v40, %v1270_v18  ;;  %v290_v8 = vmul.f32 0.015625, %v1338_v1  ;;  %v483_v1 = vrot.slane %v288_v20, %v1270_v18 }
  0xd8   :  { %v195_v16 = vpop.xlane.xlu0 %194  ;;  %v1344_v17 = vpop.xlane.xlu1 %104 }
  0xd9   :  { %v310_v47 = vmul.f32 0.015625, %v195_v16  ;;  %v703_v60 = vsel %vm678_vm5, %v531_v10, %v702_v56  ;;  %v491_v43 = vrot.slane %v290_v8, %v1270_v18 }
  0xdb   :  { %v571_v55 = vrot.slane %v310_v47, %v1270_v18 }
  0xdc   :  { %v1349_v50 = vpop.xlane.xlu0 %107  ;;  %v138_v46 = vpop.xlane.xlu1 %137 }
  0xdd   :  { %v712_v22 = vsel %vm682_vm7, %v571_v55, %v711_v11  ;;  %v291_v21 = vmul.f32 0.015625, %v138_v46  ;;  %v693_v46 = vsel %vm672_vm2, %v487_v42, %v483_v1  ;;  %v281_v54 = vmul.f32 0.015625, %v1349_v50 }
  0xde   :  { %v694_v39 = vsel %vm674_vm3, %v491_v43, %v693_v46  ;;  %v280_v55 = vmul.f32 0.015625, %v1344_v17 }
  0xdf   :  { %v495_v61 = vrot.slane %v291_v21, %v1270_v18  ;;  %v455_v50 = vrot.slane %v281_v54, %v1270_v18 }
  0xe0   :  { %v168_v58 = vpop.xlane.xlu0 %167  ;;  %v198_v59 = vpop.xlane.xlu1 %197  ;;  %v451_v17 = vrot.slane %v280_v55, %v1270_v18 }
  0xe1   :  { %v311_v3 = vmul.f32 0.015625, %v198_v59  ;;  %v301_v44 = vmul.f32 0.015625, %v168_v58  ;;  %v695_v6 = vsel %vm676_vm4, %v495_v61, %v694_v39 }
  0xe2   :  { %v686_v10 = vsel %vm672_vm2, %v455_v50, %v451_v17 }
  0xe3   :  { %v575_v7 = vrot.slane %v311_v3, %v1270_v18  ;;  %v535_v12 = vrot.slane %v301_v44, %v1270_v18 }
  0xe4   :  { %v111_v15 = vpop.xlane.xlu0 %110  ;;  %v141_v19 = vpop.xlane.xlu1 %140 }
  0xe5   :  { %v713_v26 = vsel %vm684_vm8, %v575_v7, %v712_v22  ;;  %v704_v5 = vsel %vm680_vm6, %v535_v12, %v703_v60  ;;  %v292_v25 = vmul.f32 0.015625, %v141_v19  ;;  %v282_v58 = vmul.f32 0.015625, %v111_v15 }
  0xe6   :  { %851 = vmatprep.subr.mxu0 %v713_v26 }
  0xe7   :  { %852 = vmatpush3.msra.mxu0 %v713_v26  ;;  %v499_v29 = vrot.slane %v292_v25, %v1270_v18  ;;  %v459_v15 = vrot.slane %v282_v58, %v1270_v18 }
  0xe8   :  { %v171_v30 = vpop.xlane.xlu0 %170  ;;  %v1366_v31 = vpop.xlane.xlu1 %80 }
  0xe9   :  { %v302_v14 = vmul.f32 0.015625, %v171_v30  ;;  %v696_v19 = vsel %vm678_vm5, %v499_v29, %v695_v6  ;;  %v687_v12 = vsel %vm674_vm3, %v459_v15, %v686_v10 }
  0xeb   :  { %v539_v34 = vrot.slane %v302_v14, %v1270_v18 }
  0xec   :  { %v84_v48 = vpop.xlane.xlu0 %83  ;;  %v114_v36 = vpop.xlane.xlu1 %113 }
  0xed   :  { %v705_v16 = vsel %vm682_vm7, %v539_v34, %v704_v5  ;;  %v283_v7 = vmul.f32 0.015625, %v114_v36  ;;  %v273_v30 = vmul.f32 0.015625, %v84_v48  ;;  %v272_v36 = vmul.f32 0.015625, %v1366_v31 }
  0xef   :  { %v463_v41 = vrot.slane %v283_v7, %v1270_v18  ;;  %v423_v63 = vrot.slane %v273_v30, %v1270_v18  ;;  %v419_v0 = vrot.slane %v272_v36, %v1270_v18 }
  0xf0   :  { %v144_v35 = vpop.xlane.xlu0 %143  ;;  %v174_v53 = vpop.xlane.xlu1 %173 }
  0xf1   :  { %v303_v57 = vmul.f32 0.015625, %v174_v53  ;;  %v293_v62 = vmul.f32 0.015625, %v144_v35  ;;  %v688_v31 = vsel %vm676_vm4, %v463_v41, %v687_v12 }
  0xf3   :  { %v543_v4 = vrot.slane %v303_v57, %v1270_v18  ;;  %v503_v23 = vrot.slane %v293_v62, %v1270_v18 }
  0xf4   :  { %v87_v9 = vpop.xlane.xlu0 %86  ;;  %v117_v13 = vpop.xlane.xlu1 %116 }
  0xf5   :  { %v706_v24 = vsel %vm684_vm8, %v543_v4, %v705_v16  ;;  %v284_v22 = vmul.f32 0.015625, %v117_v13  ;;  %v697_v28 = vsel %vm680_vm6, %v503_v23, %v696_v19  ;;  %v274_v44 = vmul.f32 0.015625, %v87_v9  ;;  %v337_v23 = vld [vmem:[%s1446_s1 + $0x8] sm:$0x3] }
  0xf6   :  { %853 = vmatprep.subr.mxu0 %v706_v24  ;;  %v673_v16 = vsel %vm672_vm2, %v423_v63, %v419_v0 }
  0xf7   :  { %854 = vmatpush3.msra.mxu0 %v706_v24  ;;  %v467_v38 = vrot.slane %v284_v22, %v1270_v18  ;;  %v427_v56 = vrot.slane %v274_v44, %v1270_v18 }
  0xf8   :  { %v147_v47 = vpop.xlane.xlu0 %146  ;;  %v90_v33 = vpop.xlane.xlu1 %89 }
  0xf9   :  { %v294_v51 = vmul.f32 0.015625, %v147_v47  ;;  %v275_v49 = vmul.f32 0.015625, %v90_v33  ;;  %v689_v4 = vsel %vm678_vm5, %v467_v38, %v688_v31  ;;  %v675_v42 = vsel %vm674_vm3, %v427_v56, %v673_v16 }
  0xfb   :  { %v507_v59 = vrot.slane %v294_v51, %v1270_v18  ;;  %v431_v5 = vrot.slane %v275_v49, %v1270_v18 }
  0xfc   :  { %v120_v2 = vpop.xlane.xlu0 %119  ;;  %v150_v3 = vpop.xlane.xlu1 %149 }
  0xfd   :  { %v295_v11 = vmul.f32 0.015625, %v150_v3  ;;  %v285_v26 = vmul.f32 0.015625, %v120_v2  ;;  %v698_v40 = vsel %vm682_vm7, %v507_v59, %v697_v28  ;;  %v677_v33 = vsel %vm676_vm4, %v431_v5, %v675_v42 }
  0xff   :  { %v511_v27 = vrot.slane %v295_v11, %v1270_v18  ;;  %v471_v48 = vrot.slane %v285_v26, %v1270_v18 }
 0x100   :  { %v93_v32 = vpop.xlane.xlu0 %92  ;;  %v123_v37 = vpop.xlane.xlu1 %122 }
 0x101   :  { %v286_v45 = vmul.f32 0.015625, %v123_v37  ;;  %v699_v14 = vsel %vm684_vm8, %v511_v27, %v698_v40  ;;  %v276_v52 = vmul.f32 0.015625, %v93_v32  ;;  %v690_v13 = vsel %vm680_vm6, %v471_v48, %v689_v4 }
 0x102   :  { %855 = vmatprep.subr.mxu0 %v699_v14 }
 0x103   :  { %856 = vmatpush3.msra.mxu0 %v699_v14  ;;  %v475_v34 = vrot.slane %v286_v45, %v1270_v18  ;;  %v435_v8 = vrot.slane %v276_v52, %v1270_v18 }
 0x104   :  { %v96_v35 = vpop.xlane.xlu0 %95  ;;  %v126_v53 = vpop.xlane.xlu1 %125 }
 0x105   :  { %v277_v57 = vmul.f32 0.015625, %v96_v35  ;;  %v287_v60 = vmul.f32 0.015625, %v126_v53  ;;  %v691_v25 = vsel %vm682_vm7, %v475_v34, %v690_v13  ;;  %v679_v1 = vsel %vm678_vm5, %v435_v8, %v677_v33 }
 0x107   :  { %v479_v9 = vrot.slane %v287_v60, %v1270_v18  ;;  %v439_v20 = vrot.slane %v277_v57, %v1270_v18 }
 0x108   :  { %v99_v21 = vpop.xlane.xlu0 %98  ;;  %v102_v24 = vpop.xlane.xlu1 %101 }
 0x109   :  { %v278_v62 = vmul.f32 0.015625, %v99_v21  ;;  %v279_v43 = vmul.f32 0.015625, %v102_v24  ;;  %v692_v47 = vsel %vm684_vm8, %v479_v9, %v691_v25  ;;  %v681_v29 = vsel %vm680_vm6, %v439_v20, %v679_v1 }
 0x10a   :  { %857 = vmatprep.subr.mxu0 %v692_v47 }
 0x10b   :  { %v443_v61 = vrot.slane %v278_v62, %v1270_v18  ;;  %v447_v51 = vrot.slane %v279_v43, %v1270_v18  ;;  %858 = vmatpush3.msra.mxu0 %v692_v47 }
 0x10c   :  { %v348_v39 = vpop.permute.xlu1 %347 }
 0x10d   :  { %v683_v46 = vsel %vm682_vm7, %v443_v61, %v681_v29 }
 0x10e   :  { %v685_v54 = vsel %vm684_vm8, %v447_v51, %v683_v46 }
 0x10f   :  { %859 = vmatprep.subr.mxu0 %v685_v54 }
 0x110   :  { %860 = vmatpush3.msra.mxu0 %v685_v54  ;;  %v343_v58 = vpop.permute.xlu0 %342 }
 0x111   :  { %862 = vmatmul.mubr.msk.f32.vlgmr.msra.gmra.mxu0 %vm743_vm1, %v337_v23 }
 0x1d1   :  { %v863_v55 = vpop.f32.mrf.mxu0 }
 0x1d2   :  { %v822_v18 = vadd.f32 %v863_v55, %v348_v39 }
 0x1d3   :  { %v816_v59 = vpop.f32.mrf.mxu0 }
 0x1d4   :  { %828 = vst.msk [vmem:[%s1448_s3 + $0x8] sm:$0x3] %vm827_vm9, %v822_v18  ;;  %v817_v2 = vadd.f32 %v816_v59, %v343_v58 }
 0x1d6   :  { %826 = vst.msk [vmem:[%s1448_s3] sm:$0xff] %vm825_vm10, %v817_v2 }

</bundles_post_ra>
